<compile_context>
chip_gen: v7x
topology: tpu7x:2x2x1
jax: 0.10.0
libtpu: 0.0.40
codegen_flags: <defaults>
</compile_context>

<pallas_src>
import jax
import jax.numpy as jnp
import numpy as np
from jax.experimental import pallas as pl
from jax.experimental.pallas import tpu as pltpu

_EPS = 1e-5


def _banded_kx_weights(w, W):
    """w: (3, 3, Cin, Cout) HWIO -> (3, W*Cin, W*Cout) per-ky band matrices.

    band[ky][wi*Cin + ci, wo*Cout + co] = w[ky, wi - wo + 1, ci, co] when the
    kx tap is in range, else 0: the horizontal contraction AND the horizontal
    zero-padding are folded into the matrix, so the matmul lhs is the
    *unpadded* row slab (K = W*Cin, no (W+2) padding, no lane offsets).
    """
    kh, kw, Cin, Cout = w.shape
    wi = jnp.arange(W)[:, None]                       # input column
    wo = jnp.arange(W)[None, :]                       # output column
    kx = wi - wo + 1
    valid = (kx >= 0) & (kx < kw)
    g = w[:, jnp.clip(kx, 0, kw - 1)]                 # (3, W, W, Cin, Cout)
    g = jnp.where(valid[None, :, :, None, None], g, 0.0)
    return jnp.transpose(g, (0, 1, 3, 2, 4)).reshape(kh, W * Cin, W * Cout)


def _packed_bands(w, W):
    """Band matrices for the 2-image-rows-per-lane-row packed layout.

    Lane l = rhalf*W*C + w*C + c (rhalf in {0,1} picks which packed row).
    out_super_row[s] = Q[s-1] @ B0 + Q[s] @ B1 + Q[s+1] @ B2, where Q is the
    vertically zero-padded packed slab.  Returns (3, 2*W*C, 2*W*C).
    """
    bx = _banded_kx_weights(w, W)                     # (3, WC, WC)
    WC = bx.shape[1]
    Z = jnp.zeros((WC, WC), bx.dtype)
    B0 = jnp.block([[Z,     Z],
                    [bx[0], Z]])                      # row above the pair
    B1 = jnp.block([[bx[1], bx[0]],
                    [bx[2], bx[1]]])                  # same super-row
    B2 = jnp.block([[Z, bx[2]],
                    [Z, Z]])                          # row below the pair
    return jnp.stack([B0, B1, B2])


@jax.jit
def residual_block(x_nhwc, w1, beta1, w2, beta2):
    """x_nhwc: (N, H, W, C) f32; w*: (3, 3, Cin, Cout) HWIO; beta*: (C,)."""
    N, H, W, C = x_nhwc.shape
    assert H % 2 == 0, "2-rows-per-lane-row packing needs even H"
    assert (2 * W) & (2 * W - 1) == 0, "lane butterfly needs 2W a power of two"
    L = 2 * W * C              # packed lane width (128 at the toy shape)
    Hs = H // 2                # super-rows (packed row pairs) per image
    Hp = Hs + 2                # + one zero-pad super-row above and below
    R = ((N * Hp + 7) // 8) * 8    # slab rows, rounded to a sublane tile

    # ---- wrapper-side layout plumbing (weights + packing, no compute) ----
    bands1 = _packed_bands(w1, W)                     # (3, L, L)
    bands2 = _packed_bands(w2, W)
    b1 = jnp.tile(beta1, 2 * W).reshape(1, L)         # lane l holds channel l%C
    b2 = jnp.tile(beta2, 2 * W).reshape(1, L)

    xp = x_nhwc.reshape(N, Hs, L)                     # pack 2 image rows -> lanes
    xp = jnp.pad(xp, ((0, 0), (1, 1), (0, 0)))        # vertical zero pad / image
    xp = jnp.pad(xp.reshape(N * Hp, L), ((0, R - N * Hp), (0, 0)))

    rows = np.arange(R)
    interior = (rows < N * Hp) & (rows % Hp >= 1) & (rows % Hp <= Hs)
    mask = jnp.asarray(interior, jnp.float32).reshape(R, 1)

    inv_cnt = 1.0 / float(N * H * W)

    def conv_bn(q, bands_ref, beta_row, mask_col):
        # 3x3 conv: kx + channel contraction via 3 banded matmuls (M=R, K=N=L);
        # ky taps combined with sublane rolls of the per-tap results.  Pad rows
        # of q are zero, so rolled-in rows contribute nothing on interior rows.
        # (At scaled shapes cast matmul operands to bf16 on v6e/v7x, keep f32 acc.)
        acc = jnp.zeros((R, L), jnp.float32)
        for tap, sh in ((0, 1), (1, 0), (2, R - 1)):   # shift = (1 - ky) mod R
            y = jnp.dot(q, bands_ref[tap], preferred_element_type=jnp.float32)
            acc = acc + (pltpu.roll(y, shift=sh, axis=0) if sh else y)
        acc = acc * mask_col                           # zero garbage on pad rows
        # BatchNorm (training) stats over (N, H, W) per channel, single pass.
        # TODO(synk): use mean-subtracted variance (two-pass) before scaling
        # N*H*W up; one-pass E[x^2]-mean^2 cancels catastrophically at scale.
        s1 = jnp.sum(acc, axis=0, keepdims=True)       # (1, L)
        s2 = jnp.sum(acc * acc, axis=0, keepdims=True)
        step = C                                       # lane butterfly: every lane
        while step < L:                                # ends with its channel total
            s1 = s1 + pltpu.roll(s1, shift=step, axis=1)
            s2 = s2 + pltpu.roll(s2, shift=step, axis=1)
            step *= 2
        mean = s1 * inv_cnt
        var = s2 * inv_cnt - mean * mean               # biased batch variance
        # gamma is frozen at 1 in CenteredBatchNorm2d; only beta is applied.
        return (acc - mean) * jax.lax.rsqrt(var + _EPS) + beta_row

    def kernel(x_ref, bd1_ref, bd2_ref, b1_ref, b2_ref, mask_ref, out_ref):
        q = x_ref[...]                                 # padded packed input (R, L)
        m = mask_ref[...]                              # (R, 1), 1.0 on interior
        # stage 1: conv1 + BN1 + relu; mask keeps pad rows zero for conv2.
        h1 = jnp.maximum(conv_bn(q, bd1_ref, b1_ref[...], m), 0.0) * m
        # stage 2: conv2 + BN2 + residual + relu (pad rows dropped by wrapper).
        y = conv_bn(h1, bd2_ref, b2_ref[...], m) + q
        out_ref[...] = jnp.maximum(y, 0.0)

    vmem = pl.BlockSpec(memory_space=pltpu.MemorySpace.VMEM)
    out = pl.pallas_call(
        kernel,
        out_shape=jax.ShapeDtypeStruct((R, L), jnp.float32),
        in_specs=[vmem] * 6,
        out_specs=vmem,
    )(xp, bands1, bands2, b1, b2, mask)

    # unpack: drop pad rows, restore (N, H, W, C)
    return out[:N * Hp].reshape(N, Hp, L)[:, 1:Hs + 1].reshape(N, H, W, C)


# ----------------------------- reference ------------------------------------


def residual_block_reference(x, w1, beta1, w2, beta2):
    def conv(h, w):
        return jax.lax.conv_general_dilated(
            h, w, window_strides=(1, 1), padding=((1, 1), (1, 1)),
            dimension_numbers=("NHWC", "HWIO", "NHWC"))

    def bn(h, beta):
        mean = jnp.mean(h, axis=(0, 1, 2), keepdims=True)
        var = jnp.mean((h - mean) ** 2, axis=(0, 1, 2), keepdims=True)
        return (h - mean) * jax.lax.rsqrt(var + _EPS) + beta

    h = jnp.maximum(bn(conv(x, w1), beta1), 0.0)
    h = bn(conv(h, w2), beta2) + x
    return jnp.maximum(h, 0.0)


# ------------------------------- main ----------------------------------------


if __name__ == "__main__":
    N, C, H, W = 2, 4, 16, 16
    key = jax.random.PRNGKey(0)
    k1, k2, k3, k4, k5 = jax.random.split(key, 5)

    # Deterministic synthetic parameters (shapes per module __init__):
    #   conv weights: (Cout, Cin, 3, 3), no bias; BN: gamma fixed to 1, beta (C,).
    x_nchw = jax.random.normal(k1, (N, C, H, W), jnp.float32)
    fan_in = C * 9
    w1_oihw = jax.random.normal(k2, (C, C, 3, 3), jnp.float32) / np.sqrt(fan_in)
    w2_oihw = jax.random.normal(k3, (C, C, 3, 3), jnp.float32) / np.sqrt(fan_in)
    beta1 = jax.random.normal(k4, (C,), jnp.float32) * 0.1
    beta2 = jax.random.normal(k5, (C,), jnp.float32) * 0.1

    # Layout conversion (glue): NCHW -> NHWC, OIHW -> HWIO.
    x_nhwc = jnp.transpose(x_nchw, (0, 2, 3, 1))
    w1 = jnp.transpose(w1_oihw, (2, 3, 1, 0))
    w2 = jnp.transpose(w2_oihw, (2, 3, 1, 0))

    ref = residual_block_reference(x_nhwc, w1, beta1, w2, beta2)
    out = jax.block_until_ready(residual_block(x_nhwc, w1, beta1, w2, beta2))
    assert out.shape == (N, H, W, C)
    assert jnp.allclose(out, ref, atol=1e-4, rtol=1e-4), "mismatch vs reference"
    print("KERNEL_OK")
</pallas_src>

<mosaic_0001>
module attributes {stable_mosaic.version = 11 : i64} {
  func.func @kernel(%arg0: memref<24x128xf32, #tpu.memory_space<vmem>>, %arg1: memref<3x128x128xf32, #tpu.memory_space<vmem>>, %arg2: memref<3x128x128xf32, #tpu.memory_space<vmem>>, %arg3: memref<1x128xf32, #tpu.memory_space<vmem>>, %arg4: memref<1x128xf32, #tpu.memory_space<vmem>>, %arg5: memref<24x1xf32, #tpu.memory_space<vmem>>, %arg6: memref<24x128xf32, #tpu.memory_space<vmem>>) attributes {dimension_semantics = [], scalar_prefetch = 0 : i64, scratch_operands = 0 : i64, tpu.core_type = #tpu.core_type<tc>} {
    %c0 = arith.constant 0 : index
    %c0_0 = arith.constant 0 : index
    %0 = vector.load %arg0[%c0, %c0_0] : memref<24x128xf32, #tpu.memory_space<vmem>>, vector<24x128xf32>
    %c0_1 = arith.constant 0 : index
    %c0_2 = arith.constant 0 : index
    %1 = vector.load %arg5[%c0_1, %c0_2] : memref<24x1xf32, #tpu.memory_space<vmem>>, vector<24x1xf32>
    %c0_3 = arith.constant 0 : index
    %c0_4 = arith.constant 0 : index
    %2 = vector.load %arg3[%c0_3, %c0_4] : memref<1x128xf32, #tpu.memory_space<vmem>>, vector<1x128xf32>
    %cst = arith.constant 0.000000e+00 : f32
    %3 = vector.broadcast %cst : f32 to vector<24x128xf32>
    %c0_5 = arith.constant 0 : index
    %c0_6 = arith.constant 0 : index
    %c0_7 = arith.constant 0 : index
    %4 = vector.load %arg1[%c0_5, %c0_6, %c0_7] : memref<3x128x128xf32, #tpu.memory_space<vmem>>, vector<1x128x128xf32>
    %5 = vector.shape_cast %4 : vector<1x128x128xf32> to vector<128x128xf32>
    %cst_8 = arith.constant dense<0.000000e+00> : vector<24x128xf32>
    %6 = tpu.matmul %0, %5, %cst_8 {dimension_numbers = #tpu.dot_dimension_numbers<[1], [0], [0], [1], [0, 0, 1, 1], [], []>} : vector<24x128xf32>, vector<128x128xf32>, vector<24x128xf32> -> vector<24x128xf32>
    %c1_i32 = arith.constant 1 : i32
    %7 = tpu.dynamic_rotate %6 by %c1_i32 dim 0 : vector<24x128xf32>, i32 -> vector<24x128xf32>
    %8 = arith.addf %3, %7 : vector<24x128xf32>
    %c1 = arith.constant 1 : index
    %c0_9 = arith.constant 0 : index
    %c0_10 = arith.constant 0 : index
    %9 = vector.load %arg1[%c1, %c0_9, %c0_10] : memref<3x128x128xf32, #tpu.memory_space<vmem>>, vector<1x128x128xf32>
    %10 = vector.shape_cast %9 : vector<1x128x128xf32> to vector<128x128xf32>
    %cst_11 = arith.constant dense<0.000000e+00> : vector<24x128xf32>
    %11 = tpu.matmul %0, %10, %cst_11 {dimension_numbers = #tpu.dot_dimension_numbers<[1], [0], [0], [1], [0, 0, 1, 1], [], []>} : vector<24x128xf32>, vector<128x128xf32>, vector<24x128xf32> -> vector<24x128xf32>
    %12 = arith.addf %8, %11 : vector<24x128xf32>
    %c2 = arith.constant 2 : index
    %c0_12 = arith.constant 0 : index
    %c0_13 = arith.constant 0 : index
    %13 = vector.load %arg1[%c2, %c0_12, %c0_13] : memref<3x128x128xf32, #tpu.memory_space<vmem>>, vector<1x128x128xf32>
    %14 = vector.shape_cast %13 : vector<1x128x128xf32> to vector<128x128xf32>
    %cst_14 = arith.constant dense<0.000000e+00> : vector<24x128xf32>
    %15 = tpu.matmul %0, %14, %cst_14 {dimension_numbers = #tpu.dot_dimension_numbers<[1], [0], [0], [1], [0, 0, 1, 1], [], []>} : vector<24x128xf32>, vector<128x128xf32>, vector<24x128xf32> -> vector<24x128xf32>
    %c23_i32 = arith.constant 23 : i32
    %16 = tpu.dynamic_rotate %15 by %c23_i32 dim 0 : vector<24x128xf32>, i32 -> vector<24x128xf32>
    %17 = arith.addf %12, %16 : vector<24x128xf32>
    %18 = vector.broadcast %1 : vector<24x1xf32> to vector<24x128xf32>
    %19 = arith.mulf %17, %18 : vector<24x128xf32>
    %cst_15 = arith.constant dense<0.000000e+00> : vector<128xf32>
    %20 = vector.multi_reduction <add>, %19, %cst_15 [0] : vector<24x128xf32> to vector<128xf32>
    %21 = vector.shape_cast %20 : vector<128xf32> to vector<1x128xf32>
    %22 = arith.mulf %19, %19 : vector<24x128xf32>
    %cst_16 = arith.constant dense<0.000000e+00> : vector<128xf32>
    %23 = vector.multi_reduction <add>, %22, %cst_16 [0] : vector<24x128xf32> to vector<128xf32>
    %24 = vector.shape_cast %23 : vector<128xf32> to vector<1x128xf32>
    %c4_i32 = arith.constant 4 : i32
    %25 = tpu.dynamic_rotate %21 by %c4_i32 dim 1 : vector<1x128xf32>, i32 -> vector<1x128xf32>
    %26 = arith.addf %21, %25 : vector<1x128xf32>
    %c4_i32_17 = arith.constant 4 : i32
    %27 = tpu.dynamic_rotate %24 by %c4_i32_17 dim 1 : vector<1x128xf32>, i32 -> vector<1x128xf32>
    %28 = arith.addf %24, %27 : vector<1x128xf32>
    %c8_i32 = arith.constant 8 : i32
    %29 = tpu.dynamic_rotate %26 by %c8_i32 dim 1 : vector<1x128xf32>, i32 -> vector<1x128xf32>
    %30 = arith.addf %26, %29 : vector<1x128xf32>
    %c8_i32_18 = arith.constant 8 : i32
    %31 = tpu.dynamic_rotate %28 by %c8_i32_18 dim 1 : vector<1x128xf32>, i32 -> vector<1x128xf32>
    %32 = arith.addf %28, %31 : vector<1x128xf32>
    %c16_i32 = arith.constant 16 : i32
    %33 = tpu.dynamic_rotate %30 by %c16_i32 dim 1 : vector<1x128xf32>, i32 -> vector<1x128xf32>
    %34 = arith.addf %30, %33 : vector<1x128xf32>
    %c16_i32_19 = arith.constant 16 : i32
    %35 = tpu.dynamic_rotate %32 by %c16_i32_19 dim 1 : vector<1x128xf32>, i32 -> vector<1x128xf32>
    %36 = arith.addf %32, %35 : vector<1x128xf32>
    %c32_i32 = arith.constant 32 : i32
    %37 = tpu.dynamic_rotate %34 by %c32_i32 dim 1 : vector<1x128xf32>, i32 -> vector<1x128xf32>
    %38 = arith.addf %34, %37 : vector<1x128xf32>
    %c32_i32_20 = arith.constant 32 : i32
    %39 = tpu.dynamic_rotate %36 by %c32_i32_20 dim 1 : vector<1x128xf32>, i32 -> vector<1x128xf32>
    %40 = arith.addf %36, %39 : vector<1x128xf32>
    %c64_i32 = arith.constant 64 : i32
    %41 = tpu.dynamic_rotate %38 by %c64_i32 dim 1 : vector<1x128xf32>, i32 -> vector<1x128xf32>
    %42 = arith.addf %38, %41 : vector<1x128xf32>
    %c64_i32_21 = arith.constant 64 : i32
    %43 = tpu.dynamic_rotate %40 by %c64_i32_21 dim 1 : vector<1x128xf32>, i32 -> vector<1x128xf32>
    %44 = arith.addf %40, %43 : vector<1x128xf32>
    %cst_22 = arith.constant 0.001953125 : f32
    %45 = vector.broadcast %cst_22 : f32 to vector<1x128xf32>
    %46 = arith.mulf %42, %45 : vector<1x128xf32>
    %cst_23 = arith.constant 0.001953125 : f32
    %47 = vector.broadcast %cst_23 : f32 to vector<1x128xf32>
    %48 = arith.mulf %44, %47 : vector<1x128xf32>
    %49 = arith.mulf %46, %46 : vector<1x128xf32>
    %50 = arith.subf %48, %49 : vector<1x128xf32>
    %51 = vector.broadcast %46 : vector<1x128xf32> to vector<24x128xf32>
    %52 = arith.subf %19, %51 : vector<24x128xf32>
    %cst_24 = arith.constant 9.99999974E-6 : f32
    %53 = vector.broadcast %cst_24 : f32 to vector<1x128xf32>
    %54 = arith.addf %50, %53 : vector<1x128xf32>
    %55 = math.rsqrt %54 : vector<1x128xf32>
    %56 = vector.broadcast %55 : vector<1x128xf32> to vector<24x128xf32>
    %57 = arith.mulf %52, %56 : vector<24x128xf32>
    %58 = vector.broadcast %2 : vector<1x128xf32> to vector<24x128xf32>
    %59 = arith.addf %57, %58 : vector<24x128xf32>
    %cst_25 = arith.constant 0.000000e+00 : f32
    %60 = vector.broadcast %cst_25 : f32 to vector<24x128xf32>
    %61 = arith.maximumf %59, %60 : vector<24x128xf32>
    %62 = vector.broadcast %1 : vector<24x1xf32> to vector<24x128xf32>
    %63 = arith.mulf %61, %62 : vector<24x128xf32>
    %c0_26 = arith.constant 0 : index
    %c0_27 = arith.constant 0 : index
    %64 = vector.load %arg4[%c0_26, %c0_27] : memref<1x128xf32, #tpu.memory_space<vmem>>, vector<1x128xf32>
    %cst_28 = arith.constant 0.000000e+00 : f32
    %65 = vector.broadcast %cst_28 : f32 to vector<24x128xf32>
    %c0_29 = arith.constant 0 : index
    %c0_30 = arith.constant 0 : index
    %c0_31 = arith.constant 0 : index
    %66 = vector.load %arg2[%c0_29, %c0_30, %c0_31] : memref<3x128x128xf32, #tpu.memory_space<vmem>>, vector<1x128x128xf32>
    %67 = vector.shape_cast %66 : vector<1x128x128xf32> to vector<128x128xf32>
    %cst_32 = arith.constant dense<0.000000e+00> : vector<24x128xf32>
    %68 = tpu.matmul %63, %67, %cst_32 {dimension_numbers = #tpu.dot_dimension_numbers<[1], [0], [0], [1], [0, 0, 1, 1], [], []>} : vector<24x128xf32>, vector<128x128xf32>, vector<24x128xf32> -> vector<24x128xf32>
    %c1_i32_33 = arith.constant 1 : i32
    %69 = tpu.dynamic_rotate %68 by %c1_i32_33 dim 0 : vector<24x128xf32>, i32 -> vector<24x128xf32>
    %70 = arith.addf %65, %69 : vector<24x128xf32>
    %c1_34 = arith.constant 1 : index
    %c0_35 = arith.constant 0 : index
    %c0_36 = arith.constant 0 : index
    %71 = vector.load %arg2[%c1_34, %c0_35, %c0_36] : memref<3x128x128xf32, #tpu.memory_space<vmem>>, vector<1x128x128xf32>
    %72 = vector.shape_cast %71 : vector<1x128x128xf32> to vector<128x128xf32>
    %cst_37 = arith.constant dense<0.000000e+00> : vector<24x128xf32>
    %73 = tpu.matmul %63, %72, %cst_37 {dimension_numbers = #tpu.dot_dimension_numbers<[1], [0], [0], [1], [0, 0, 1, 1], [], []>} : vector<24x128xf32>, vector<128x128xf32>, vector<24x128xf32> -> vector<24x128xf32>
    %74 = arith.addf %70, %73 : vector<24x128xf32>
    %c2_38 = arith.constant 2 : index
    %c0_39 = arith.constant 0 : index
    %c0_40 = arith.constant 0 : index
    %75 = vector.load %arg2[%c2_38, %c0_39, %c0_40] : memref<3x128x128xf32, #tpu.memory_space<vmem>>, vector<1x128x128xf32>
    %76 = vector.shape_cast %75 : vector<1x128x128xf32> to vector<128x128xf32>
    %cst_41 = arith.constant dense<0.000000e+00> : vector<24x128xf32>
    %77 = tpu.matmul %63, %76, %cst_41 {dimension_numbers = #tpu.dot_dimension_numbers<[1], [0], [0], [1], [0, 0, 1, 1], [], []>} : vector<24x128xf32>, vector<128x128xf32>, vector<24x128xf32> -> vector<24x128xf32>
    %c23_i32_42 = arith.constant 23 : i32
    %78 = tpu.dynamic_rotate %77 by %c23_i32_42 dim 0 : vector<24x128xf32>, i32 -> vector<24x128xf32>
    %79 = arith.addf %74, %78 : vector<24x128xf32>
    %80 = vector.broadcast %1 : vector<24x1xf32> to vector<24x128xf32>
    %81 = arith.mulf %79, %80 : vector<24x128xf32>
    %cst_43 = arith.constant dense<0.000000e+00> : vector<128xf32>
    %82 = vector.multi_reduction <add>, %81, %cst_43 [0] : vector<24x128xf32> to vector<128xf32>
    %83 = vector.shape_cast %82 : vector<128xf32> to vector<1x128xf32>
    %84 = arith.mulf %81, %81 : vector<24x128xf32>
    %cst_44 = arith.constant dense<0.000000e+00> : vector<128xf32>
    %85 = vector.multi_reduction <add>, %84, %cst_44 [0] : vector<24x128xf32> to vector<128xf32>
    %86 = vector.shape_cast %85 : vector<128xf32> to vector<1x128xf32>
    %c4_i32_45 = arith.constant 4 : i32
    %87 = tpu.dynamic_rotate %83 by %c4_i32_45 dim 1 : vector<1x128xf32>, i32 -> vector<1x128xf32>
    %88 = arith.addf %83, %87 : vector<1x128xf32>
    %c4_i32_46 = arith.constant 4 : i32
    %89 = tpu.dynamic_rotate %86 by %c4_i32_46 dim 1 : vector<1x128xf32>, i32 -> vector<1x128xf32>
    %90 = arith.addf %86, %89 : vector<1x128xf32>
    %c8_i32_47 = arith.constant 8 : i32
    %91 = tpu.dynamic_rotate %88 by %c8_i32_47 dim 1 : vector<1x128xf32>, i32 -> vector<1x128xf32>
    %92 = arith.addf %88, %91 : vector<1x128xf32>
    %c8_i32_48 = arith.constant 8 : i32
    %93 = tpu.dynamic_rotate %90 by %c8_i32_48 dim 1 : vector<1x128xf32>, i32 -> vector<1x128xf32>
    %94 = arith.addf %90, %93 : vector<1x128xf32>
    %c16_i32_49 = arith.constant 16 : i32
    %95 = tpu.dynamic_rotate %92 by %c16_i32_49 dim 1 : vector<1x128xf32>, i32 -> vector<1x128xf32>
    %96 = arith.addf %92, %95 : vector<1x128xf32>
    %c16_i32_50 = arith.constant 16 : i32
    %97 = tpu.dynamic_rotate %94 by %c16_i32_50 dim 1 : vector<1x128xf32>, i32 -> vector<1x128xf32>
    %98 = arith.addf %94, %97 : vector<1x128xf32>
    %c32_i32_51 = arith.constant 32 : i32
    %99 = tpu.dynamic_rotate %96 by %c32_i32_51 dim 1 : vector<1x128xf32>, i32 -> vector<1x128xf32>
    %100 = arith.addf %96, %99 : vector<1x128xf32>
    %c32_i32_52 = arith.constant 32 : i32
    %101 = tpu.dynamic_rotate %98 by %c32_i32_52 dim 1 : vector<1x128xf32>, i32 -> vector<1x128xf32>
    %102 = arith.addf %98, %101 : vector<1x128xf32>
    %c64_i32_53 = arith.constant 64 : i32
    %103 = tpu.dynamic_rotate %100 by %c64_i32_53 dim 1 : vector<1x128xf32>, i32 -> vector<1x128xf32>
    %104 = arith.addf %100, %103 : vector<1x128xf32>
    %c64_i32_54 = arith.constant 64 : i32
    %105 = tpu.dynamic_rotate %102 by %c64_i32_54 dim 1 : vector<1x128xf32>, i32 -> vector<1x128xf32>
    %106 = arith.addf %102, %105 : vector<1x128xf32>
    %cst_55 = arith.constant 0.001953125 : f32
    %107 = vector.broadcast %cst_55 : f32 to vector<1x128xf32>
    %108 = arith.mulf %104, %107 : vector<1x128xf32>
    %cst_56 = arith.constant 0.001953125 : f32
    %109 = vector.broadcast %cst_56 : f32 to vector<1x128xf32>
    %110 = arith.mulf %106, %109 : vector<1x128xf32>
    %111 = arith.mulf %108, %108 : vector<1x128xf32>
    %112 = arith.subf %110, %111 : vector<1x128xf32>
    %113 = vector.broadcast %108 : vector<1x128xf32> to vector<24x128xf32>
    %114 = arith.subf %81, %113 : vector<24x128xf32>
    %cst_57 = arith.constant 9.99999974E-6 : f32
    %115 = vector.broadcast %cst_57 : f32 to vector<1x128xf32>
    %116 = arith.addf %112, %115 : vector<1x128xf32>
    %117 = math.rsqrt %116 : vector<1x128xf32>
    %118 = vector.broadcast %117 : vector<1x128xf32> to vector<24x128xf32>
    %119 = arith.mulf %114, %118 : vector<24x128xf32>
    %120 = vector.broadcast %64 : vector<1x128xf32> to vector<24x128xf32>
    %121 = arith.addf %119, %120 : vector<24x128xf32>
    %122 = arith.addf %121, %0 : vector<24x128xf32>
    %cst_58 = arith.constant 0.000000e+00 : f32
    %123 = vector.broadcast %cst_58 : f32 to vector<24x128xf32>
    %124 = arith.maximumf %122, %123 : vector<24x128xf32>
    %c0_59 = arith.constant 0 : index
    %c0_60 = arith.constant 0 : index
    %125 = vector.load %arg6[%c0_59, %c0_60] : memref<24x128xf32, #tpu.memory_space<vmem>>, vector<24x128xf32>
    tpu.vector_store %arg6[%c0_59, %c0_60], %124 {strides = array<i32>} : memref<24x128xf32, #tpu.memory_space<vmem>>, vector<24x128xf32>,
    return
  }
}

</mosaic_0001>

<bundles_post_ra>
// kernel: squeeze.12
= control target key start
LH: loop header
LB: loop body
LE: loop exit
PB: predicated region body
PF: predicated region fallthrough
CT: control target
= control target key end

     0   :  { %vm6_vm0 = vcmask 1043458   ;;  %s211_s6 = smov 3  ;;  %vm10_vm1 = vcmask 1045508   ;;  %vm14_vm2 = vcmask 1047558   ;;  %s214_s9 = smov 12  ;;  %vm16_vm3 = vcmask 31744   ;;  %s6167_s0 = inlined_call_operand.vmem [shape: f32[1,16,4,16,4], index: 0, kind: input, shape index: {}]   ;;  %s6168_s1 = inlined_call_operand.vmem [shape: f32[64,64], index: 1, kind: output, shape index: {}]  }
   0x1   :  { %v2954_v0 = vld [vmem:[%s6167_s0 + $0x8f] ss:$16 sm:%s211_s6]   ;;  %s219_s10 = smov 48  ;;  %s224_s15 = smov 192  ;;  %vm185_vm4 = vcmask 523744   ;;  %vm368_vm5 = vcmask 490944  }
   0x2   :  { %v2955_v1 = vld [vmem:[%s6167_s0 + $0x8f] ss:$16 sm:%s214_s9]   ;;  %s166_s16 = smov 3  ;;  %s169_s21 = smov 12  ;;  %vm551_vm6 = vcmask 458144   ;;  %vm734_vm7 = vcmask 425344  }
   0x3   :  { %v2956_v2 = vld [vmem:[%s6167_s0 + $0x8f] ss:$16 sm:%s219_s10]   ;;  %v217_v3 = vsel %vm6_vm0, %v2955_v1, %v2954_v0  ;;  %s174_s22 = smov 48  ;;  %s179_s27 = smov 192  ;;  %vm917_vm8 = vcmask 392544   ;;  %vm1100_vm9 = vcmask 359744  }
   0x4   :  { %v2957_v4 = vld [vmem:[%s6167_s0 + $0x8f] ss:$16 sm:%s224_s15]   ;;  %v222_v6 = vsel %vm10_vm1, %v2956_v2, %v217_v3  ;;  %s234_s28 = smov 3  ;;  %s237_s4 = smov 12  ;;  %vm1283_vm10 = vcmask 326944   ;;  %vm1466_vm11 = vcmask 294144  }
   0x5   :  { %v2945_v5 = vld [vmem:[%s6167_s0 + $0xf] ss:$16 sm:%s166_s16]   ;;  %v227_v9 = vsel %vm14_vm2, %v2957_v4, %v222_v6  ;;  %s242_s5 = smov 48  ;;  %s3545_s6 = smov 60   ;;  %vm1649_vm12 = vcmask 261344   ;;  %vm1832_vm13 = vcmask 228544  }
   0x6   :  { %v2946_v7 = vld [vmem:[%s6167_s0 + $0xf] ss:$16 sm:%s169_s21]   ;;  %228 = vrot.lane.b32.xlu1 %v227_v9, %s3545_s6  ;;  %s247_s9 = smov 192  ;;  %s188_s10 = smov 3  ;;  %vm2015_vm14 = vcmask 195744   ;;  %vm2198_vm15 = vcmask 162944  }
   0x7   :  { %v2947_v8 = vld [vmem:[%s6167_s0 + $0xf] ss:$16 sm:%s174_s22]   ;;  %v172_v10 = vsel %vm6_vm0, %v2946_v7, %v2945_v5  ;;  %s191_s15 = smov 12  ;;  %s196_s16 = smov 48 }
   0x8   :  { %v2948_v11 = vld [vmem:[%s6167_s0 + $0xf] ss:$16 sm:%s179_s27]   ;;  %v177_v13 = vsel %vm10_vm1, %v2947_v8, %v172_v10  ;;  %s201_s19 = smov 192  ;;  %s280_s20 = smov 3 }
   0x9   :  { %v2959_v12 = vld [vmem:[%s6167_s0 + $0x28f] ss:$16 sm:%s234_s28]   ;;  %v182_v15 = vsel %vm14_vm2, %v2948_v11, %v177_v13  ;;  %s283_s25 = smov 12  ;;  %s288_s26 = smov 48 }
   0xa   :  { %v2960_v14 = vld [vmem:[%s6167_s0 + $0x28f] ss:$16 sm:%s237_s4]   ;;  %183 = vrot.lane.b32.xlu0 %v182_v15, %s3545_s6  ;;  %s293_s29 = smov 192  ;;  %s257_s30 = smov 3 }
   0xb   :  { %v240_v16 = vsel %vm6_vm0, %v2960_v14, %v2959_v12  ;;  %v2961_v17 = vld [vmem:[%s6167_s0 + $0x28f] ss:$16 sm:%s242_s5]   ;;  %s260_s7 = smov 12  ;;  %s265_s8 = smov 48 }
   0xc   :  { %v2962_v18 = vld [vmem:[%s6167_s0 + $0x28f] ss:$16 sm:%s247_s9]   ;;  %v245_v19 = vsel %vm10_vm1, %v2961_v17, %v240_v16  ;;  %s270_s13 = smov 192  ;;  %s329_s17 = smov 12 }
   0xd   :  { %v2949_v20 = vld [vmem:[%s6167_s0 + $0x20f] ss:$16 sm:%s188_s10]   ;;  %v250_v21 = vsel %vm14_vm2, %v2962_v18, %v245_v19  ;;  %s334_s22 = smov 48  ;;  %s339_s23 = smov 192 }
   0xe   :  { %v2950_v22 = vld [vmem:[%s6167_s0 + $0x20f] ss:$16 sm:%s191_s15]   ;;  %251 = vrot.lane.b32.xlu1 %v250_v21, %s3545_s6  ;;  %s306_s2 = smov 12  ;;  %s311_s3 = smov 48 }
   0xf   :  { %v2951_v23 = vld [vmem:[%s6167_s0 + $0x20f] ss:$16 sm:%s196_s16]   ;;  %v194_v24 = vsel %vm6_vm0, %v2950_v22, %v2949_v20  ;;  %s326_s16 = smov 3  ;;  %s316_s9 = smov 192 }
  0x10   :  { %v2952_v25 = vld [vmem:[%s6167_s0 + $0x20f] ss:$16 sm:%s201_s19]   ;;  %v199_v26 = vsel %vm10_vm1, %v2951_v23, %v194_v24  ;;  %s371_s12 = smov 3  ;;  %s379_s18 = smov 48 }
  0x11   :  { %v2969_v27 = vld [vmem:[%s6167_s0 + $0x30f] ss:$16 sm:%s280_s20]   ;;  %v204_v29 = vsel %vm14_vm2, %v2952_v25, %v199_v26  ;;  %s384_s19 = smov 192  ;;  %v2988_v55 = vld [vmem:[%s6167_s0 + $0x20e] ss:$16 sm:%s371_s12]   ;;  %s352_s27 = smov 12 }
  0x12   :  { %v2970_v28 = vld [vmem:[%s6167_s0 + $0x30f] ss:$16 sm:%s283_s25]   ;;  %205 = vrot.lane.b32.xlu0 %v204_v29, %s3545_s6  ;;  %s357_s28 = smov 48  ;;  %s362_s4 = smov 192 }
  0x13   :  { %v286_v30 = vsel %vm6_vm0, %v2970_v28, %v2969_v27  ;;  %v2971_v31 = vld [vmem:[%s6167_s0 + $0x30f] ss:$16 sm:%s288_s26]   ;;  %s303_s26 = smov 3  ;;  %v2990_v59 = vld [vmem:[%s6167_s0 + $0x20e] ss:$16 sm:%s379_s18]   ;;  %s430_s14 = smov 192 }
  0x14   :  { %v2972_v32 = vld [vmem:[%s6167_s0 + $0x30f] ss:$16 sm:%s293_s29]   ;;  %v291_v33 = vsel %vm10_vm1, %v2971_v31, %v286_v30  ;;  %v2991_v60 = vld [vmem:[%s6167_s0 + $0x20e] ss:$16 sm:%s384_s19]   ;;  %s3546_s15 = smov 56   ;;  %s394_s18 = smov 3 }
  0x15   :  { %v2964_v34 = vld [vmem:[%s6167_s0 + $0x10f] ss:$16 sm:%s257_s30]   ;;  %v296_v35 = vsel %vm14_vm2, %v2972_v32, %v291_v33  ;;  %v2985_v0 = vld [vmem:[%s6167_s0 + $0xe] ss:$16 sm:%s352_s27]   ;;  %s402_s24 = smov 48  ;;  %s407_s29 = smov 192 }
  0x16   :  { %v2965_v36 = vld [vmem:[%s6167_s0 + $0x10f] ss:$16 sm:%s260_s7]   ;;  %297 = vrot.lane.b32.xlu1 %v296_v35, %s3545_s6  ;;  %s417_s7 = smov 3  ;;  %s476_s10 = smov 192 }
  0x17   :  { %v2966_v37 = vld [vmem:[%s6167_s0 + $0x10f] ss:$16 sm:%s265_s8]   ;;  %v263_v38 = vsel %vm6_vm0, %v2965_v36, %v2964_v34  ;;  %s420_s8 = smov 12  ;;  %v2986_v1 = vld [vmem:[%s6167_s0 + $0xe] ss:$16 sm:%s357_s28]   ;;  %s443_s19 = smov 12 }
  0x18   :  { %v2967_v39 = vld [vmem:[%s6167_s0 + $0x10f] ss:$16 sm:%s270_s13]   ;;  %v268_v40 = vsel %vm10_vm1, %v2966_v37, %v263_v38  ;;  %s374_s13 = smov 12  ;;  %v2987_v3 = vld [vmem:[%s6167_s0 + $0xe] ss:$16 sm:%s362_s4]   ;;  %s466_s4 = smov 12 }
  0x19   :  { %v2979_v41 = vld [vmem:[%s6167_s0 + $0x38f] ss:$16 sm:%s326_s16]   ;;  %v273_v43 = vsel %vm14_vm2, %v2967_v39, %v268_v40  ;;  %v2989_v56 = vld [vmem:[%s6167_s0 + $0x20e] ss:$16 sm:%s374_s13]   ;;  %s425_s13 = smov 48  ;;  %s448_s20 = smov 48 }
  0x1a   :  { %v2980_v42 = vld [vmem:[%s6167_s0 + $0x38f] ss:$16 sm:%s329_s17]   ;;  %274 = vrot.lane.b32.xlu0 %v273_v43, %s3545_s6  ;;  %v377_v58 = vsel %vm6_vm0, %v2989_v56, %v2988_v55  ;;  %s453_s25 = smov 192  ;;  %s509_s28 = smov 3 }
  0x1b   :  { %v332_v44 = vsel %vm6_vm0, %v2980_v42, %v2979_v41  ;;  %v2981_v45 = vld [vmem:[%s6167_s0 + $0x38f] ss:$16 sm:%s334_s22]   ;;  %s349_s22 = smov 3  ;;  %v382_v61 = vsel %vm10_vm1, %v2990_v59, %v377_v58  ;;  %v2998_v5 = vld [vmem:[%s6167_s0 + $0x28e] ss:$16 sm:%s417_s7]   ;;  %s522_s5 = smov 192 }
  0x1c   :  { %v2982_v46 = vld [vmem:[%s6167_s0 + $0x38f] ss:$16 sm:%s339_s23]   ;;  %v337_v47 = vsel %vm10_vm1, %v2981_v45, %v332_v44  ;;  %v2984_v62 = vld [vmem:[%s6167_s0 + $0xe] ss:$16 sm:%s349_s22]   ;;  %v387_v63 = vsel %vm14_vm2, %v2991_v60, %v382_v61  ;;  %s397_s23 = smov 12  ;;  %s494_s16 = smov 48 }
  0x1d   :  { %v2974_v48 = vld [vmem:[%s6167_s0 + $0x18f] ss:$16 sm:%s303_s26]   ;;  %v342_v49 = vsel %vm14_vm2, %v2982_v46, %v337_v47  ;;  %v355_v2 = vsel %vm6_vm0, %v2985_v0, %v2984_v62  ;;  %v2999_v6 = vld [vmem:[%s6167_s0 + $0x28e] ss:$16 sm:%s420_s8]   ;;  %s499_s21 = smov 192  ;;  %s562_s30 = smov 48 }
  0x1e   :  { %v2975_v50 = vld [vmem:[%s6167_s0 + $0x18f] ss:$16 sm:%s306_s2]   ;;  %343 = vrot.lane.b32.xlu1 %v342_v49, %s3545_s6  ;;  %v360_v4 = vsel %vm10_vm1, %v2986_v1, %v355_v2  ;;  %v423_v8 = vsel %vm6_vm0, %v2999_v6, %v2998_v5  ;;  %s567_s2 = smov 192  ;;  %s540_s11 = smov 48 }
  0x1f   :  { %v2976_v51 = vld [vmem:[%s6167_s0 + $0x18f] ss:$16 sm:%s311_s3]   ;;  %v309_v52 = vsel %vm6_vm0, %v2975_v50, %v2974_v48  ;;  %v365_v7 = vsel %vm14_vm2, %v2987_v3, %v360_v4  ;;  %v3000_v9 = vld [vmem:[%s6167_s0 + $0x28e] ss:$16 sm:%s425_s13]   ;;  %s463_s3 = smov 3  ;;  %s440_s13 = smov 3 }
  0x20   :  { %v2977_v53 = vld [vmem:[%s6167_s0 + $0x18f] ss:$16 sm:%s316_s9]   ;;  %v314_v54 = vsel %vm10_vm1, %v2976_v51, %v309_v52  ;;  %v3001_v10 = vld [vmem:[%s6167_s0 + $0x28e] ss:$16 sm:%s430_s14]   ;;  %v428_v11 = vsel %vm10_vm1, %v3000_v9, %v423_v8  ;;  %s471_s9 = smov 48  ;;  %s489_s14 = smov 12 }
  0x21   :  { %v319_v57 = vsel %vm14_vm2, %v2977_v53, %v314_v54  ;;  %v2993_v12 = vld [vmem:[%s6167_s0 + $0x8e] ss:$16 sm:%s394_s18]   ;;  %v433_v13 = vsel %vm14_vm2, %v3001_v10, %v428_v11  ;;  %v3029_v51 = vld [vmem:[%s6167_s0 + $0x20d] ss:$16 sm:%s562_s30]   ;;  %s545_s17 = smov 192  ;;  %s613_s26 = smov 192 }
  0x22   :  { %320 = vrot.lane.b32.xlu0 %v319_v57, %s3545_s6  ;;  %388 = vrot.lane.b32.xlu1 %v387_v63, %s3546_s15  ;;  %v2994_v14 = vld [vmem:[%s6167_s0 + $0x8e] ss:$16 sm:%s397_s23]   ;;  %s517_s6 = smov 48  ;;  %s3547_s27 = smov 52  }
  0x23   :  { %v2995_v15 = vld [vmem:[%s6167_s0 + $0x8e] ss:$16 sm:%s402_s24]   ;;  %v400_v16 = vsel %vm6_vm0, %v2994_v14, %v2993_v12  ;;  %s554_s24 = smov 3  ;;  %v3030_v52 = vld [vmem:[%s6167_s0 + $0x20d] ss:$16 sm:%s567_s2]   ;;  %s577_s30 = smov 3 }
  0x24   :  { %v2996_v17 = vld [vmem:[%s6167_s0 + $0x8e] ss:$16 sm:%s407_s29]   ;;  %v405_v18 = vsel %vm10_vm1, %v2995_v15, %v400_v16  ;;  %s512_s29 = smov 12  ;;  %v3027_v47 = vld [vmem:[%s6167_s0 + $0x20d] ss:$16 sm:%s554_s24]   ;;  %s585_s7 = smov 48 }
  0x25   :  { %v3008_v19 = vld [vmem:[%s6167_s0 + $0x30e] ss:$16 sm:%s463_s3]   ;;  %v410_v21 = vsel %vm14_vm2, %v2996_v17, %v405_v18  ;;  %v3025_v57 = vld [vmem:[%s6167_s0 + $0xd] ss:$16 sm:%s540_s11]   ;;  %s590_s12 = smov 192  ;;  %s659_s22 = smov 192 }
  0x26   :  { %366 = vrot.lane.b32.xlu0 %v365_v7, %s3546_s15  ;;  %434 = vrot.lane.b32.xlu1 %v433_v13, %s3546_s15  ;;  %v3009_v20 = vld [vmem:[%s6167_s0 + $0x30e] ss:$16 sm:%s466_s4]   ;;  %s626_s2 = smov 12  ;;  %s631_s3 = smov 48 }
  0x27   :  { %v469_v22 = vsel %vm6_vm0, %v3009_v20, %v3008_v19  ;;  %v3010_v23 = vld [vmem:[%s6167_s0 + $0x30e] ss:$16 sm:%s471_s9]   ;;  %s486_s9 = smov 3  ;;  %v3026_v59 = vld [vmem:[%s6167_s0 + $0xd] ss:$16 sm:%s545_s17]   ;;  %s649_s17 = smov 12 }
  0x28   :  { %v3011_v24 = vld [vmem:[%s6167_s0 + $0x30e] ss:$16 sm:%s476_s10]   ;;  %v474_v25 = vsel %vm10_vm1, %v3010_v23, %v469_v22  ;;  %s535_s10 = smov 12  ;;  %v3040_v2 = vld [vmem:[%s6167_s0 + $0x28d] ss:$16 sm:%s613_s26]   ;;  %s636_s8 = smov 192 }
  0x29   :  { %v3003_v26 = vld [vmem:[%s6167_s0 + $0x10e] ss:$16 sm:%s440_s13]   ;;  %v479_v27 = vsel %vm14_vm2, %v3011_v24, %v474_v25  ;;  %v3024_v56 = vld [vmem:[%s6167_s0 + $0xd] ss:$16 sm:%s535_s10]   ;;  %s692_s11 = smov 3  ;;  %s705_s18 = smov 192 }
  0x2a   :  { %411 = vrot.lane.b32.xlu0 %v410_v21, %s3546_s15  ;;  %v3004_v28 = vld [vmem:[%s6167_s0 + $0x10e] ss:$16 sm:%s443_s19]   ;;  %480 = vrot.lane.b32.xlu1 %v479_v27, %s3546_s15  ;;  %s600_s19 = smov 3  ;;  %s672_s26 = smov 12 }
  0x2b   :  { %v3005_v29 = vld [vmem:[%s6167_s0 + $0x10e] ss:$16 sm:%s448_s20]   ;;  %v446_v30 = vsel %vm6_vm0, %v3004_v28, %v3003_v26  ;;  %s603_s20 = smov 12  ;;  %v3037_v61 = vld [vmem:[%s6167_s0 + $0x28d] ss:$16 sm:%s600_s19]   ;;  %s682_s4 = smov 192 }
  0x2c   :  { %v3006_v31 = vld [vmem:[%s6167_s0 + $0x10e] ss:$16 sm:%s453_s25]   ;;  %v451_v32 = vsel %vm10_vm1, %v3005_v29, %v446_v30  ;;  %s557_s25 = smov 12  ;;  %v3038_v62 = vld [vmem:[%s6167_s0 + $0x28d] ss:$16 sm:%s603_s20]   ;;  %s745_s13 = smov 48 }
  0x2d   :  { %v3018_v33 = vld [vmem:[%s6167_s0 + $0x38e] ss:$16 sm:%s509_s28]   ;;  %v456_v35 = vsel %vm14_vm2, %v3006_v31, %v451_v32  ;;  %v3028_v48 = vld [vmem:[%s6167_s0 + $0x20d] ss:$16 sm:%s557_s25]   ;;  %s608_s25 = smov 48  ;;  %v606_v0 = vsel %vm6_vm0, %v3038_v62, %v3037_v61  ;;  %s677_s28 = smov 48 }
  0x2e   :  { %v3019_v34 = vld [vmem:[%s6167_s0 + $0x38e] ss:$16 sm:%s512_s29]   ;;  %457 = vrot.lane.b32.xlu0 %v456_v35, %s3546_s15  ;;  %v560_v50 = vsel %vm6_vm0, %v3028_v48, %v3027_v47  ;;  %s723_s23 = smov 48  ;;  %s728_s29 = smov 192 }
  0x2f   :  { %v515_v36 = vsel %vm6_vm0, %v3019_v34, %v3018_v33  ;;  %v3020_v37 = vld [vmem:[%s6167_s0 + $0x38e] ss:$16 sm:%s517_s6]   ;;  %s532_s6 = smov 3  ;;  %v565_v53 = vsel %vm10_vm1, %v3029_v51, %v560_v50  ;;  %v3039_v1 = vld [vmem:[%s6167_s0 + $0x28d] ss:$16 sm:%s608_s25]   ;;  %s623_s25 = smov 3 }
  0x30   :  { %v3021_v38 = vld [vmem:[%s6167_s0 + $0x38e] ss:$16 sm:%s522_s5]   ;;  %v520_v39 = vsel %vm10_vm1, %v3020_v37, %v515_v36  ;;  %v3023_v54 = vld [vmem:[%s6167_s0 + $0xd] ss:$16 sm:%s532_s6]   ;;  %v570_v55 = vsel %vm14_vm2, %v3030_v52, %v565_v53  ;;  %s580_s5 = smov 12  ;;  %v611_v3 = vsel %vm10_vm1, %v3039_v1, %v606_v0  ;;  %s3548_s10 = smov 48  }
  0x31   :  { %v3013_v40 = vld [vmem:[%s6167_s0 + $0x18e] ss:$16 sm:%s486_s9]   ;;  %v525_v41 = vsel %vm14_vm2, %v3021_v38, %v520_v39  ;;  %v538_v58 = vsel %vm6_vm0, %v3024_v56, %v3023_v54  ;;  %v3032_v4 = vld [vmem:[%s6167_s0 + $0x8d] ss:$16 sm:%s577_s30]   ;;  %v616_v5 = vsel %vm14_vm2, %v3040_v2, %v611_v3  ;;  %s796_s9 = smov 192  ;;  %s768_s19 = smov 48 }
  0x32   :  { %v3014_v42 = vld [vmem:[%s6167_s0 + $0x18e] ss:$16 sm:%s489_s14]   ;;  %526 = vrot.lane.b32.xlu1 %v525_v41, %s3546_s15  ;;  %v543_v60 = vsel %vm10_vm1, %v3025_v57, %v538_v58  ;;  %s750_s14 = smov 192  ;;  %s773_s24 = smov 192 }
  0x33   :  { %v3015_v43 = vld [vmem:[%s6167_s0 + $0x18e] ss:$16 sm:%s494_s16]   ;;  %v492_v44 = vsel %vm6_vm0, %v3014_v42, %v3013_v40  ;;  %v548_v63 = vsel %vm14_vm2, %v3026_v59, %v543_v60  ;;  %s646_s16 = smov 3  ;;  %v3033_v6 = vld [vmem:[%s6167_s0 + $0x8d] ss:$16 sm:%s580_s5]   ;;  %s842_s6 = smov 192 }
  0x34   :  { %v3016_v45 = vld [vmem:[%s6167_s0 + $0x18e] ss:$16 sm:%s499_s21]   ;;  %v497_v46 = vsel %vm10_vm1, %v3015_v43, %v492_v44  ;;  %v3034_v7 = vld [vmem:[%s6167_s0 + $0x8d] ss:$16 sm:%s585_s7]   ;;  %s654_s21 = smov 48  ;;  %v583_v8 = vsel %vm6_vm0, %v3033_v6, %v3032_v4  ;;  %s737_s7 = smov 3 }
  0x35   :  { %v502_v49 = vsel %vm14_vm2, %v3016_v45, %v497_v46  ;;  %v3035_v9 = vld [vmem:[%s6167_s0 + $0x8d] ss:$16 sm:%s590_s12]   ;;  %v588_v10 = vsel %vm10_vm1, %v3034_v7, %v583_v8  ;;  %s695_s12 = smov 12  ;;  %v3066_v39 = vld [vmem:[%s6167_s0 + $0x20c] ss:$16 sm:%s737_s7]   ;;  %s819_s20 = smov 192 }
  0x36   :  { %503 = vrot.lane.b32.xlu0 %v502_v49, %s3546_s15  ;;  %571 = vrot.lane.b32.xlu1 %v570_v55, %s3547_s27  ;;  %v3047_v11 = vld [vmem:[%s6167_s0 + $0x30d] ss:$16 sm:%s646_s16]   ;;  %v593_v13 = vsel %vm14_vm2, %v3035_v9, %v588_v10  ;;  %s700_s15 = smov 48  ;;  %s814_s16 = smov 48 }
  0x37   :  { %v3048_v12 = vld [vmem:[%s6167_s0 + $0x30d] ss:$16 sm:%s649_s17]   ;;  %v3068_v43 = vld [vmem:[%s6167_s0 + $0x20c] ss:$16 sm:%s745_s13]   ;;  %s760_s13 = smov 3  ;;  %s888_s30 = smov 192 }
  0x38   :  { %v652_v14 = vsel %vm6_vm0, %v3048_v12, %v3047_v11  ;;  %v3049_v15 = vld [vmem:[%s6167_s0 + $0x30d] ss:$16 sm:%s654_s21]   ;;  %s669_s21 = smov 3  ;;  %v3069_v44 = vld [vmem:[%s6167_s0 + $0x20c] ss:$16 sm:%s750_s14]   ;;  %s809_s14 = smov 12 }
  0x39   :  { %v3050_v16 = vld [vmem:[%s6167_s0 + $0x30d] ss:$16 sm:%s659_s22]   ;;  %v657_v17 = vsel %vm10_vm1, %v3049_v15, %v652_v14  ;;  %s718_s22 = smov 12  ;;  %v3064_v49 = vld [vmem:[%s6167_s0 + $0xc] ss:$16 sm:%s723_s23]   ;;  %s875_s23 = smov 3 }
  0x3a   :  { %549 = vrot.lane.b32.xlu0 %v548_v63, %s3547_s27  ;;  %617 = vrot.lane.b32.xlu1 %v616_v5, %s3547_s27  ;;  %v3042_v18 = vld [vmem:[%s6167_s0 + $0x10d] ss:$16 sm:%s623_s25]   ;;  %v662_v19 = vsel %vm14_vm2, %v3050_v16, %v657_v17  ;;  %s865_s17 = smov 192  ;;  %s928_s25 = smov 48 }
  0x3b   :  { %v3043_v20 = vld [vmem:[%s6167_s0 + $0x10d] ss:$16 sm:%s626_s2]   ;;  %s783_s2 = smov 3  ;;  %v3063_v48 = vld [vmem:[%s6167_s0 + $0xc] ss:$16 sm:%s718_s22]   ;;  %s906_s5 = smov 48 }
  0x3c   :  { %v3044_v21 = vld [vmem:[%s6167_s0 + $0x10d] ss:$16 sm:%s631_s3]   ;;  %v629_v22 = vsel %vm6_vm0, %v3043_v20, %v3042_v18  ;;  %s786_s3 = smov 12  ;;  %v3065_v51 = vld [vmem:[%s6167_s0 + $0xc] ss:$16 sm:%s728_s29]   ;;  %s832_s29 = smov 12 }
  0x3d   :  { %v3045_v23 = vld [vmem:[%s6167_s0 + $0x10d] ss:$16 sm:%s636_s8]   ;;  %v634_v24 = vsel %vm10_vm1, %v3044_v21, %v629_v22  ;;  %s740_s8 = smov 12  ;;  %v3076_v53 = vld [vmem:[%s6167_s0 + $0x28c] ss:$16 sm:%s783_s2]   ;;  %s3549_s22 = smov 44  }
  0x3e   :  { %594 = vrot.lane.b32.xlu0 %v593_v13, %s3547_s27  ;;  %663 = vrot.lane.b32.xlu1 %v662_v19, %s3547_s27  ;;  %v3057_v25 = vld [vmem:[%s6167_s0 + $0x38d] ss:$16 sm:%s692_s11]   ;;  %v639_v27 = vsel %vm14_vm2, %v3045_v23, %v634_v24  ;;  %s860_s11 = smov 48  ;;  %s951_s2 = smov 48 }
  0x3f   :  { %v3058_v26 = vld [vmem:[%s6167_s0 + $0x38d] ss:$16 sm:%s695_s12]   ;;  %v3067_v40 = vld [vmem:[%s6167_s0 + $0x20c] ss:$16 sm:%s740_s8]   ;;  %s791_s8 = smov 48  ;;  %s911_s12 = smov 192 }
  0x40   :  { %v698_v28 = vsel %vm6_vm0, %v3058_v26, %v3057_v25  ;;  %v3059_v29 = vld [vmem:[%s6167_s0 + $0x38d] ss:$16 sm:%s700_s15]   ;;  %s715_s15 = smov 3  ;;  %v743_v42 = vsel %vm6_vm0, %v3067_v40, %v3066_v39  ;;  %v3077_v54 = vld [vmem:[%s6167_s0 + $0x28c] ss:$16 sm:%s786_s3]   ;;  %s956_s7 = smov 192 }
  0x41   :  { %v3060_v30 = vld [vmem:[%s6167_s0 + $0x38d] ss:$16 sm:%s705_s18]   ;;  %v703_v31 = vsel %vm10_vm1, %v3059_v29, %v698_v28  ;;  %v748_v45 = vsel %vm10_vm1, %v3068_v43, %v743_v42  ;;  %v3062_v46 = vld [vmem:[%s6167_s0 + $0xc] ss:$16 sm:%s715_s15]   ;;  %s763_s18 = smov 12  ;;  %v789_v56 = vsel %vm6_vm0, %v3077_v54, %v3076_v53  ;;  %s1025_s15 = smov 192 }
  0x42   :  { %640 = vrot.lane.b32.xlu0 %v639_v27, %s3547_s27  ;;  %v3052_v32 = vld [vmem:[%s6167_s0 + $0x18d] ss:$16 sm:%s669_s21]   ;;  %v708_v33 = vsel %vm14_vm2, %v3060_v30, %v703_v31  ;;  %v753_v47 = vsel %vm14_vm2, %v3069_v44, %v748_v45  ;;  %v721_v50 = vsel %vm6_vm0, %v3063_v48, %v3062_v46  ;;  %s979_s21 = smov 192  ;;  %s1002_s3 = smov 192 }
  0x43   :  { %v3053_v34 = vld [vmem:[%s6167_s0 + $0x18d] ss:$16 sm:%s672_s26]   ;;  %709 = vrot.lane.b32.xlu1 %v708_v33, %s3547_s27  ;;  %v726_v52 = vsel %vm10_vm1, %v3064_v49, %v721_v50  ;;  %s933_s26 = smov 192 }
  0x44   :  { %v3054_v35 = vld [vmem:[%s6167_s0 + $0x18d] ss:$16 sm:%s677_s28]   ;;  %v675_v36 = vsel %vm6_vm0, %v3053_v34, %v3052_v32  ;;  %v731_v55 = vsel %vm14_vm2, %v3065_v51, %v726_v52  ;;  %v3078_v57 = vld [vmem:[%s6167_s0 + $0x28c] ss:$16 sm:%s791_s8]   ;;  %s829_s28 = smov 3  ;;  %s806_s8 = smov 3 }
  0x45   :  { %v3055_v37 = vld [vmem:[%s6167_s0 + $0x18d] ss:$16 sm:%s682_s4]   ;;  %v680_v38 = vsel %vm10_vm1, %v3054_v35, %v675_v36  ;;  %v3079_v58 = vld [vmem:[%s6167_s0 + $0x28c] ss:$16 sm:%s796_s9]   ;;  %v794_v59 = vsel %vm10_vm1, %v3078_v57, %v789_v56  ;;  %s837_s4 = smov 48  ;;  %s855_s9 = smov 12 }
  0x46   :  { %v685_v41 = vsel %vm14_vm2, %v3055_v37, %v680_v38  ;;  %v3071_v60 = vld [vmem:[%s6167_s0 + $0x8c] ss:$16 sm:%s760_s13]   ;;  %v799_v61 = vsel %vm14_vm2, %v3079_v58, %v794_v59  ;;  %v3107_v35 = vld [vmem:[%s6167_s0 + $0x20b] ss:$16 sm:%s928_s25]   ;;  %s943_s25 = smov 3  ;;  %s1071_s13 = smov 192 }
  0x47   :  { %686 = vrot.lane.b32.xlu0 %v685_v41, %s3547_s27  ;;  %754 = vrot.lane.b32.xlu1 %v753_v47, %s3548_s10  ;;  %v3072_v62 = vld [vmem:[%s6167_s0 + $0x8c] ss:$16 sm:%s763_s18]   ;;  %s883_s27 = smov 48  ;;  %s1089_s18 = smov 48 }
  0x48   :  { %v3073_v63 = vld [vmem:[%s6167_s0 + $0x8c] ss:$16 sm:%s768_s19]   ;;  %v766_v0 = vsel %vm6_vm0, %v3072_v62, %v3071_v60  ;;  %s920_s19 = smov 3  ;;  %v3108_v36 = vld [vmem:[%s6167_s0 + $0x20b] ss:$16 sm:%s933_s26]   ;;  %s992_s26 = smov 12 }
  0x49   :  { %v3074_v1 = vld [vmem:[%s6167_s0 + $0x8c] ss:$16 sm:%s773_s24]   ;;  %v771_v2 = vsel %vm10_vm1, %v3073_v63, %v766_v0  ;;  %s878_s24 = smov 12  ;;  %v3105_v31 = vld [vmem:[%s6167_s0 + $0x20b] ss:$16 sm:%s920_s19]   ;;  %s1139_s19 = smov 192 }
  0x4a   :  { %v3086_v3 = vld [vmem:[%s6167_s0 + $0x30c] ss:$16 sm:%s829_s28]   ;;  %v776_v5 = vsel %vm14_vm2, %v3074_v1, %v771_v2  ;;  %v3103_v41 = vld [vmem:[%s6167_s0 + $0xb] ss:$16 sm:%s906_s5]   ;;  %s997_s28 = smov 48  ;;  %s1058_s5 = smov 3 }
  0x4b   :  { %732 = vrot.lane.b32.xlu0 %v731_v55, %s3548_s10  ;;  %800 = vrot.lane.b32.xlu1 %v799_v61, %s3548_s10  ;;  %v3087_v4 = vld [vmem:[%s6167_s0 + $0x30c] ss:$16 sm:%s832_s29]   ;;  %s1048_s29 = smov 192 }
  0x4c   :  { %v835_v6 = vsel %vm6_vm0, %v3087_v4, %v3086_v3  ;;  %v3088_v7 = vld [vmem:[%s6167_s0 + $0x30c] ss:$16 sm:%s837_s4]   ;;  %s852_s4 = smov 3  ;;  %v3104_v43 = vld [vmem:[%s6167_s0 + $0xb] ss:$16 sm:%s911_s12]   ;;  %s1015_s12 = smov 12 }
  0x4d   :  { %v3089_v8 = vld [vmem:[%s6167_s0 + $0x30c] ss:$16 sm:%s842_s6]   ;;  %v840_v9 = vsel %vm10_vm1, %v3088_v7, %v835_v6  ;;  %s901_s6 = smov 12  ;;  %v3118_v50 = vld [vmem:[%s6167_s0 + $0x28b] ss:$16 sm:%s979_s21]   ;;  %s1038_s21 = smov 12 }
  0x4e   :  { %v3081_v10 = vld [vmem:[%s6167_s0 + $0x10c] ss:$16 sm:%s806_s8]   ;;  %v845_v11 = vsel %vm14_vm2, %v3089_v8, %v840_v9  ;;  %v3102_v40 = vld [vmem:[%s6167_s0 + $0xb] ss:$16 sm:%s901_s6]   ;;  %s1111_s8 = smov 48  ;;  %s3550_s6 = smov 40  }
  0x4f   :  { %777 = vrot.lane.b32.xlu0 %v776_v5, %s3548_s10  ;;  %v3082_v12 = vld [vmem:[%s6167_s0 + $0x10c] ss:$16 sm:%s809_s14]   ;;  %846 = vrot.lane.b32.xlu1 %v845_v11, %s3548_s10  ;;  %s966_s14 = smov 3 }
  0x50   :  { %v3083_v13 = vld [vmem:[%s6167_s0 + $0x10c] ss:$16 sm:%s814_s16]   ;;  %v812_v14 = vsel %vm6_vm0, %v3082_v12, %v3081_v10  ;;  %s969_s16 = smov 12  ;;  %v3115_v45 = vld [vmem:[%s6167_s0 + $0x28b] ss:$16 sm:%s966_s14]   ;;  %s1134_s14 = smov 48 }
  0x51   :  { %v3084_v15 = vld [vmem:[%s6167_s0 + $0x10c] ss:$16 sm:%s819_s20]   ;;  %v817_v16 = vsel %vm10_vm1, %v3083_v13, %v812_v14  ;;  %s923_s20 = smov 12  ;;  %v3116_v46 = vld [vmem:[%s6167_s0 + $0x28b] ss:$16 sm:%s969_s16]   ;;  %s1185_s16 = smov 192 }
  0x52   :  { %v3096_v17 = vld [vmem:[%s6167_s0 + $0x38c] ss:$16 sm:%s875_s23]   ;;  %v822_v19 = vsel %vm14_vm2, %v3084_v15, %v817_v16  ;;  %v3106_v32 = vld [vmem:[%s6167_s0 + $0x20b] ss:$16 sm:%s923_s20]   ;;  %s974_s20 = smov 48  ;;  %v972_v48 = vsel %vm6_vm0, %v3116_v46, %v3115_v45  ;;  %s1043_s23 = smov 48 }
  0x53   :  { %v3097_v18 = vld [vmem:[%s6167_s0 + $0x38c] ss:$16 sm:%s878_s24]   ;;  %823 = vrot.lane.b32.xlu0 %v822_v19, %s3548_s10  ;;  %v926_v34 = vsel %vm6_vm0, %v3106_v32, %v3105_v31  ;;  %s1094_s24 = smov 192 }
  0x54   :  { %v881_v20 = vsel %vm6_vm0, %v3097_v18, %v3096_v17  ;;  %v3098_v21 = vld [vmem:[%s6167_s0 + $0x38c] ss:$16 sm:%s883_s27]   ;;  %s898_s27 = smov 3  ;;  %v931_v37 = vsel %vm10_vm1, %v3107_v35, %v926_v34  ;;  %v3117_v49 = vld [vmem:[%s6167_s0 + $0x28b] ss:$16 sm:%s974_s20]   ;;  %s989_s20 = smov 3 }
  0x55   :  { %v3099_v22 = vld [vmem:[%s6167_s0 + $0x38c] ss:$16 sm:%s888_s30]   ;;  %v886_v23 = vsel %vm10_vm1, %v3098_v21, %v881_v20  ;;  %v3101_v38 = vld [vmem:[%s6167_s0 + $0xb] ss:$16 sm:%s898_s27]   ;;  %v936_v39 = vsel %vm14_vm2, %v3108_v36, %v931_v37  ;;  %s946_s30 = smov 12  ;;  %v977_v51 = vsel %vm10_vm1, %v3117_v49, %v972_v48  ;;  %s1208_s27 = smov 192 }
  0x56   :  { %v3091_v24 = vld [vmem:[%s6167_s0 + $0x18c] ss:$16 sm:%s852_s4]   ;;  %v891_v25 = vsel %vm14_vm2, %v3099_v22, %v886_v23  ;;  %v904_v42 = vsel %vm6_vm0, %v3102_v40, %v3101_v38  ;;  %v3110_v52 = vld [vmem:[%s6167_s0 + $0x8b] ss:$16 sm:%s943_s25]   ;;  %v982_v53 = vsel %vm14_vm2, %v3118_v50, %v977_v51  ;;  %s1162_s4 = smov 192  ;;  %s1254_s25 = smov 192 }
  0x57   :  { %v3092_v26 = vld [vmem:[%s6167_s0 + $0x18c] ss:$16 sm:%s855_s9]   ;;  %892 = vrot.lane.b32.xlu1 %v891_v25, %s3548_s10  ;;  %v909_v44 = vsel %vm10_vm1, %v3103_v41, %v904_v42  ;;  %s1116_s9 = smov 192 }
  0x58   :  { %v3093_v27 = vld [vmem:[%s6167_s0 + $0x18c] ss:$16 sm:%s860_s11]   ;;  %v858_v28 = vsel %vm6_vm0, %v3092_v26, %v3091_v24  ;;  %v914_v47 = vsel %vm14_vm2, %v3104_v43, %v909_v44  ;;  %s1012_s11 = smov 3  ;;  %v3111_v54 = vld [vmem:[%s6167_s0 + $0x8b] ss:$16 sm:%s946_s30]   ;;  %s1272_s30 = smov 48 }
  0x59   :  { %v3094_v29 = vld [vmem:[%s6167_s0 + $0x18c] ss:$16 sm:%s865_s17]   ;;  %v863_v30 = vsel %vm10_vm1, %v3093_v27, %v858_v28  ;;  %v3112_v55 = vld [vmem:[%s6167_s0 + $0x8b] ss:$16 sm:%s951_s2]   ;;  %s1020_s17 = smov 48  ;;  %v949_v56 = vsel %vm6_vm0, %v3111_v54, %v3110_v52  ;;  %s1103_s2 = smov 3 }
  0x5a   :  { %v868_v33 = vsel %vm14_vm2, %v3094_v29, %v863_v30  ;;  %v3113_v57 = vld [vmem:[%s6167_s0 + $0x8b] ss:$16 sm:%s956_s7]   ;;  %v954_v58 = vsel %vm10_vm1, %v3112_v55, %v949_v56  ;;  %s1061_s7 = smov 12  ;;  %v3144_v23 = vld [vmem:[%s6167_s0 + $0x20a] ss:$16 sm:%s1103_s2]   ;;  %s1322_s2 = smov 192 }
  0x5b   :  { %869 = vrot.lane.b32.xlu0 %v868_v33, %s3548_s10  ;;  %937 = vrot.lane.b32.xlu1 %v936_v39, %s3549_s22  ;;  %v3125_v59 = vld [vmem:[%s6167_s0 + $0x30b] ss:$16 sm:%s1012_s11]   ;;  %v959_v61 = vsel %vm14_vm2, %v3113_v57, %v954_v58  ;;  %s1066_s10 = smov 48  ;;  %s1180_s11 = smov 48 }
  0x5c   :  { %v3126_v60 = vld [vmem:[%s6167_s0 + $0x30b] ss:$16 sm:%s1015_s12]   ;;  %v3146_v27 = vld [vmem:[%s6167_s0 + $0x20a] ss:$16 sm:%s1111_s8]   ;;  %s1126_s8 = smov 3  ;;  %s1231_s12 = smov 192 }
  0x5d   :  { %v1018_v62 = vsel %vm6_vm0, %v3126_v60, %v3125_v59  ;;  %v3127_v63 = vld [vmem:[%s6167_s0 + $0x30b] ss:$16 sm:%s1020_s17]   ;;  %s1035_s17 = smov 3  ;;  %v3147_v28 = vld [vmem:[%s6167_s0 + $0x20a] ss:$16 sm:%s1116_s9]   ;;  %s1175_s9 = smov 12 }
  0x5e   :  { %v3128_v0 = vld [vmem:[%s6167_s0 + $0x30b] ss:$16 sm:%s1025_s15]   ;;  %v1023_v1 = vsel %vm10_vm1, %v3127_v63, %v1018_v62  ;;  %s1084_s15 = smov 12  ;;  %v3142_v33 = vld [vmem:[%s6167_s0 + $0xa] ss:$16 sm:%s1089_s18]   ;;  %s1241_s18 = smov 3 }
  0x5f   :  { %915 = vrot.lane.b32.xlu0 %v914_v47, %s3549_s22  ;;  %983 = vrot.lane.b32.xlu1 %v982_v53, %s3549_s22  ;;  %v3120_v2 = vld [vmem:[%s6167_s0 + $0x10b] ss:$16 sm:%s989_s20]   ;;  %v1028_v3 = vsel %vm14_vm2, %v3128_v0, %v1023_v1  ;;  %s1294_s20 = smov 48 }
  0x60   :  { %v3121_v4 = vld [vmem:[%s6167_s0 + $0x10b] ss:$16 sm:%s992_s26]   ;;  %s1149_s26 = smov 3  ;;  %v3141_v32 = vld [vmem:[%s6167_s0 + $0xa] ss:$16 sm:%s1084_s15]   ;;  %s3551_s15 = smov 36  }
  0x61   :  { %v3122_v5 = vld [vmem:[%s6167_s0 + $0x10b] ss:$16 sm:%s997_s28]   ;;  %v995_v6 = vsel %vm6_vm0, %v3121_v4, %v3120_v2  ;;  %s1152_s28 = smov 12  ;;  %v3143_v35 = vld [vmem:[%s6167_s0 + $0xa] ss:$16 sm:%s1094_s24]   ;;  %s1198_s24 = smov 12 }
  0x62   :  { %v3123_v7 = vld [vmem:[%s6167_s0 + $0x10b] ss:$16 sm:%s1002_s3]   ;;  %v1000_v8 = vsel %vm10_vm1, %v3122_v5, %v995_v6  ;;  %s1106_s3 = smov 12  ;;  %v3154_v37 = vld [vmem:[%s6167_s0 + $0x28a] ss:$16 sm:%s1149_s26]   ;;  %s1317_s26 = smov 48 }
  0x63   :  { %960 = vrot.lane.b32.xlu0 %v959_v61, %s3549_s22  ;;  %1029 = vrot.lane.b32.xlu1 %v1028_v3, %s3549_s22  ;;  %v3135_v9 = vld [vmem:[%s6167_s0 + $0x38b] ss:$16 sm:%s1058_s5]   ;;  %v1005_v11 = vsel %vm14_vm2, %v3123_v7, %v1000_v8  ;;  %s1226_s5 = smov 48 }
  0x64   :  { %v3136_v10 = vld [vmem:[%s6167_s0 + $0x38b] ss:$16 sm:%s1061_s7]   ;;  %v3145_v24 = vld [vmem:[%s6167_s0 + $0x20a] ss:$16 sm:%s1106_s3]   ;;  %s1157_s3 = smov 48  ;;  %s1277_s7 = smov 192 }
  0x65   :  { %v1064_v12 = vsel %vm6_vm0, %v3136_v10, %v3135_v9  ;;  %v3137_v13 = vld [vmem:[%s6167_s0 + $0x38b] ss:$16 sm:%s1066_s10]   ;;  %s1081_s10 = smov 3  ;;  %v1109_v26 = vsel %vm6_vm0, %v3145_v24, %v3144_v23  ;;  %v3155_v38 = vld [vmem:[%s6167_s0 + $0x28a] ss:$16 sm:%s1152_s28]   ;;  %s1368_s28 = smov 192 }
  0x66   :  { %v3138_v14 = vld [vmem:[%s6167_s0 + $0x38b] ss:$16 sm:%s1071_s13]   ;;  %v1069_v15 = vsel %vm10_vm1, %v3137_v13, %v1064_v12  ;;  %v1114_v29 = vsel %vm10_vm1, %v3146_v27, %v1109_v26  ;;  %v3140_v30 = vld [vmem:[%s6167_s0 + $0xa] ss:$16 sm:%s1081_s10]   ;;  %s1129_s13 = smov 12  ;;  %v1155_v40 = vsel %vm6_vm0, %v3155_v38, %v3154_v37  ;;  %s1391_s10 = smov 192 }
  0x67   :  { %1006 = vrot.lane.b32.xlu0 %v1005_v11, %s3549_s22  ;;  %v3130_v16 = vld [vmem:[%s6167_s0 + $0x18b] ss:$16 sm:%s1035_s17]   ;;  %v1074_v17 = vsel %vm14_vm2, %v3138_v14, %v1069_v15  ;;  %v1119_v31 = vsel %vm14_vm2, %v3147_v28, %v1114_v29  ;;  %v1087_v34 = vsel %vm6_vm0, %v3141_v32, %v3140_v30  ;;  %s1345_s17 = smov 192 }
  0x68   :  { %v3131_v18 = vld [vmem:[%s6167_s0 + $0x18b] ss:$16 sm:%s1038_s21]   ;;  %1075 = vrot.lane.b32.xlu1 %v1074_v17, %s3549_s22  ;;  %v1092_v36 = vsel %vm10_vm1, %v3142_v33, %v1087_v34  ;;  %s1299_s21 = smov 192 }
  0x69   :  { %v3132_v19 = vld [vmem:[%s6167_s0 + $0x18b] ss:$16 sm:%s1043_s23]   ;;  %v1041_v20 = vsel %vm6_vm0, %v3131_v18, %v3130_v16  ;;  %v1097_v39 = vsel %vm14_vm2, %v3143_v35, %v1092_v36  ;;  %v3156_v41 = vld [vmem:[%s6167_s0 + $0x28a] ss:$16 sm:%s1157_s3]   ;;  %s1195_s23 = smov 3  ;;  %s1172_s3 = smov 3 }
  0x6a   :  { %v3133_v21 = vld [vmem:[%s6167_s0 + $0x18b] ss:$16 sm:%s1048_s29]   ;;  %v1046_v22 = vsel %vm10_vm1, %v3132_v19, %v1041_v20  ;;  %v3157_v42 = vld [vmem:[%s6167_s0 + $0x28a] ss:$16 sm:%s1162_s4]   ;;  %v1160_v43 = vsel %vm10_vm1, %v3156_v41, %v1155_v40  ;;  %s1203_s29 = smov 48  ;;  %s1221_s4 = smov 12 }
  0x6b   :  { %v1051_v25 = vsel %vm14_vm2, %v3133_v21, %v1046_v22  ;;  %v3149_v44 = vld [vmem:[%s6167_s0 + $0x8a] ss:$16 sm:%s1126_s8]   ;;  %v1165_v45 = vsel %vm14_vm2, %v3157_v42, %v1160_v43  ;;  %v3185_v20 = vld [vmem:[%s6167_s0 + $0x209] ss:$16 sm:%s1294_s20]   ;;  %s1309_s20 = smov 3  ;;  %s1437_s8 = smov 192 }
  0x6c   :  { %1052 = vrot.lane.b32.xlu0 %v1051_v25, %s3549_s22  ;;  %1120 = vrot.lane.b32.xlu1 %v1119_v31, %s3550_s6  ;;  %v3150_v46 = vld [vmem:[%s6167_s0 + $0x8a] ss:$16 sm:%s1129_s13]   ;;  %s1249_s22 = smov 48  ;;  %s1455_s13 = smov 48 }
  0x6d   :  { %v3151_v47 = vld [vmem:[%s6167_s0 + $0x8a] ss:$16 sm:%s1134_s14]   ;;  %v1132_v48 = vsel %vm6_vm0, %v3150_v46, %v3149_v44  ;;  %s1286_s14 = smov 3  ;;  %v3186_v21 = vld [vmem:[%s6167_s0 + $0x209] ss:$16 sm:%s1299_s21]   ;;  %s1358_s21 = smov 12 }
  0x6e   :  { %v3152_v49 = vld [vmem:[%s6167_s0 + $0x8a] ss:$16 sm:%s1139_s19]   ;;  %v1137_v50 = vsel %vm10_vm1, %v3151_v47, %v1132_v48  ;;  %s1244_s19 = smov 12  ;;  %v3183_v16 = vld [vmem:[%s6167_s0 + $0x209] ss:$16 sm:%s1286_s14]   ;;  %s12_s14 = smov 192 }
  0x6f   :  { %v3164_v51 = vld [vmem:[%s6167_s0 + $0x30a] ss:$16 sm:%s1195_s23]   ;;  %v1142_v53 = vsel %vm14_vm2, %v3152_v49, %v1137_v50  ;;  %v3181_v27 = vld [vmem:[%s6167_s0 + $0x9] ss:$16 sm:%s1272_s30]   ;;  %s1363_s23 = smov 48  ;;  %s1424_s30 = smov 3 }
  0x70   :  { %1098 = vrot.lane.b32.xlu0 %v1097_v39, %s3550_s6  ;;  %1166 = vrot.lane.b32.xlu1 %v1165_v45, %s3550_s6  ;;  %v3165_v52 = vld [vmem:[%s6167_s0 + $0x30a] ss:$16 sm:%s1198_s24]   ;;  %s1414_s24 = smov 192 }
  0x71   :  { %v1201_v54 = vsel %vm6_vm0, %v3165_v52, %v3164_v51  ;;  %v3166_v55 = vld [vmem:[%s6167_s0 + $0x30a] ss:$16 sm:%s1203_s29]   ;;  %s1218_s29 = smov 3  ;;  %v3182_v30 = vld [vmem:[%s6167_s0 + $0x9] ss:$16 sm:%s1277_s7]   ;;  %s1381_s7 = smov 12 }
  0x72   :  { %v3167_v56 = vld [vmem:[%s6167_s0 + $0x30a] ss:$16 sm:%s1208_s27]   ;;  %v1206_v57 = vsel %vm10_vm1, %v3166_v55, %v1201_v54  ;;  %s1267_s27 = smov 12  ;;  %v3196_v37 = vld [vmem:[%s6167_s0 + $0x289] ss:$16 sm:%s1345_s17]   ;;  %s1404_s17 = smov 12 }
  0x73   :  { %v3159_v58 = vld [vmem:[%s6167_s0 + $0x10a] ss:$16 sm:%s1172_s3]   ;;  %v1211_v59 = vsel %vm14_vm2, %v3167_v56, %v1206_v57  ;;  %v3180_v26 = vld [vmem:[%s6167_s0 + $0x9] ss:$16 sm:%s1267_s27]   ;;  %s1477_s3 = smov 48  ;;  %s3552_s27 = smov 32  }
  0x74   :  { %1143 = vrot.lane.b32.xlu0 %v1142_v53, %s3550_s6  ;;  %v3160_v60 = vld [vmem:[%s6167_s0 + $0x10a] ss:$16 sm:%s1175_s9]   ;;  %1212 = vrot.lane.b32.xlu1 %v1211_v59, %s3550_s6  ;;  %s1332_s9 = smov 3 }
  0x75   :  { %v3161_v61 = vld [vmem:[%s6167_s0 + $0x10a] ss:$16 sm:%s1180_s11]   ;;  %v1178_v62 = vsel %vm6_vm0, %v3160_v60, %v3159_v58  ;;  %s1335_s11 = smov 12  ;;  %v3193_v32 = vld [vmem:[%s6167_s0 + $0x289] ss:$16 sm:%s1332_s9]   ;;  %s8_s9 = smov 48 }
  0x76   :  { %v3162_v63 = vld [vmem:[%s6167_s0 + $0x10a] ss:$16 sm:%s1185_s16]   ;;  %v1183_v0 = vsel %vm10_vm1, %v3161_v61, %v1178_v62  ;;  %s1289_s16 = smov 12  ;;  %v3194_v33 = vld [vmem:[%s6167_s0 + $0x289] ss:$16 sm:%s1335_s11]   ;;  %s85_s11 = smov 12 }
  0x77   :  { %v3174_v1 = vld [vmem:[%s6167_s0 + $0x38a] ss:$16 sm:%s1241_s18]   ;;  %v1188_v3 = vsel %vm14_vm2, %v3162_v63, %v1183_v0  ;;  %v3184_v17 = vld [vmem:[%s6167_s0 + $0x209] ss:$16 sm:%s1289_s16]   ;;  %s1340_s16 = smov 48  ;;  %v1338_v35 = vsel %vm6_vm0, %v3194_v33, %v3193_v32  ;;  %s1409_s18 = smov 48 }
  0x78   :  { %v3175_v2 = vld [vmem:[%s6167_s0 + $0x38a] ss:$16 sm:%s1244_s19]   ;;  %1189 = vrot.lane.b32.xlu0 %v1188_v3, %s3550_s6  ;;  %v4335_v14 = vpop.permute.xlu1 %228   ;;  %v1292_v19 = vsel %vm6_vm0, %v3184_v17, %v3183_v16  ;;  %s1460_s19 = smov 192 }
  0x79   :  { %v1247_v4 = vsel %vm6_vm0, %v3175_v2, %v3174_v1  ;;  %v3176_v5 = vld [vmem:[%s6167_s0 + $0x38a] ss:$16 sm:%s1249_s22]   ;;  %s1264_s22 = smov 3  ;;  %v1297_v23 = vsel %vm10_vm1, %v3185_v20, %v1292_v19  ;;  %v3195_v36 = vld [vmem:[%s6167_s0 + $0x289] ss:$16 sm:%s1340_s16]   ;;  %s1355_s16 = smov 3 }
  0x7a   :  { %v3177_v6 = vld [vmem:[%s6167_s0 + $0x38a] ss:$16 sm:%s1254_s25]   ;;  %v1252_v7 = vsel %vm10_vm1, %v3176_v5, %v1247_v4  ;;  %v3179_v24 = vld [vmem:[%s6167_s0 + $0x9] ss:$16 sm:%s1264_s22]   ;;  %v1302_v25 = vsel %vm14_vm2, %v3186_v21, %v1297_v23  ;;  %s1312_s25 = smov 12  ;;  %v1343_v39 = vsel %vm10_vm1, %v3195_v36, %v1338_v35  ;;  %s1528_s22 = smov 192 }
  0x7b   :  { %v3169_v8 = vld [vmem:[%s6167_s0 + $0x18a] ss:$16 sm:%s1218_s29]   ;;  %v1257_v9 = vsel %vm14_vm2, %v3177_v6, %v1252_v7  ;;  %v1270_v29 = vsel %vm6_vm0, %v3180_v26, %v3179_v24  ;;  %v3188_v40 = vld [vmem:[%s6167_s0 + $0x89] ss:$16 sm:%s1309_s20]   ;;  %v1348_v41 = vsel %vm14_vm2, %v3196_v37, %v1343_v39  ;;  %s32_s29 = smov 192  ;;  %s1630_s20 = smov 3 }
  0x7c   :  { %v3170_v10 = vld [vmem:[%s6167_s0 + $0x18a] ss:$16 sm:%s1221_s4]   ;;  %1258 = vrot.lane.b32.xlu1 %v1257_v9, %s3550_s6  ;;  %v4352_v22 = vpop.permute.xlu0 %183   ;;  %v1275_v31 = vsel %vm10_vm1, %v3181_v27, %v1270_v29  ;;  %s1482_s4 = smov 192 }
  0x7d   :  { %v3171_v11 = vld [vmem:[%s6167_s0 + $0x18a] ss:$16 sm:%s1226_s5]   ;;  %v1224_v12 = vsel %vm6_vm0, %v3170_v10, %v3169_v8  ;;  %v1280_v34 = vsel %vm14_vm2, %v3182_v30, %v1275_v31  ;;  %s1378_s5 = smov 3  ;;  %v3189_v42 = vld [vmem:[%s6167_s0 + $0x89] ss:$16 sm:%s1312_s25]   ;;  %s1492_s25 = smov 3 }
  0x7e   :  { %v3172_v13 = vld [vmem:[%s6167_s0 + $0x18a] ss:$16 sm:%s1231_s12]   ;;  %v1229_v15 = vsel %vm10_vm1, %v3171_v11, %v1224_v12  ;;  %v3190_v43 = vld [vmem:[%s6167_s0 + $0x89] ss:$16 sm:%s1317_s26]   ;;  %s1386_s12 = smov 48  ;;  %v1315_v45 = vsel %vm6_vm0, %v3189_v42, %v3188_v40  ;;  %s1469_s26 = smov 3 }
  0x7f   :  { %v1234_v18 = vsel %vm14_vm2, %v3172_v13, %v1229_v15  ;;  %v3191_v46 = vld [vmem:[%s6167_s0 + $0x89] ss:$16 sm:%s1322_s2]   ;;  %v1320_v47 = vsel %vm10_vm1, %v3190_v43, %v1315_v45  ;;  %s1427_s2 = smov 12  ;;  %v3222_v17 = vld [vmem:[%s6167_s0 + $0x208] ss:$16 sm:%s1469_s26]   ;;  %s2255_s26 = smov 48 }
  0x80   :  { %1235 = vrot.lane.b32.xlu0 %v1234_v18, %s3550_s6  ;;  %v4366_v28 = vpop.permute.xlu1 %251   ;;  %1303 = vrot.lane.b32.xlu1 %v1302_v25, %s3551_s15  ;;  %v3203_v48 = vld [vmem:[%s6167_s0 + $0x309] ss:$16 sm:%s1378_s5]   ;;  %v1325_v50 = vsel %vm14_vm2, %v3191_v46, %v1320_v47  ;;  %s1432_s6 = smov 48  ;;  %s1500_s5 = smov 48 }
  0x81   :  { %v3204_v49 = vld [vmem:[%s6167_s0 + $0x309] ss:$16 sm:%s1381_s7]   ;;  %v3224_v21 = vld [vmem:[%s6167_s0 + $0x208] ss:$16 sm:%s1477_s3]   ;;  %s2_s3 = smov 3  ;;  %s148_s7 = smov 12 }
  0x82   :  { %v1384_v51 = vsel %vm6_vm0, %v3204_v49, %v3203_v48  ;;  %v3205_v52 = vld [vmem:[%s6167_s0 + $0x309] ss:$16 sm:%s1386_s12]   ;;  %s1401_s12 = smov 3  ;;  %v3225_v23 = vld [vmem:[%s6167_s0 + $0x208] ss:$16 sm:%s1482_s4]   ;;  %s1495_s4 = smov 12 }
  0x83   :  { %v3206_v53 = vld [vmem:[%s6167_s0 + $0x309] ss:$16 sm:%s1391_s10]   ;;  %v1389_v55 = vsel %vm10_vm1, %v3205_v52, %v1384_v51  ;;  %s1450_s10 = smov 12  ;;  %v3220_v30 = vld [vmem:[%s6167_s0 + $0x8] ss:$16 sm:%s1455_s13]   ;;  %s103_s13 = smov 3 }
  0x84   :  { %v4388_v38 = vpop.permute.xlu0 %205   ;;  %1281 = vrot.lane.b32.xlu0 %v1280_v34, %s3551_s15  ;;  %1349 = vrot.lane.b32.xlu1 %v1348_v41, %s3551_s15  ;;  %v3198_v56 = vld [vmem:[%s6167_s0 + $0x109] ss:$16 sm:%s1355_s16]   ;;  %v1394_v57 = vsel %vm14_vm2, %v3206_v53, %v1389_v55  ;;  %s1515_s16 = smov 3 }
  0x85   :  { %v3199_v58 = vld [vmem:[%s6167_s0 + $0x109] ss:$16 sm:%s1358_s21]   ;;  %s19_s21 = smov 3  ;;  %v3219_v29 = vld [vmem:[%s6167_s0 + $0x8] ss:$16 sm:%s1450_s10]   ;;  %s1505_s10 = smov 192 }
  0x86   :  { %v3200_v59 = vld [vmem:[%s6167_s0 + $0x109] ss:$16 sm:%s1363_s23]   ;;  %v1361_v61 = vsel %vm6_vm0, %v3199_v58, %v3198_v56  ;;  %s22_s23 = smov 12  ;;  %v3221_v33 = vld [vmem:[%s6167_s0 + $0x8] ss:$16 sm:%s1460_s19]   ;;  %s1518_s19 = smov 12 }
  0x87   :  { %v3201_v62 = vld [vmem:[%s6167_s0 + $0x109] ss:$16 sm:%s1368_s28]   ;;  %v1366_v63 = vsel %vm10_vm1, %v3200_v59, %v1361_v61  ;;  %s1472_s28 = smov 12  ;;  %v2910_v35 = vld [vmem:[%s6167_s0 + $0x80] ss:$16 sm:%s19_s21]   ;;  %s1706_s21 = smov 48 }
  0x88   :  { %v4402_v44 = vpop.permute.xlu1 %297   ;;  %1326 = vrot.lane.b32.xlu0 %v1325_v50, %s3551_s15  ;;  %1395 = vrot.lane.b32.xlu1 %v1394_v57, %s3551_s15  ;;  %v3213_v0 = vld [vmem:[%s6167_s0 + $0x389] ss:$16 sm:%s1424_s30]   ;;  %v1371_v2 = vsel %vm14_vm2, %v3201_v62, %v1366_v63  ;;  %s1538_s30 = smov 3 }
  0x89   :  { %v3214_v1 = vld [vmem:[%s6167_s0 + $0x389] ss:$16 sm:%s1427_s2]   ;;  %v3223_v18 = vld [vmem:[%s6167_s0 + $0x208] ss:$16 sm:%s1472_s28]   ;;  %s27_s28 = smov 48  ;;  %s1757_s2 = smov 192 }
  0x8a   :  { %v1430_v3 = vsel %vm6_vm0, %v3214_v1, %v3213_v0  ;;  %v3215_v4 = vld [vmem:[%s6167_s0 + $0x389] ss:$16 sm:%s1432_s6]   ;;  %s1447_s6 = smov 3  ;;  %v1475_v20 = vsel %vm6_vm0, %v3223_v18, %v3222_v17  ;;  %v2911_v36 = vld [vmem:[%s6167_s0 + $0x80] ss:$16 sm:%s22_s23]   ;;  %s1564_s23 = smov 12 }
  0x8b   :  { %v3216_v5 = vld [vmem:[%s6167_s0 + $0x389] ss:$16 sm:%s1437_s8]   ;;  %v1435_v7 = vsel %vm10_vm1, %v3215_v4, %v1430_v3  ;;  %v1480_v25 = vsel %vm10_vm1, %v3224_v21, %v1475_v20  ;;  %v3218_v26 = vld [vmem:[%s6167_s0 + $0x8] ss:$16 sm:%s1447_s6]   ;;  %s4_s8 = smov 12  ;;  %v25_v39 = vsel %vm6_vm0, %v2911_v36, %v2910_v35  ;;  %s82_s6 = smov 3 }
  0x8c   :  { %v4424_v54 = vpop.permute.xlu0 %274   ;;  %1372 = vrot.lane.b32.xlu0 %v1371_v2, %s3551_s15  ;;  %v3208_v8 = vld [vmem:[%s6167_s0 + $0x189] ss:$16 sm:%s1401_s12]   ;;  %v1440_v9 = vsel %vm14_vm2, %v3216_v5, %v1435_v7  ;;  %v1485_v27 = vsel %vm14_vm2, %v3225_v23, %v1480_v25  ;;  %v1453_v32 = vsel %vm6_vm0, %v3219_v29, %v3218_v26  ;;  %s90_s12 = smov 48 }
  0x8d   :  { %v3209_v10 = vld [vmem:[%s6167_s0 + $0x189] ss:$16 sm:%s1404_s17]   ;;  %1441 = vrot.lane.b32.xlu1 %v1440_v9, %s3551_s15  ;;  %v1458_v34 = vsel %vm10_vm1, %v3220_v30, %v1453_v32  ;;  %s1551_s17 = smov 192 }
  0x8e   :  { %v3210_v11 = vld [vmem:[%s6167_s0 + $0x189] ss:$16 sm:%s1409_s18]   ;;  %v1407_v13 = vsel %vm6_vm0, %v3209_v10, %v3208_v8  ;;  %v1463_v37 = vsel %vm14_vm2, %v3221_v33, %v1458_v34  ;;  %v2912_v40 = vld [vmem:[%s6167_s0 + $0x80] ss:$16 sm:%s27_s28]   ;;  %s111_s28 = smov 48  ;;  %s124_s18 = smov 3 }
  0x8f   :  { %v3211_v15 = vld [vmem:[%s6167_s0 + $0x189] ss:$16 sm:%s1414_s24]   ;;  %v1412_v16 = vsel %vm10_vm1, %v3210_v11, %v1407_v13  ;;  %v2913_v41 = vld [vmem:[%s6167_s0 + $0x80] ss:$16 sm:%s32_s29]   ;;  %v30_v43 = vsel %vm10_vm1, %v2912_v40, %v25_v39  ;;  %s116_s29 = smov 192  ;;  %s1569_s24 = smov 48 }
  0x90   :  { %v4438_v60 = vpop.permute.xlu1 %343   ;;  %v1417_v19 = vsel %vm14_vm2, %v3211_v15, %v1412_v16  ;;  %v3_v45 = vld [vmem:[%s6167_s0] ss:$16 sm:%s2_s3]   ;;  %v35_v46 = vsel %vm14_vm2, %v2913_v41, %v30_v43  ;;  %v3232_v52 = vld [vmem:[%s6167_s0 + $0x288] ss:$16 sm:%s1515_s16]   ;;  %s132_s3 = smov 48  ;;  %s153_s16 = smov 48 }
  0x91   :  { %1418 = vrot.lane.b32.xlu0 %v1417_v19, %s3551_s15  ;;  %1486 = vrot.lane.b32.xlu1 %v1485_v27, %s3552_s27  ;;  %s1523_s15 = smov 48  ;;  %v5_v47 = vld [vmem:[%s6167_s0] ss:$16 sm:%s4_s8]   ;;  %s1541_s8 = smov 12 }
  0x92   :  { %v9_v48 = vld [vmem:[%s6167_s0] ss:$16 sm:%s8_s9]   ;;  %2914 = vst.msk [vmem:[%s6168_s1 + $0x8] sm:$0xff] %vm16_vm3, %v35_v46   ;;  %v7_v50 = vsel %vm6_vm0, %v5_v47, %v3_v45  ;;  %s1546_s9 = smov 48 }
  0x93   :  { %v13_v51 = vld [vmem:[%s6167_s0] ss:$16 sm:%s12_s14]   ;;  %2958 = vst.msk [vmem:[%s6168_s1 + $0x8] sm:$0xff] %vm185_vm4, %v4335_v14   ;;  %v11_v14 = vsel %vm10_vm1, %v9_v48, %v7_v50  ;;  %s1660_s14 = smov 48 }
  0x94   :  { %v4460_v6 = vpop.permute.xlu0 %320   ;;  %v4474_v12 = vpop.permute.xlu1 %388   ;;  %v3233_v53 = vld [vmem:[%s6167_s0 + $0x288] ss:$16 sm:%s1518_s19]   ;;  %v15_v56 = vsel %vm14_vm2, %v13_v51, %v11_v14  ;;  %s106_s19 = smov 12  ;;  %v2930_v3 = vld [vmem:[%s6167_s0 + $0x280] ss:$16 sm:%s103_s13]   ;;  %s1655_s13 = smov 12 }
  0x95   :  { %1464 = vrot.lane.b32.xlu0 %v1463_v37, %s3552_s27  ;;  %v3234_v55 = vld [vmem:[%s6167_s0 + $0x288] ss:$16 sm:%s1523_s15]   ;;  %v1521_v57 = vsel %vm6_vm0, %v3233_v53, %v3232_v52  ;;  %17 = vst.msk [vmem:[%s6168_s1] sm:$0xff] %vm16_vm3, %v15_v56   ;;  %s1561_s15 = smov 3 }
  0x96   :  { %v3235_v58 = vld [vmem:[%s6167_s0 + $0x288] ss:$16 sm:%s1528_s22]   ;;  %v1526_v62 = vsel %vm10_vm1, %v3234_v55, %v1521_v57  ;;  %186 = vst.msk [vmem:[%s6168_s1] sm:$0xff] %vm185_vm4, %v4352_v22   ;;  %s53_s22 = smov 192 }
  0x97   :  { %v3227_v59 = vld [vmem:[%s6167_s0 + $0x88] ss:$16 sm:%s1492_s25]   ;;  %v1531_v22 = vsel %vm14_vm2, %v3235_v58, %v1526_v62  ;;  %v2931_v7 = vld [vmem:[%s6167_s0 + $0x280] ss:$16 sm:%s106_s19]   ;;  %s95_s19 = smov 192  ;;  %s1607_s25 = smov 3 }
  0x98   :  { %v4496_v24 = vpop.permute.xlu0 %366   ;;  %v4510_v31 = vpop.permute.xlu1 %434   ;;  %v3228_v63 = vld [vmem:[%s6167_s0 + $0x88] ss:$16 sm:%s1495_s4]   ;;  %1532 = vrot.lane.b32.xlu1 %v1531_v22, %s3552_s27  ;;  %v109_v9 = vsel %vm6_vm0, %v2931_v7, %v2930_v3  ;;  %s137_s4 = smov 192 }
  0x99   :  { %v3229_v0 = vld [vmem:[%s6167_s0 + $0x88] ss:$16 sm:%s1500_s5]   ;;  %v1498_v1 = vsel %vm6_vm0, %v3228_v63, %v3227_v59  ;;  %369 = vst.msk [vmem:[%s6168_s1] sm:$0xff] %vm368_vm5, %v4496_v24   ;;  %s1615_s5 = smov 48 }
  0x9a   :  { %v3230_v2 = vld [vmem:[%s6167_s0 + $0x88] ss:$16 sm:%s1505_s10]   ;;  %v1503_v5 = vsel %vm10_vm1, %v3229_v0, %v1498_v1  ;;  %v2932_v10 = vld [vmem:[%s6167_s0 + $0x280] ss:$16 sm:%s111_s28]   ;;  %s1633_s28 = smov 12  ;;  %s1701_s10 = smov 12 }
  0x9b   :  { %v1508_v8 = vsel %vm14_vm2, %v3230_v2, %v1503_v5  ;;  %v2933_v11 = vld [vmem:[%s6167_s0 + $0x280] ss:$16 sm:%s116_s29]   ;;  %v114_v13 = vsel %vm10_vm1, %v2932_v10, %v109_v9  ;;  %s1574_s29 = smov 192  ;;  %v3242_v23 = vld [vmem:[%s6167_s0 + $0x308] ss:$16 sm:%s1561_s15]   ;;  %s1592_s15 = smov 48 }
  0x9c   :  { %v412_v42 = vpop.permute.xlu0 %411   ;;  %v4544_v49 = vpop.permute.xlu1 %480   ;;  %1509 = vrot.lane.b32.xlu0 %v1508_v8, %s3552_s27  ;;  %v2925_v15 = vld [vmem:[%s6167_s0 + $0x200] ss:$16 sm:%s82_s6]   ;;  %v119_v17 = vsel %vm14_vm2, %v2933_v11, %v114_v13  ;;  %s1643_s6 = smov 192 }
  0x9d   :  { %2997 = vst.msk [vmem:[%s6168_s1 + $0x8] sm:$0xff] %vm368_vm5, %v412_v42   ;;  %v2926_v18 = vld [vmem:[%s6167_s0 + $0x200] ss:$16 sm:%s85_s11]   ;;  %s1620_s11 = smov 192 }
  0x9e   :  { %v2927_v19 = vld [vmem:[%s6167_s0 + $0x200] ss:$16 sm:%s90_s12]   ;;  %2934 = vst.msk [vmem:[%s6168_s1 + $0x28] sm:$0xff] %vm16_vm3, %v119_v17   ;;  %v88_v20 = vsel %vm6_vm0, %v2926_v18, %v2925_v15  ;;  %s40_s12 = smov 3 }
  0x9f   :  { %v2928_v21 = vld [vmem:[%s6167_s0 + $0x200] ss:$16 sm:%s95_s19]   ;;  %2963 = vst.msk [vmem:[%s6168_s1 + $0x28] sm:$0xff] %vm185_vm4, %v4366_v28   ;;  %v93_v28 = vsel %vm10_vm1, %v2927_v19, %v88_v20  ;;  %s1587_s19 = smov 12 }
  0xa0   :  { %v4581_v61 = vpop.permute.xlu0 %457   ;;  %v3243_v25 = vld [vmem:[%s6167_s0 + $0x308] ss:$16 sm:%s1564_s23]   ;;  %v98_v27 = vsel %vm14_vm2, %v2928_v21, %v93_v28  ;;  %s127_s23 = smov 12  ;;  %3002 = vst.msk [vmem:[%s6168_s1 + $0x28] sm:$0xff] %vm368_vm5, %v4510_v31  }
  0xa1   :  { %v3244_v26 = vld [vmem:[%s6167_s0 + $0x308] ss:$16 sm:%s1569_s24]   ;;  %v1567_v29 = vsel %vm6_vm0, %v3243_v25, %v3242_v23  ;;  %2929 = vst.msk [vmem:[%s6168_s1 + $0x20] sm:$0xff] %vm16_vm3, %v98_v27   ;;  %s1744_s24 = smov 3 }
  0xa2   :  { %v3245_v30 = vld [vmem:[%s6167_s0 + $0x308] ss:$16 sm:%s1574_s29]   ;;  %v1572_v31 = vsel %vm10_vm1, %v3244_v26, %v1567_v29  ;;  %2953 = vst.msk [vmem:[%s6168_s1 + $0x20] sm:$0xff] %vm185_vm4, %v4388_v38   ;;  %s1597_s29 = smov 192 }
  0xa3   :  { %v3237_v32 = vld [vmem:[%s6167_s0 + $0x108] ss:$16 sm:%s1538_s30]   ;;  %v1577_v38 = vsel %vm14_vm2, %v3245_v30, %v1572_v31  ;;  %v2935_v39 = vld [vmem:[%s6167_s0 + $0x300] ss:$16 sm:%s124_s18]   ;;  %s48_s18 = smov 48  ;;  %s145_s30 = smov 3 }
  0xa4   :  { %v4607_v4 = vpop.permute.xlu1 %526   ;;  %v3238_v33 = vld [vmem:[%s6167_s0 + $0x108] ss:$16 sm:%s1541_s8]   ;;  %1578 = vrot.lane.b32.xlu1 %v1577_v38, %s3552_s27  ;;  %2992 = vst.msk [vmem:[%s6168_s1 + $0x20] sm:$0xff] %vm368_vm5, %v4474_v12   ;;  %s74_s8 = smov 192 }
  0xa5   :  { %v3239_v34 = vld [vmem:[%s6167_s0 + $0x108] ss:$16 sm:%s1546_s9]   ;;  %v1544_v36 = vsel %vm6_vm0, %v3238_v33, %v3237_v32  ;;  %v2936_v41 = vld [vmem:[%s6167_s0 + $0x300] ss:$16 sm:%s127_s23]   ;;  %s1652_s9 = smov 3  ;;  %s1711_s23 = smov 192 }
  0xa6   :  { %v3240_v37 = vld [vmem:[%s6167_s0 + $0x108] ss:$16 sm:%s1551_s17]   ;;  %v1549_v40 = vsel %vm10_vm1, %v3239_v34, %v1544_v36  ;;  %s43_s17 = smov 12  ;;  %v130_v43 = vsel %vm6_vm0, %v2936_v41, %v2935_v39  ;;  %v2937_v45 = vld [vmem:[%s6167_s0 + $0x300] ss:$16 sm:%s132_s3]   ;;  %s3555_s3 = smov 20  }
  0xa7   :  { %v1554_v42 = vsel %vm14_vm2, %v3240_v37, %v1549_v40  ;;  %v2938_v46 = vld [vmem:[%s6167_s0 + $0x300] ss:$16 sm:%s137_s4]   ;;  %v135_v47 = vsel %vm10_vm1, %v2937_v45, %v130_v43  ;;  %s1610_s4 = smov 12  ;;  %v3252_v56 = vld [vmem:[%s6167_s0 + $0x388] ss:$16 sm:%s1607_s25]   ;;  %s61_s25 = smov 3 }
  0xa8   :  { %v4632_v16 = vpop.permute.xlu0 %503   ;;  %v572_v24 = vpop.permute.xlu1 %571   ;;  %1555 = vrot.lane.b32.xlu0 %v1554_v42, %s3552_s27  ;;  %v2915_v48 = vld [vmem:[%s6167_s0 + $0x100] ss:$16 sm:%s40_s12]   ;;  %v140_v50 = vsel %vm14_vm2, %v2938_v46, %v135_v47  ;;  %s1584_s12 = smov 3 }
  0xa9   :  { %3031 = vst.msk [vmem:[%s6168_s1 + $0x20] sm:$0xff] %vm551_vm6, %v572_v24   ;;  %v2916_v51 = vld [vmem:[%s6167_s0 + $0x100] ss:$16 sm:%s43_s17]   ;;  %s158_s17 = smov 192 }
  0xaa   :  { %v2917_v52 = vld [vmem:[%s6167_s0 + $0x100] ss:$16 sm:%s48_s18]   ;;  %2939 = vst.msk [vmem:[%s6168_s1 + $0x30] sm:$0xff] %vm16_vm3, %v140_v50   ;;  %v46_v53 = vsel %vm6_vm0, %v2916_v51, %v2915_v48  ;;  %s2763_s18 = smov 192 }
  0xab   :  { %v2918_v55 = vld [vmem:[%s6167_s0 + $0x100] ss:$16 sm:%s53_s22]   ;;  %2973 = vst.msk [vmem:[%s6168_s1 + $0x30] sm:$0xff] %vm185_vm4, %v4402_v44   ;;  %v51_v44 = vsel %vm10_vm1, %v2917_v52, %v46_v53  ;;  %s1747_s22 = smov 12 }
  0xac   :  { %v550_v35 = vpop.permute.xlu0 %549   ;;  %v618_v12 = vpop.permute.xlu1 %617   ;;  %v3253_v57 = vld [vmem:[%s6167_s0 + $0x388] ss:$16 sm:%s1610_s4]   ;;  %v56_v62 = vsel %vm14_vm2, %v2918_v55, %v51_v44  ;;  %3012 = vst.msk [vmem:[%s6168_s1 + $0x30] sm:$0xff] %vm368_vm5, %v4544_v49   ;;  %s3554_s4 = smov 24  }
  0xad   :  { %552 = vst.msk [vmem:[%s6168_s1] sm:$0xff] %vm551_vm6, %v550_v35   ;;  %3041 = vst.msk [vmem:[%s6168_s1 + $0x28] sm:$0xff] %vm551_vm6, %v618_v12   ;;  %v3254_v58 = vld [vmem:[%s6167_s0 + $0x388] ss:$16 sm:%s1615_s5]   ;;  %v1613_v63 = vsel %vm6_vm0, %v3253_v57, %v3252_v56  ;;  %s1675_s5 = smov 3 }
  0xae   :  { %v3255_v0 = vld [vmem:[%s6167_s0 + $0x388] ss:$16 sm:%s1620_s11]   ;;  %2919 = vst.msk [vmem:[%s6168_s1 + $0x10] sm:$0xff] %vm16_vm3, %v56_v62   ;;  %v1618_v49 = vsel %vm10_vm1, %v3254_v58, %v1613_v63  ;;  %s1683_s11 = smov 48 }
  0xaf   :  { %v3247_v22 = vld [vmem:[%s6167_s0 + $0x188] ss:$16 sm:%s1584_s12]   ;;  %2968 = vst.msk [vmem:[%s6168_s1 + $0x10] sm:$0xff] %vm185_vm4, %v4424_v54   ;;  %v1623_v54 = vsel %vm14_vm2, %v3255_v0, %v1618_v49  ;;  %s2456_s12 = smov 12 }
  0xb0   :  { %v595_v14 = vpop.permute.xlu0 %594   ;;  %v664_v59 = vpop.permute.xlu1 %663   ;;  %v3248_v1 = vld [vmem:[%s6167_s0 + $0x188] ss:$16 sm:%s1587_s19]   ;;  %v2940_v7 = vld [vmem:[%s6167_s0 + $0x380] ss:$16 sm:%s145_s30]   ;;  %s69_s30 = smov 48  ;;  %s1734_s19 = smov 192 }
  0xb1   :  { %3036 = vst.msk [vmem:[%s6168_s1 + $0x8] sm:$0xff] %vm551_vm6, %v595_v14   ;;  %v3249_v2 = vld [vmem:[%s6167_s0 + $0x188] ss:$16 sm:%s1592_s15]   ;;  %3051 = vst.msk [vmem:[%s6168_s1 + $0x30] sm:$0xff] %vm551_vm6, %v664_v59   ;;  %v1590_v3 = vsel %vm6_vm0, %v3248_v1, %v3247_v22  ;;  %s1665_s15 = smov 192 }
  0xb2   :  { %v3250_v5 = vld [vmem:[%s6167_s0 + $0x188] ss:$16 sm:%s1597_s29]   ;;  %1624 = vrot.lane.b32.xlu1 %v1623_v54, %s3552_s27  ;;  %v1595_v9 = vsel %vm10_vm1, %v3249_v2, %v1590_v3  ;;  %s64_s29 = smov 12  ;;  %3007 = vst.msk [vmem:[%s6168_s1 + $0x10] sm:$0xff] %vm368_vm5, %v4581_v61  }
  0xb3   :  { %v2941_v10 = vld [vmem:[%s6167_s0 + $0x380] ss:$16 sm:%s148_s7]   ;;  %v1600_v61 = vsel %vm14_vm2, %v3250_v5, %v1595_v9  ;;  %v3261_v25 = vld [vmem:[%s6167_s0 + $0x207] ss:$16 sm:%s1652_s9]   ;;  %s3553_s7 = smov 28   ;;  %s1678_s9 = smov 12 }
  0xb4   :  { %v641_v8 = vpop.permute.xlu0 %640   ;;  %v151_v11 = vsel %vm6_vm0, %v2941_v10, %v2940_v7  ;;  %v2942_v13 = vld [vmem:[%s6167_s0 + $0x380] ss:$16 sm:%s153_s16]   ;;  %1601 = vrot.lane.b32.xlu0 %v1600_v61, %s3552_s27  ;;  %s2461_s27 = smov 48  ;;  %s2616_s16 = smov 12 }
  0xb5   :  { %v2943_v15 = vld [vmem:[%s6167_s0 + $0x380] ss:$16 sm:%s158_s17]   ;;  %3046 = vst.msk [vmem:[%s6168_s1 + $0x10] sm:$0xff] %vm551_vm6, %v641_v8   ;;  %v710_v17 = vpop.permute.xlu1 %709   ;;  %v156_v18 = vsel %vm10_vm1, %v2942_v13, %v151_v11  ;;  %s1688_s17 = smov 192 }
  0xb6   :  { %v2920_v19 = vld [vmem:[%s6167_s0 + $0x180] ss:$16 sm:%s61_s25]   ;;  %v161_v20 = vsel %vm14_vm2, %v2943_v15, %v156_v18  ;;  %v3262_v27 = vld [vmem:[%s6167_s0 + $0x207] ss:$16 sm:%s1655_s13]   ;;  %s1729_s13 = smov 48  ;;  %s2438_s25 = smov 48 }
  0xb7   :  { %v2921_v21 = vld [vmem:[%s6167_s0 + $0x180] ss:$16 sm:%s64_s29]   ;;  %2944 = vst.msk [vmem:[%s6168_s1 + $0x38] sm:$0xff] %vm16_vm3, %v161_v20   ;;  %s1638_s29 = smov 48  ;;  %v1658_v32 = vsel %vm6_vm0, %v3262_v27, %v3261_v25 }
  0xb8   :  { %v2922_v23 = vld [vmem:[%s6167_s0 + $0x180] ss:$16 sm:%s69_s30]   ;;  %v67_v24 = vsel %vm6_vm0, %v2921_v21, %v2920_v19  ;;  %2983 = vst.msk [vmem:[%s6168_s1 + $0x38] sm:$0xff] %vm185_vm4, %v4438_v60   ;;  %s1752_s30 = smov 48 }
  0xb9   :  { %v2923_v28 = vld [vmem:[%s6167_s0 + $0x180] ss:$16 sm:%s74_s8]   ;;  %v687_v26 = vpop.permute.xlu0 %686   ;;  %v72_v60 = vsel %vm10_vm1, %v2922_v23, %v67_v24  ;;  %v3263_v29 = vld [vmem:[%s6167_s0 + $0x207] ss:$16 sm:%s1660_s14]   ;;  %s1698_s8 = smov 3  ;;  %s2613_s14 = smov 3 }
  0xba   :  { %v77_v30 = vsel %vm14_vm2, %v2923_v28, %v72_v60  ;;  %v3264_v31 = vld [vmem:[%s6167_s0 + $0x207] ss:$16 sm:%s1665_s15]   ;;  %3022 = vst.msk [vmem:[%s6168_s1 + $0x38] sm:$0xff] %vm368_vm5, %v4607_v4   ;;  %v755_v4 = vpop.permute.xlu1 %754   ;;  %v1663_v34 = vsel %vm10_vm1, %v3263_v29, %v1658_v32  ;;  %s2522_s15 = smov 3 }
  0xbb   :  { %v3257_v33 = vld [vmem:[%s6167_s0 + $0x7] ss:$16 sm:%s1630_s20]   ;;  %2924 = vst.msk [vmem:[%s6168_s1 + $0x18] sm:$0xff] %vm16_vm3, %v77_v30   ;;  %s2525_s20 = smov 12 }
  0xbc   :  { %v3258_v35 = vld [vmem:[%s6167_s0 + $0x7] ss:$16 sm:%s1633_s28]   ;;  %3061 = vst.msk [vmem:[%s6168_s1 + $0x38] sm:$0xff] %vm551_vm6, %v710_v17   ;;  %s2072_s28 = smov 48 }
  0xbd   :  { %v3259_v38 = vld [vmem:[%s6167_s0 + $0x7] ss:$16 sm:%s1638_s29]   ;;  %3070 = vst.msk [vmem:[%s6168_s1 + $0x20] sm:$0xff] %vm734_vm7, %v755_v4   ;;  %v1636_v36 = vsel %vm6_vm0, %v3258_v35, %v3257_v33  ;;  %s1889_s29 = smov 48 }
  0xbe   :  { %2978 = vst.msk [vmem:[%s6168_s1 + $0x18] sm:$0xff] %vm185_vm4, %v4460_v6   ;;  %v1668_v6 = vsel %vm14_vm2, %v3264_v31, %v1663_v34  ;;  %v3260_v37 = vld [vmem:[%s6167_s0 + $0x7] ss:$16 sm:%s1643_s6]   ;;  %v1641_v40 = vsel %vm10_vm1, %v3259_v38, %v1636_v36  ;;  %v801_v48 = vpop.permute.xlu1 %800   ;;  %s2548_s6 = smov 12 }
  0xbf   :  { %v3271_v39 = vld [vmem:[%s6167_s0 + $0x287] ss:$16 sm:%s1698_s8]   ;;  %1669 = vrot.lane.b32.xlu1 %v1668_v6, %s3553_s7  ;;  %3017 = vst.msk [vmem:[%s6168_s1 + $0x18] sm:$0xff] %vm368_vm5, %v4632_v16   ;;  %v733_v16 = vpop.permute.xlu0 %732   ;;  %v1646_v12 = vsel %vm14_vm2, %v3260_v37, %v1641_v40  ;;  %s1721_s8 = smov 3 }
  0xc0   :  { %v3272_v41 = vld [vmem:[%s6167_s0 + $0x287] ss:$16 sm:%s1701_s10]   ;;  %3056 = vst.msk [vmem:[%s6168_s1 + $0x18] sm:$0xff] %vm551_vm6, %v687_v26   ;;  %1647 = vrot.lane.b32.xlu0 %v1646_v12, %s3553_s7  ;;  %s1724_s10 = smov 12 }
  0xc1   :  { %v1704_v42 = vsel %vm6_vm0, %v3272_v41, %v3271_v39  ;;  %v3273_v43 = vld [vmem:[%s6167_s0 + $0x287] ss:$16 sm:%s1706_s21]   ;;  %735 = vst.msk [vmem:[%s6168_s1] sm:$0xff] %vm734_vm7, %v733_v16   ;;  %3080 = vst.msk [vmem:[%s6168_s1 + $0x28] sm:$0xff] %vm734_vm7, %v801_v48   ;;  %s2064_s21 = smov 3 }
  0xc2   :  { %v3274_v45 = vld [vmem:[%s6167_s0 + $0x287] ss:$16 sm:%s1711_s23]   ;;  %v1709_v46 = vsel %vm10_vm1, %v3273_v43, %v1704_v42  ;;  %v847_v49 = vpop.permute.xlu1 %846   ;;  %s1881_s23 = smov 3  ;;  %v3312_v43 = vld [vmem:[%s6167_s0 + $0x286] ss:$16 sm:%s1889_s29]   ;;  %s1935_s29 = smov 48 }
  0xc3   :  { %v3266_v47 = vld [vmem:[%s6167_s0 + $0x87] ss:$16 sm:%s1675_s5]   ;;  %v1714_v50 = vsel %vm14_vm2, %v3274_v45, %v1709_v46  ;;  %v778_v57 = vpop.permute.xlu0 %777   ;;  %3090 = vst.msk [vmem:[%s6168_s1 + $0x30] sm:$0xff] %vm734_vm7, %v847_v49   ;;  %s2453_s5 = smov 3 }
  0xc4   :  { %v3267_v51 = vld [vmem:[%s6167_s0 + $0x87] ss:$16 sm:%s1678_s9]   ;;  %1715 = vrot.lane.b32.xlu1 %v1714_v50, %s3553_s7  ;;  %3075 = vst.msk [vmem:[%s6168_s1 + $0x8] sm:$0xff] %vm734_vm7, %v778_v57   ;;  %s2502_s9 = smov 12 }
  0xc5   :  { %v3268_v52 = vld [vmem:[%s6167_s0 + $0x87] ss:$16 sm:%s1683_s11]   ;;  %v1681_v14 = vsel %vm6_vm0, %v3267_v51, %v3266_v47  ;;  %v3310_v40 = vld [vmem:[%s6167_s0 + $0x286] ss:$16 sm:%s1881_s23]   ;;  %s1927_s23 = smov 3  ;;  %s2507_s11 = smov 48 }
  0xc6   :  { %v3269_v53 = vld [vmem:[%s6167_s0 + $0x87] ss:$16 sm:%s1688_s17]   ;;  %v1686_v55 = vsel %vm10_vm1, %v3268_v52, %v1681_v14  ;;  %s2466_s17 = smov 192 }
  0xc7   :  { %v3281_v56 = vld [vmem:[%s6167_s0 + $0x307] ss:$16 sm:%s1744_s24]   ;;  %v1691_v58 = vsel %vm14_vm2, %v3269_v53, %v1686_v55  ;;  %s1790_s24 = smov 3  ;;  %v824_v10 = vpop.permute.xlu0 %823  }
  0xc8   :  { %v3282_v44 = vld [vmem:[%s6167_s0 + $0x307] ss:$16 sm:%s1747_s22]   ;;  %1692 = vrot.lane.b32.xlu0 %v1691_v58, %s3553_s7  ;;  %s1793_s22 = smov 12  ;;  %3085 = vst.msk [vmem:[%s6168_s1 + $0x10] sm:$0xff] %vm734_vm7, %v824_v10  }
  0xc9   :  { %v1750_v59 = vsel %vm6_vm0, %v3282_v44, %v3281_v56  ;;  %v3283_v62 = vld [vmem:[%s6167_s0 + $0x307] ss:$16 sm:%s1752_s30]   ;;  %s1798_s30 = smov 48  ;;  %v893_v19 = vpop.permute.xlu1 %892   ;;  %v3320_v56 = vld [vmem:[%s6167_s0 + $0x306] ss:$16 sm:%s1927_s23]   ;;  %s1973_s23 = smov 3 }
  0xca   :  { %v3284_v63 = vld [vmem:[%s6167_s0 + $0x307] ss:$16 sm:%s1757_s2]   ;;  %v1755_v0 = vsel %vm10_vm1, %v3283_v62, %v1750_v59  ;;  %s1803_s2 = smov 192  ;;  %3100 = vst.msk [vmem:[%s6168_s1 + $0x38] sm:$0xff] %vm734_vm7, %v893_v19  }
  0xcb   :  { %v3276_v22 = vld [vmem:[%s6167_s0 + $0x107] ss:$16 sm:%s1721_s8]   ;;  %v1760_v1 = vsel %vm14_vm2, %v3284_v63, %v1755_v0  ;;  %s1767_s8 = smov 3  ;;  %v3322_v62 = vld [vmem:[%s6167_s0 + $0x306] ss:$16 sm:%s1935_s29]   ;;  %s1981_s29 = smov 48 }
  0xcc   :  { %v3277_v2 = vld [vmem:[%s6167_s0 + $0x107] ss:$16 sm:%s1724_s10]   ;;  %1761 = vrot.lane.b32.xlu1 %v1760_v1, %s3553_s7  ;;  %s1770_s10 = smov 12 }
  0xcd   :  { %v3278_v54 = vld [vmem:[%s6167_s0 + $0x107] ss:$16 sm:%s1729_s13]   ;;  %v1727_v3 = vsel %vm6_vm0, %v3277_v2, %v3276_v22  ;;  %s1775_s13 = smov 48  ;;  %v870_v27 = vpop.permute.xlu0 %869   ;;  %v938_v34 = vpop.permute.xlu1 %937  }
  0xce   :  { %v3279_v5 = vld [vmem:[%s6167_s0 + $0x107] ss:$16 sm:%s1734_s19]   ;;  %v1732_v7 = vsel %vm10_vm1, %v3278_v54, %v1727_v3  ;;  %s1780_s19 = smov 192  ;;  %3095 = vst.msk [vmem:[%s6168_s1 + $0x18] sm:$0xff] %vm734_vm7, %v870_v27  }
  0xcf   :  { %v3291_v8 = vld [vmem:[%s6167_s0 + $0x387] ss:$16 sm:%s1790_s24]   ;;  %v1737_v61 = vsel %vm14_vm2, %v3279_v5, %v1732_v7  ;;  %s1835_s24 = smov 3  ;;  %3109 = vst.msk [vmem:[%s6168_s1 + $0x20] sm:$0xff] %vm917_vm8, %v938_v34  }
  0xd0   :  { %v3292_v9 = vld [vmem:[%s6167_s0 + $0x387] ss:$16 sm:%s1793_s22]   ;;  %1738 = vrot.lane.b32.xlu0 %v1737_v61, %s3553_s7  ;;  %s1838_s22 = smov 12 }
  0xd1   :  { %v1796_v11 = vsel %vm6_vm0, %v3292_v9, %v3291_v8  ;;  %v3293_v13 = vld [vmem:[%s6167_s0 + $0x387] ss:$16 sm:%s1798_s30]   ;;  %s1843_s30 = smov 48  ;;  %v3300_v26 = vld [vmem:[%s6167_s0 + $0x206] ss:$16 sm:%s1835_s24]   ;;  %s1884_s24 = smov 12  ;;  %v916_v16 = vpop.permute.xlu0 %915   ;;  %v984_v48 = vpop.permute.xlu1 %983  }
  0xd2   :  { %v3294_v15 = vld [vmem:[%s6167_s0 + $0x387] ss:$16 sm:%s1803_s2]   ;;  %v1801_v17 = vsel %vm10_vm1, %v3293_v13, %v1796_v11  ;;  %s1848_s2 = smov 192  ;;  %v3301_v60 = vld [vmem:[%s6167_s0 + $0x206] ss:$16 sm:%s1838_s22]   ;;  %s2776_s22 = smov 12 }
  0xd3   :  { %v3286_v18 = vld [vmem:[%s6167_s0 + $0x187] ss:$16 sm:%s1767_s8]   ;;  %v1806_v20 = vsel %vm14_vm2, %v3294_v15, %v1801_v17  ;;  %s1813_s8 = smov 3  ;;  %v1841_v30 = vsel %vm6_vm0, %v3301_v60, %v3300_v26  ;;  %v3302_v32 = vld [vmem:[%s6167_s0 + $0x206] ss:$16 sm:%s1843_s30]   ;;  %s1894_s30 = smov 192 }
  0xd4   :  { %v3287_v21 = vld [vmem:[%s6167_s0 + $0x187] ss:$16 sm:%s1770_s10]   ;;  %1807 = vrot.lane.b32.xlu1 %v1806_v20, %s3553_s7  ;;  %s1816_s10 = smov 12  ;;  %v1846_v33 = vsel %vm10_vm1, %v3302_v32, %v1841_v30  ;;  %918 = vst.msk [vmem:[%s6168_s1] sm:$0xff] %vm917_vm8, %v916_v16  }
  0xd5   :  { %v3288_v23 = vld [vmem:[%s6167_s0 + $0x187] ss:$16 sm:%s1775_s13]   ;;  %v1773_v24 = vsel %vm6_vm0, %v3287_v21, %v3286_v18  ;;  %s1821_s13 = smov 48  ;;  %v3303_v31 = vld [vmem:[%s6167_s0 + $0x206] ss:$16 sm:%s1848_s2]   ;;  %v961_v57 = vpop.permute.xlu0 %960   ;;  %v1030_v49 = vpop.permute.xlu1 %1029   ;;  %s3556_s2 = smov 16  }
  0xd6   :  { %v3289_v28 = vld [vmem:[%s6167_s0 + $0x187] ss:$16 sm:%s1780_s19]   ;;  %v1778_v25 = vsel %vm10_vm1, %v3288_v23, %v1773_v24  ;;  %s1826_s19 = smov 192  ;;  %v3296_v4 = vld [vmem:[%s6167_s0 + $0x6] ss:$16 sm:%s1813_s8]   ;;  %v1851_v35 = vsel %vm14_vm2, %v3303_v31, %v1846_v33  ;;  %s1858_s8 = smov 3 }
  0xd7   :  { %v1783_v29 = vsel %vm14_vm2, %v3289_v28, %v1778_v25  ;;  %v3297_v38 = vld [vmem:[%s6167_s0 + $0x6] ss:$16 sm:%s1816_s10]   ;;  %s1861_s10 = smov 12  ;;  %3119 = vst.msk [vmem:[%s6168_s1 + $0x28] sm:$0xff] %vm917_vm8, %v984_v48   ;;  %3114 = vst.msk [vmem:[%s6168_s1 + $0x8] sm:$0xff] %vm917_vm8, %v961_v57  }
  0xd8   :  { %1784 = vrot.lane.b32.xlu0 %v1783_v29, %s3553_s7  ;;  %v3298_v6 = vld [vmem:[%s6167_s0 + $0x6] ss:$16 sm:%s1821_s13]   ;;  %1852 = vrot.lane.b32.xlu1 %v1851_v35, %s3554_s4  ;;  %v1819_v36 = vsel %vm6_vm0, %v3297_v38, %v3296_v4  ;;  %s1866_s13 = smov 48  ;;  %s2247_s7 = smov 3 }
  0xd9   :  { %v3299_v37 = vld [vmem:[%s6167_s0 + $0x6] ss:$16 sm:%s1826_s19]   ;;  %v1824_v39 = vsel %vm10_vm1, %v3298_v6, %v1819_v36  ;;  %s1871_s19 = smov 192  ;;  %3129 = vst.msk [vmem:[%s6168_s1 + $0x30] sm:$0xff] %vm917_vm8, %v1030_v49   ;;  %v1007_v10 = vpop.permute.xlu0 %1006  }
  0xda   :  { %v3311_v41 = vld [vmem:[%s6167_s0 + $0x286] ss:$16 sm:%s1884_s24]   ;;  %v1829_v12 = vsel %vm14_vm2, %v3299_v37, %v1824_v39  ;;  %s1930_s24 = smov 12  ;;  %3124 = vst.msk [vmem:[%s6168_s1 + $0x10] sm:$0xff] %vm917_vm8, %v1007_v10   ;;  %v1076_v19 = vpop.permute.xlu1 %1075  }
  0xdb   :  { %v1887_v42 = vsel %vm6_vm0, %v3311_v41, %v3310_v40  ;;  %v3313_v45 = vld [vmem:[%s6167_s0 + $0x286] ss:$16 sm:%s1894_s30]   ;;  %s1940_s30 = smov 192  ;;  %3139 = vst.msk [vmem:[%s6168_s1 + $0x38] sm:$0xff] %vm917_vm8, %v1076_v19  }
  0xdc   :  { %1830 = vrot.lane.b32.xlu0 %v1829_v12, %s3554_s4  ;;  %v1892_v46 = vsel %vm10_vm1, %v3312_v43, %v1887_v42  ;;  %v3305_v47 = vld [vmem:[%s6167_s0 + $0x86] ss:$16 sm:%s1858_s8]   ;;  %s1904_s8 = smov 3 }
  0xdd   :  { %v1897_v50 = vsel %vm14_vm2, %v3313_v45, %v1892_v46  ;;  %v3306_v51 = vld [vmem:[%s6167_s0 + $0x86] ss:$16 sm:%s1861_s10]   ;;  %s1907_s10 = smov 12  ;;  %v3349_v40 = vld [vmem:[%s6167_s0 + $0x285] ss:$16 sm:%s2064_s21]   ;;  %s2110_s21 = smov 3 }
  0xde   :  { %v3307_v52 = vld [vmem:[%s6167_s0 + $0x86] ss:$16 sm:%s1866_s13]   ;;  %1898 = vrot.lane.b32.xlu1 %v1897_v50, %s3554_s4  ;;  %v1864_v14 = vsel %vm6_vm0, %v3306_v51, %v3305_v47  ;;  %s1912_s13 = smov 48  ;;  %v1053_v27 = vpop.permute.xlu0 %1052   ;;  %v1121_v34 = vpop.permute.xlu1 %1120  }
  0xdf   :  { %v3308_v53 = vld [vmem:[%s6167_s0 + $0x86] ss:$16 sm:%s1871_s19]   ;;  %v1869_v55 = vsel %vm10_vm1, %v3307_v52, %v1864_v14  ;;  %s1917_s19 = smov 192  ;;  %3134 = vst.msk [vmem:[%s6168_s1 + $0x18] sm:$0xff] %vm917_vm8, %v1053_v27  }
  0xe0   :  { %v3321_v44 = vld [vmem:[%s6167_s0 + $0x306] ss:$16 sm:%s1930_s24]   ;;  %v1874_v58 = vsel %vm14_vm2, %v3308_v53, %v1869_v55  ;;  %s1976_s24 = smov 12  ;;  %3148 = vst.msk [vmem:[%s6168_s1 + $0x20] sm:$0xff] %vm1100_vm9, %v1121_v34  }
  0xe1   :  { %v1933_v59 = vsel %vm6_vm0, %v3321_v44, %v3320_v56  ;;  %v3323_v63 = vld [vmem:[%s6167_s0 + $0x306] ss:$16 sm:%s1940_s30]   ;;  %1875 = vrot.lane.b32.xlu0 %v1874_v58, %s3554_s4  ;;  %s1986_s30 = smov 192 }
  0xe2   :  { %v1938_v0 = vsel %vm10_vm1, %v3322_v62, %v1933_v59  ;;  %v3315_v22 = vld [vmem:[%s6167_s0 + $0x106] ss:$16 sm:%s1904_s8]   ;;  %s1950_s8 = smov 3  ;;  %v1099_v16 = vpop.permute.xlu0 %1098   ;;  %v3351_v43 = vld [vmem:[%s6167_s0 + $0x285] ss:$16 sm:%s2072_s28]   ;;  %v1167_v48 = vpop.permute.xlu1 %1166   ;;  %s2118_s28 = smov 48 }
  0xe3   :  { %v1943_v1 = vsel %vm14_vm2, %v3323_v63, %v1938_v0  ;;  %v3316_v2 = vld [vmem:[%s6167_s0 + $0x106] ss:$16 sm:%s1907_s10]   ;;  %s1953_s10 = smov 12  ;;  %1101 = vst.msk [vmem:[%s6168_s1] sm:$0xff] %vm1100_vm9, %v1099_v16   ;;  %3158 = vst.msk [vmem:[%s6168_s1 + $0x28] sm:$0xff] %vm1100_vm9, %v1167_v48  }
  0xe4   :  { %v3317_v54 = vld [vmem:[%s6167_s0 + $0x106] ss:$16 sm:%s1912_s13]   ;;  %1944 = vrot.lane.b32.xlu1 %v1943_v1, %s3554_s4  ;;  %v1910_v3 = vsel %vm6_vm0, %v3316_v2, %v3315_v22  ;;  %s1958_s13 = smov 48 }
  0xe5   :  { %v3318_v5 = vld [vmem:[%s6167_s0 + $0x106] ss:$16 sm:%s1917_s19]   ;;  %v1915_v7 = vsel %vm10_vm1, %v3317_v54, %v1910_v3  ;;  %s1963_s19 = smov 192  ;;  %v3359_v56 = vld [vmem:[%s6167_s0 + $0x305] ss:$16 sm:%s2110_s21]   ;;  %s2156_s21 = smov 3 }
  0xe6   :  { %v3330_v8 = vld [vmem:[%s6167_s0 + $0x386] ss:$16 sm:%s1973_s23]   ;;  %v1920_v61 = vsel %vm14_vm2, %v3318_v5, %v1915_v7  ;;  %s2018_s23 = smov 3  ;;  %v1144_v57 = vpop.permute.xlu0 %1143   ;;  %v3361_v62 = vld [vmem:[%s6167_s0 + $0x305] ss:$16 sm:%s2118_s28]   ;;  %v1213_v49 = vpop.permute.xlu1 %1212   ;;  %s2164_s28 = smov 48 }
  0xe7   :  { %v3331_v9 = vld [vmem:[%s6167_s0 + $0x386] ss:$16 sm:%s1976_s24]   ;;  %1921 = vrot.lane.b32.xlu0 %v1920_v61, %s3554_s4  ;;  %s2021_s24 = smov 12  ;;  %3153 = vst.msk [vmem:[%s6168_s1 + $0x8] sm:$0xff] %vm1100_vm9, %v1144_v57  }
  0xe8   :  { %v1979_v11 = vsel %vm6_vm0, %v3331_v9, %v3330_v8  ;;  %v3332_v13 = vld [vmem:[%s6167_s0 + $0x386] ss:$16 sm:%s1981_s29]   ;;  %s2026_s29 = smov 48  ;;  %v3339_v26 = vld [vmem:[%s6167_s0 + $0x205] ss:$16 sm:%s2018_s23]   ;;  %s2067_s23 = smov 12 }
  0xe9   :  { %v3333_v15 = vld [vmem:[%s6167_s0 + $0x386] ss:$16 sm:%s1986_s30]   ;;  %v1984_v17 = vsel %vm10_vm1, %v3332_v13, %v1979_v11  ;;  %s2031_s30 = smov 192  ;;  %v3340_v60 = vld [vmem:[%s6167_s0 + $0x205] ss:$16 sm:%s2021_s24]   ;;  %s2590_s24 = smov 3 }
  0xea   :  { %v3325_v18 = vld [vmem:[%s6167_s0 + $0x186] ss:$16 sm:%s1950_s8]   ;;  %v1989_v20 = vsel %vm14_vm2, %v3333_v15, %v1984_v17  ;;  %s1996_s8 = smov 3  ;;  %v2024_v30 = vsel %vm6_vm0, %v3340_v60, %v3339_v26  ;;  %v3341_v32 = vld [vmem:[%s6167_s0 + $0x205] ss:$16 sm:%s2026_s29]   ;;  %s2077_s29 = smov 192  ;;  %v1190_v10 = vpop.permute.xlu0 %1189  }
  0xeb   :  { %v3326_v21 = vld [vmem:[%s6167_s0 + $0x186] ss:$16 sm:%s1953_s10]   ;;  %1990 = vrot.lane.b32.xlu1 %v1989_v20, %s3554_s4  ;;  %s1999_s10 = smov 12  ;;  %v2029_v33 = vsel %vm10_vm1, %v3341_v32, %v2024_v30  ;;  %3168 = vst.msk [vmem:[%s6168_s1 + $0x30] sm:$0xff] %vm1100_vm9, %v1213_v49  }
  0xec   :  { %v3327_v23 = vld [vmem:[%s6167_s0 + $0x186] ss:$16 sm:%s1958_s13]   ;;  %v1956_v24 = vsel %vm6_vm0, %v3326_v21, %v3325_v18  ;;  %s2004_s13 = smov 48  ;;  %v3342_v31 = vld [vmem:[%s6167_s0 + $0x205] ss:$16 sm:%s2031_s30]   ;;  %s3557_s30 = smov 12  }
  0xed   :  { %v3328_v28 = vld [vmem:[%s6167_s0 + $0x186] ss:$16 sm:%s1963_s19]   ;;  %v1961_v25 = vsel %vm10_vm1, %v3327_v23, %v1956_v24  ;;  %s2009_s19 = smov 192  ;;  %v3335_v4 = vld [vmem:[%s6167_s0 + $0x5] ss:$16 sm:%s1996_s8]   ;;  %v2034_v35 = vsel %vm14_vm2, %v3342_v31, %v2029_v33  ;;  %s2041_s8 = smov 3 }
  0xee   :  { %v1966_v29 = vsel %vm14_vm2, %v3328_v28, %v1961_v25  ;;  %v3336_v38 = vld [vmem:[%s6167_s0 + $0x5] ss:$16 sm:%s1999_s10]   ;;  %s2044_s10 = smov 12  ;;  %3163 = vst.msk [vmem:[%s6168_s1 + $0x10] sm:$0xff] %vm1100_vm9, %v1190_v10   ;;  %v1259_v19 = vpop.permute.xlu1 %1258  }
  0xef   :  { %1967 = vrot.lane.b32.xlu0 %v1966_v29, %s3554_s4  ;;  %v3337_v6 = vld [vmem:[%s6167_s0 + $0x5] ss:$16 sm:%s2004_s13]   ;;  %2035 = vrot.lane.b32.xlu1 %v2034_v35, %s3555_s3  ;;  %v2002_v36 = vsel %vm6_vm0, %v3336_v38, %v3335_v4  ;;  %s2049_s13 = smov 48  ;;  %s2430_s4 = smov 3 }
  0xf0   :  { %v3338_v37 = vld [vmem:[%s6167_s0 + $0x5] ss:$16 sm:%s2009_s19]   ;;  %v2007_v39 = vsel %vm10_vm1, %v3337_v6, %v2002_v36  ;;  %s2054_s19 = smov 192  ;;  %3178 = vst.msk [vmem:[%s6168_s1 + $0x38] sm:$0xff] %vm1100_vm9, %v1259_v19  }
  0xf1   :  { %v3350_v41 = vld [vmem:[%s6167_s0 + $0x285] ss:$16 sm:%s2067_s23]   ;;  %v2012_v12 = vsel %vm14_vm2, %v3338_v37, %v2007_v39  ;;  %s2113_s23 = smov 12 }
  0xf2   :  { %v2070_v42 = vsel %vm6_vm0, %v3350_v41, %v3349_v40  ;;  %v3352_v45 = vld [vmem:[%s6167_s0 + $0x285] ss:$16 sm:%s2077_s29]   ;;  %s2123_s29 = smov 192  ;;  %v1236_v27 = vpop.permute.xlu0 %1235   ;;  %v1304_v34 = vpop.permute.xlu1 %1303   ;;  %v3388_v40 = vld [vmem:[%s6167_s0 + $0x284] ss:$16 sm:%s2247_s7]   ;;  %s2293_s7 = smov 3 }
  0xf3   :  { %2013 = vrot.lane.b32.xlu0 %v2012_v12, %s3555_s3  ;;  %v2075_v46 = vsel %vm10_vm1, %v3351_v43, %v2070_v42  ;;  %v3344_v47 = vld [vmem:[%s6167_s0 + $0x85] ss:$16 sm:%s2041_s8]   ;;  %s2087_s8 = smov 3  ;;  %3173 = vst.msk [vmem:[%s6168_s1 + $0x18] sm:$0xff] %vm1100_vm9, %v1236_v27  }
  0xf4   :  { %v2080_v50 = vsel %vm14_vm2, %v3352_v45, %v2075_v46  ;;  %v3345_v51 = vld [vmem:[%s6167_s0 + $0x85] ss:$16 sm:%s2044_s10]   ;;  %s2090_s10 = smov 12  ;;  %3187 = vst.msk [vmem:[%s6168_s1 + $0x20] sm:$0xff] %vm1283_vm10, %v1304_v34  }
  0xf5   :  { %v3346_v52 = vld [vmem:[%s6167_s0 + $0x85] ss:$16 sm:%s2049_s13]   ;;  %2081 = vrot.lane.b32.xlu1 %v2080_v50, %s3555_s3  ;;  %v2047_v14 = vsel %vm6_vm0, %v3345_v51, %v3344_v47  ;;  %s2095_s13 = smov 48 }
  0xf6   :  { %v3347_v53 = vld [vmem:[%s6167_s0 + $0x85] ss:$16 sm:%s2054_s19]   ;;  %v2052_v55 = vsel %vm10_vm1, %v3346_v52, %v2047_v14  ;;  %s2100_s19 = smov 192  ;;  %v1282_v16 = vpop.permute.xlu0 %1281   ;;  %v3390_v43 = vld [vmem:[%s6167_s0 + $0x284] ss:$16 sm:%s2255_s26]   ;;  %v1350_v48 = vpop.permute.xlu1 %1349   ;;  %s2301_s26 = smov 48 }
  0xf7   :  { %v3360_v44 = vld [vmem:[%s6167_s0 + $0x305] ss:$16 sm:%s2113_s23]   ;;  %v2057_v58 = vsel %vm14_vm2, %v3347_v53, %v2052_v55  ;;  %s2159_s23 = smov 12  ;;  %1284 = vst.msk [vmem:[%s6168_s1] sm:$0xff] %vm1283_vm10, %v1282_v16   ;;  %3197 = vst.msk [vmem:[%s6168_s1 + $0x28] sm:$0xff] %vm1283_vm10, %v1350_v48  }
  0xf8   :  { %v2116_v59 = vsel %vm6_vm0, %v3360_v44, %v3359_v56  ;;  %v3362_v63 = vld [vmem:[%s6167_s0 + $0x305] ss:$16 sm:%s2123_s29]   ;;  %2058 = vrot.lane.b32.xlu0 %v2057_v58, %s3555_s3  ;;  %s2169_s29 = smov 192 }
  0xf9   :  { %v2121_v0 = vsel %vm10_vm1, %v3361_v62, %v2116_v59  ;;  %v3354_v22 = vld [vmem:[%s6167_s0 + $0x105] ss:$16 sm:%s2087_s8]   ;;  %s2133_s8 = smov 3  ;;  %v3398_v56 = vld [vmem:[%s6167_s0 + $0x304] ss:$16 sm:%s2293_s7]   ;;  %s2339_s7 = smov 3 }
  0xfa   :  { %v2126_v1 = vsel %vm14_vm2, %v3362_v63, %v2121_v0  ;;  %v3355_v2 = vld [vmem:[%s6167_s0 + $0x105] ss:$16 sm:%s2090_s10]   ;;  %s2136_s10 = smov 12  ;;  %v1327_v57 = vpop.permute.xlu0 %1326   ;;  %v3400_v62 = vld [vmem:[%s6167_s0 + $0x304] ss:$16 sm:%s2301_s26]   ;;  %v1396_v49 = vpop.permute.xlu1 %1395   ;;  %s2347_s26 = smov 48 }
  0xfb   :  { %v3356_v54 = vld [vmem:[%s6167_s0 + $0x105] ss:$16 sm:%s2095_s13]   ;;  %2127 = vrot.lane.b32.xlu1 %v2126_v1, %s3555_s3  ;;  %v2093_v3 = vsel %vm6_vm0, %v3355_v2, %v3354_v22  ;;  %s2141_s13 = smov 48  ;;  %3192 = vst.msk [vmem:[%s6168_s1 + $0x8] sm:$0xff] %vm1283_vm10, %v1327_v57  }
  0xfc   :  { %v3357_v5 = vld [vmem:[%s6167_s0 + $0x105] ss:$16 sm:%s2100_s19]   ;;  %v2098_v7 = vsel %vm10_vm1, %v3356_v54, %v2093_v3  ;;  %s2146_s19 = smov 192  ;;  %3207 = vst.msk [vmem:[%s6168_s1 + $0x30] sm:$0xff] %vm1283_vm10, %v1396_v49  }
  0xfd   :  { %v3369_v8 = vld [vmem:[%s6167_s0 + $0x385] ss:$16 sm:%s2156_s21]   ;;  %v2103_v61 = vsel %vm14_vm2, %v3357_v5, %v2098_v7  ;;  %s2201_s21 = smov 3  ;;  %v3433_v49 = vld [vmem:[%s6167_s0 + $0x103] ss:$16 sm:%s2456_s12]  }
  0xfe   :  { %v3370_v9 = vld [vmem:[%s6167_s0 + $0x385] ss:$16 sm:%s2159_s23]   ;;  %2104 = vrot.lane.b32.xlu0 %v2103_v61, %s3555_s3  ;;  %s2204_s23 = smov 12  ;;  %v1373_v10 = vpop.permute.xlu0 %1372  }
  0xff   :  { %v2162_v11 = vsel %vm6_vm0, %v3370_v9, %v3369_v8  ;;  %v3371_v13 = vld [vmem:[%s6167_s0 + $0x385] ss:$16 sm:%s2164_s28]   ;;  %s2209_s28 = smov 48  ;;  %v3378_v26 = vld [vmem:[%s6167_s0 + $0x204] ss:$16 sm:%s2201_s21]   ;;  %s2250_s21 = smov 12  ;;  %v1442_v19 = vpop.permute.xlu1 %1441  }
 0x100   :  { %v3372_v15 = vld [vmem:[%s6167_s0 + $0x385] ss:$16 sm:%s2169_s29]   ;;  %v2167_v17 = vsel %vm10_vm1, %v3371_v13, %v2162_v11  ;;  %s2214_s29 = smov 192  ;;  %v3379_v60 = vld [vmem:[%s6167_s0 + $0x204] ss:$16 sm:%s2204_s23]   ;;  %s2535_s23 = smov 192 }
 0x101   :  { %v3364_v18 = vld [vmem:[%s6167_s0 + $0x185] ss:$16 sm:%s2133_s8]   ;;  %v2172_v20 = vsel %vm14_vm2, %v3372_v15, %v2167_v17  ;;  %s2179_s8 = smov 3  ;;  %v2207_v30 = vsel %vm6_vm0, %v3379_v60, %v3378_v26  ;;  %v3380_v32 = vld [vmem:[%s6167_s0 + $0x204] ss:$16 sm:%s2209_s28]   ;;  %s2260_s28 = smov 192 }
 0x102   :  { %v3365_v21 = vld [vmem:[%s6167_s0 + $0x185] ss:$16 sm:%s2136_s10]   ;;  %2173 = vrot.lane.b32.xlu1 %v2172_v20, %s3555_s3  ;;  %s2182_s10 = smov 12  ;;  %v2212_v33 = vsel %vm10_vm1, %v3380_v32, %v2207_v30  ;;  %3202 = vst.msk [vmem:[%s6168_s1 + $0x10] sm:$0xff] %vm1283_vm10, %v1373_v10  }
 0x103   :  { %v3366_v23 = vld [vmem:[%s6167_s0 + $0x185] ss:$16 sm:%s2141_s13]   ;;  %v2139_v24 = vsel %vm6_vm0, %v3365_v21, %v3364_v18  ;;  %s2187_s13 = smov 48  ;;  %v3381_v31 = vld [vmem:[%s6167_s0 + $0x204] ss:$16 sm:%s2214_s29]   ;;  %v1419_v27 = vpop.permute.xlu0 %1418   ;;  %v1487_v34 = vpop.permute.xlu1 %1486  }
 0x104   :  { %v3367_v28 = vld [vmem:[%s6167_s0 + $0x185] ss:$16 sm:%s2146_s19]   ;;  %v2144_v25 = vsel %vm10_vm1, %v3366_v23, %v2139_v24  ;;  %s2192_s19 = smov 192  ;;  %v3374_v4 = vld [vmem:[%s6167_s0 + $0x4] ss:$16 sm:%s2179_s8]   ;;  %v2217_v35 = vsel %vm14_vm2, %v3381_v31, %v2212_v33  ;;  %s2224_s8 = smov 3 }
 0x105   :  { %v2149_v29 = vsel %vm14_vm2, %v3367_v28, %v2144_v25  ;;  %v3375_v38 = vld [vmem:[%s6167_s0 + $0x4] ss:$16 sm:%s2182_s10]   ;;  %s2227_s10 = smov 12  ;;  %3217 = vst.msk [vmem:[%s6168_s1 + $0x38] sm:$0xff] %vm1283_vm10, %v1442_v19   ;;  %3212 = vst.msk [vmem:[%s6168_s1 + $0x18] sm:$0xff] %vm1283_vm10, %v1419_v27  }
 0x106   :  { %2150 = vrot.lane.b32.xlu0 %v2149_v29, %s3555_s3  ;;  %v3376_v6 = vld [vmem:[%s6167_s0 + $0x4] ss:$16 sm:%s2187_s13]   ;;  %2218 = vrot.lane.b32.xlu1 %v2217_v35, %s3556_s2  ;;  %v2185_v36 = vsel %vm6_vm0, %v3375_v38, %v3374_v4  ;;  %s2232_s13 = smov 48  ;;  %s2621_s3 = smov 48 }
 0x107   :  { %v3377_v37 = vld [vmem:[%s6167_s0 + $0x4] ss:$16 sm:%s2192_s19]   ;;  %v2190_v39 = vsel %vm10_vm1, %v3376_v6, %v2185_v36  ;;  %s2237_s19 = smov 192  ;;  %3226 = vst.msk [vmem:[%s6168_s1 + $0x20] sm:$0xff] %vm1466_vm11, %v1487_v34   ;;  %v1465_v16 = vpop.permute.xlu0 %1464  }
 0x108   :  { %v3389_v41 = vld [vmem:[%s6167_s0 + $0x284] ss:$16 sm:%s2250_s21]   ;;  %v2195_v12 = vsel %vm14_vm2, %v3377_v37, %v2190_v39  ;;  %s2296_s21 = smov 12  ;;  %1467 = vst.msk [vmem:[%s6168_s1] sm:$0xff] %vm1466_vm11, %v1465_v16  }
 0x109   :  { %v2253_v42 = vsel %vm6_vm0, %v3389_v41, %v3388_v40  ;;  %v3391_v45 = vld [vmem:[%s6167_s0 + $0x284] ss:$16 sm:%s2260_s28]   ;;  %s2306_s28 = smov 192  ;;  %v3427_v40 = vld [vmem:[%s6167_s0 + $0x283] ss:$16 sm:%s2430_s4]   ;;  %s2476_s4 = smov 3 }
 0x10a   :  { %2196 = vrot.lane.b32.xlu0 %v2195_v12, %s3556_s2  ;;  %v2258_v46 = vsel %vm10_vm1, %v3390_v43, %v2253_v42  ;;  %v3383_v47 = vld [vmem:[%s6167_s0 + $0x84] ss:$16 sm:%s2224_s8]   ;;  %s2270_s8 = smov 3 }
 0x10b   :  { %v2263_v50 = vsel %vm14_vm2, %v3391_v45, %v2258_v46  ;;  %v3384_v51 = vld [vmem:[%s6167_s0 + $0x84] ss:$16 sm:%s2227_s10]   ;;  %s2273_s10 = smov 12  ;;  %v3429_v43 = vld [vmem:[%s6167_s0 + $0x283] ss:$16 sm:%s2438_s25]   ;;  %s2484_s25 = smov 48 }
 0x10c   :  { %v3385_v52 = vld [vmem:[%s6167_s0 + $0x84] ss:$16 sm:%s2232_s13]   ;;  %2264 = vrot.lane.b32.xlu1 %v2263_v50, %s3556_s2  ;;  %v2230_v14 = vsel %vm6_vm0, %v3384_v51, %v3383_v47  ;;  %s2278_s13 = smov 48 }
 0x10d   :  { %v3386_v53 = vld [vmem:[%s6167_s0 + $0x84] ss:$16 sm:%s2237_s19]   ;;  %v2235_v55 = vsel %vm10_vm1, %v3385_v52, %v2230_v14  ;;  %s2283_s19 = smov 192  ;;  %v3444_v19 = vld [vmem:[%s6167_s0 + $0x183] ss:$16 sm:%s2507_s11]   ;;  %s2799_s11 = smov 12 }
 0x10e   :  { %v3399_v44 = vld [vmem:[%s6167_s0 + $0x304] ss:$16 sm:%s2296_s21]   ;;  %v2240_v58 = vsel %vm14_vm2, %v3386_v53, %v2235_v55  ;;  %s2342_s21 = smov 12  ;;  %v3437_v55 = vld [vmem:[%s6167_s0 + $0x303] ss:$16 sm:%s2476_s4]   ;;  %s2626_s4 = smov 192 }
 0x10f   :  { %v2299_v59 = vsel %vm6_vm0, %v3399_v44, %v3398_v56  ;;  %v3401_v63 = vld [vmem:[%s6167_s0 + $0x304] ss:$16 sm:%s2306_s28]   ;;  %2241 = vrot.lane.b32.xlu0 %v2240_v58, %s3556_s2  ;;  %s2352_s28 = smov 192 }
 0x110   :  { %v2304_v0 = vsel %vm10_vm1, %v3400_v62, %v2299_v59  ;;  %v3393_v22 = vld [vmem:[%s6167_s0 + $0x104] ss:$16 sm:%s2270_s8]   ;;  %s2316_s8 = smov 3  ;;  %v3439_v58 = vld [vmem:[%s6167_s0 + $0x303] ss:$16 sm:%s2484_s25]   ;;  %s2545_s25 = smov 3 }
 0x111   :  { %v2309_v1 = vsel %vm14_vm2, %v3401_v63, %v2304_v0  ;;  %v3394_v2 = vld [vmem:[%s6167_s0 + $0x104] ss:$16 sm:%s2273_s10]   ;;  %s2319_s10 = smov 12  ;;  %v3432_v63 = vld [vmem:[%s6167_s0 + $0x103] ss:$16 sm:%s2453_s5]   ;;  %v1533_v0 = vpop.permute.xlu1 %1532  }
 0x112   :  { %v3395_v54 = vld [vmem:[%s6167_s0 + $0x104] ss:$16 sm:%s2278_s13]   ;;  %2310 = vrot.lane.b32.xlu1 %v2309_v1, %s3556_s2  ;;  %v2276_v3 = vsel %vm6_vm0, %v3394_v2, %v3393_v22  ;;  %s2324_s13 = smov 48  ;;  %3236 = vst.msk [vmem:[%s6168_s1 + $0x28] sm:$0xff] %vm1466_vm11, %v1533_v0   ;;  %v2459_v2 = vsel %vm6_vm0, %v3433_v49, %v3432_v63 }
 0x113   :  { %v3396_v5 = vld [vmem:[%s6167_s0 + $0x104] ss:$16 sm:%s2283_s19]   ;;  %v2281_v7 = vsel %vm10_vm1, %v3395_v54, %v2276_v3  ;;  %s2329_s19 = smov 192  ;;  %v3434_v1 = vld [vmem:[%s6167_s0 + $0x103] ss:$16 sm:%s2461_s27]   ;;  %v1510_v3 = vpop.permute.xlu0 %1509   ;;  %s2750_s27 = smov 3 }
 0x114   :  { %v3408_v8 = vld [vmem:[%s6167_s0 + $0x384] ss:$16 sm:%s2339_s7]   ;;  %v2286_v61 = vsel %vm14_vm2, %v3396_v5, %v2281_v7  ;;  %s2384_s7 = smov 3  ;;  %v3435_v54 = vld [vmem:[%s6167_s0 + $0x103] ss:$16 sm:%s2466_s17]   ;;  %v2464_v5 = vsel %vm10_vm1, %v3434_v1, %v2459_v2  ;;  %s2512_s17 = smov 192 }
 0x115   :  { %v3409_v9 = vld [vmem:[%s6167_s0 + $0x384] ss:$16 sm:%s2342_s21]   ;;  %2287 = vrot.lane.b32.xlu0 %v2286_v61, %s3556_s2  ;;  %s2387_s21 = smov 12  ;;  %3231 = vst.msk [vmem:[%s6168_s1 + $0x8] sm:$0xff] %vm1466_vm11, %v1510_v3  }
 0x116   :  { %v2345_v11 = vsel %vm6_vm0, %v3409_v9, %v3408_v8  ;;  %v3410_v13 = vld [vmem:[%s6167_s0 + $0x384] ss:$16 sm:%s2347_s26]   ;;  %s2392_s26 = smov 48  ;;  %v3417_v26 = vld [vmem:[%s6167_s0 + $0x203] ss:$16 sm:%s2384_s7]   ;;  %s2433_s7 = smov 12  ;;  %v2469_v9 = vsel %vm14_vm2, %v3435_v54, %v2464_v5 }
 0x117   :  { %v3411_v15 = vld [vmem:[%s6167_s0 + $0x384] ss:$16 sm:%s2352_s28]   ;;  %v2350_v17 = vsel %vm10_vm1, %v3410_v13, %v2345_v11  ;;  %s2397_s28 = smov 192  ;;  %v3418_v60 = vld [vmem:[%s6167_s0 + $0x203] ss:$16 sm:%s2387_s21]   ;;  %s2530_s21 = smov 48 }
 0x118   :  { %v3403_v18 = vld [vmem:[%s6167_s0 + $0x184] ss:$16 sm:%s2316_s8]   ;;  %v2355_v20 = vsel %vm14_vm2, %v3411_v15, %v2350_v17  ;;  %s2362_s8 = smov 3  ;;  %v2390_v30 = vsel %vm6_vm0, %v3418_v60, %v3417_v26  ;;  %v3419_v32 = vld [vmem:[%s6167_s0 + $0x203] ss:$16 sm:%s2392_s26]   ;;  %s2443_s26 = smov 192 }
 0x119   :  { %v3404_v21 = vld [vmem:[%s6167_s0 + $0x184] ss:$16 sm:%s2319_s10]   ;;  %2356 = vrot.lane.b32.xlu1 %v2355_v20, %s3556_s2  ;;  %s2365_s10 = smov 12  ;;  %v2395_v33 = vsel %vm10_vm1, %v3419_v32, %v2390_v30 }
 0x11a   :  { %v3405_v23 = vld [vmem:[%s6167_s0 + $0x184] ss:$16 sm:%s2324_s13]   ;;  %v2322_v24 = vsel %vm6_vm0, %v3404_v21, %v3403_v18  ;;  %s2370_s13 = smov 48  ;;  %v3420_v31 = vld [vmem:[%s6167_s0 + $0x203] ss:$16 sm:%s2397_s28]   ;;  %s2499_s28 = smov 3  ;;  %v1556_v34 = vpop.permute.xlu0 %1555  }
 0x11b   :  { %v3406_v28 = vld [vmem:[%s6167_s0 + $0x184] ss:$16 sm:%s2329_s19]   ;;  %v2327_v25 = vsel %vm10_vm1, %v3405_v23, %v2322_v24  ;;  %s2375_s19 = smov 192  ;;  %v3413_v4 = vld [vmem:[%s6167_s0 + $0x3] ss:$16 sm:%s2362_s8]   ;;  %v2400_v35 = vsel %vm14_vm2, %v3420_v31, %v2395_v33  ;;  %s2407_s8 = smov 3 }
 0x11c   :  { %v2332_v29 = vsel %vm14_vm2, %v3406_v28, %v2327_v25  ;;  %v3414_v38 = vld [vmem:[%s6167_s0 + $0x3] ss:$16 sm:%s2365_s10]   ;;  %s2410_s10 = smov 12  ;;  %v3452_v32 = vld [vmem:[%s6167_s0 + $0x2] ss:$16 sm:%s2545_s25]   ;;  %s2781_s25 = smov 48 }
 0x11d   :  { %2333 = vrot.lane.b32.xlu0 %v2332_v29, %s3556_s2  ;;  %v3415_v6 = vld [vmem:[%s6167_s0 + $0x3] ss:$16 sm:%s2370_s13]   ;;  %2401 = vrot.lane.b32.xlu1 %v2400_v35, %s3557_s30  ;;  %v2368_v36 = vsel %vm6_vm0, %v3414_v38, %v3413_v4  ;;  %s2415_s13 = smov 48  ;;  %v1579_v29 = vpop.permute.xlu1 %1578   ;;  %s2672_s2 = smov 192 }
 0x11e   :  { %v3416_v37 = vld [vmem:[%s6167_s0 + $0x3] ss:$16 sm:%s2375_s19]   ;;  %v2373_v39 = vsel %vm10_vm1, %v3415_v6, %v2368_v36  ;;  %s2420_s19 = smov 192  ;;  %3246 = vst.msk [vmem:[%s6168_s1 + $0x30] sm:$0xff] %vm1466_vm11, %v1579_v29   ;;  %3241 = vst.msk [vmem:[%s6168_s1 + $0x10] sm:$0xff] %vm1466_vm11, %v1556_v34  }
 0x11f   :  { %v3428_v41 = vld [vmem:[%s6167_s0 + $0x283] ss:$16 sm:%s2433_s7]   ;;  %v2378_v12 = vsel %vm14_vm2, %v3416_v37, %v2373_v39  ;;  %s2479_s7 = smov 12  ;;  %v3453_v33 = vld [vmem:[%s6167_s0 + $0x2] ss:$16 sm:%s2548_s6]   ;;  %s2593_s6 = smov 12 }
 0x120   :  { %v2436_v42 = vsel %vm6_vm0, %v3428_v41, %v3427_v40  ;;  %v3430_v45 = vld [vmem:[%s6167_s0 + $0x283] ss:$16 sm:%s2443_s26]   ;;  %s2489_s26 = smov 192  ;;  %v2551_v35 = vsel %vm6_vm0, %v3453_v33, %v3452_v32  ;;  %v3466_v36 = vld [vmem:[%s6167_s0 + $0x282] ss:$16 sm:%s2613_s14]   ;;  %s2659_s14 = smov 3 }
 0x121   :  { %2379 = vrot.lane.b32.xlu0 %v2378_v12, %s3557_s30  ;;  %v2441_v46 = vsel %vm10_vm1, %v3429_v43, %v2436_v42  ;;  %v3422_v47 = vld [vmem:[%s6167_s0 + $0x83] ss:$16 sm:%s2407_s8]   ;;  %s2553_s8 = smov 48 }
 0x122   :  { %v2446_v48 = vsel %vm14_vm2, %v3430_v45, %v2441_v46  ;;  %v3423_v50 = vld [vmem:[%s6167_s0 + $0x83] ss:$16 sm:%s2410_s10]   ;;  %s2558_s10 = smov 192  ;;  %v3454_v4 = vld [vmem:[%s6167_s0 + $0x2] ss:$16 sm:%s2553_s8]   ;;  %s2598_s8 = smov 48 }
 0x123   :  { %v3424_v51 = vld [vmem:[%s6167_s0 + $0x83] ss:$16 sm:%s2415_s13]   ;;  %2447 = vrot.lane.b32.xlu1 %v2446_v48, %s3557_s30  ;;  %v2413_v52 = vsel %vm6_vm0, %v3423_v50, %v3422_v47  ;;  %v2556_v6 = vsel %vm10_vm1, %v3454_v4, %v2551_v35  ;;  %s2708_s13 = smov 12 }
 0x124   :  { %v3425_v14 = vld [vmem:[%s6167_s0 + $0x83] ss:$16 sm:%s2420_s19]   ;;  %v2418_v53 = vsel %vm10_vm1, %v3424_v51, %v2413_v52  ;;  %v3455_v38 = vld [vmem:[%s6167_s0 + $0x2] ss:$16 sm:%s2558_s10]   ;;  %s2603_s10 = smov 192  ;;  %s2713_s19 = smov 48 }
 0x125   :  { %v3438_v56 = vld [vmem:[%s6167_s0 + $0x303] ss:$16 sm:%s2479_s7]   ;;  %v2423_v44 = vsel %vm14_vm2, %v3425_v14, %v2418_v53  ;;  %s3558_s7 = smov 8   ;;  %v3467_v37 = vld [vmem:[%s6167_s0 + $0x282] ss:$16 sm:%s2616_s16]   ;;  %v2561_v39 = vsel %vm14_vm2, %v3455_v38, %v2556_v6  ;;  %s2662_s16 = smov 12  ;;  %v1625_v14 = vpop.permute.xlu1 %1624  }
 0x126   :  { %v2482_v57 = vsel %vm6_vm0, %v3438_v56, %v3437_v55  ;;  %v3440_v59 = vld [vmem:[%s6167_s0 + $0x303] ss:$16 sm:%s2489_s26]   ;;  %2424 = vrot.lane.b32.xlu0 %v2423_v44, %s3557_s30  ;;  %v2619_v40 = vsel %vm6_vm0, %v3467_v37, %v3466_v36  ;;  %s2639_s26 = smov 12  ;;  %3256 = vst.msk [vmem:[%s6168_s1 + $0x38] sm:$0xff] %vm1466_vm11, %v1625_v14  }
 0x127   :  { %v2487_v62 = vsel %vm10_vm1, %v3439_v58, %v2482_v57  ;;  %v3447_v7 = vld [vmem:[%s6167_s0 + $0x383] ss:$16 sm:%s2522_s15]   ;;  %s2567_s15 = smov 3  ;;  %v3468_v41 = vld [vmem:[%s6167_s0 + $0x282] ss:$16 sm:%s2621_s3]  }
 0x128   :  { %v2492_v22 = vsel %vm14_vm2, %v3440_v59, %v2487_v62  ;;  %v3448_v8 = vld [vmem:[%s6167_s0 + $0x383] ss:$16 sm:%s2525_s20]   ;;  %s2570_s20 = smov 12  ;;  %v3456_v24 = vld [vmem:[%s6167_s0 + $0x202] ss:$16 sm:%s2567_s15]   ;;  %v2624_v12 = vsel %vm10_vm1, %v3468_v41, %v2619_v40  ;;  %v1602_v59 = vpop.permute.xlu0 %1601   ;;  %s2718_s15 = smov 192 }
 0x129   :  { %2493 = vrot.lane.b32.xlu1 %v2492_v22, %s3557_s30  ;;  %v2528_v10 = vsel %vm6_vm0, %v3448_v8, %v3447_v7  ;;  %v3449_v61 = vld [vmem:[%s6167_s0 + $0x383] ss:$16 sm:%s2530_s21]   ;;  %s2575_s21 = smov 48  ;;  %3251 = vst.msk [vmem:[%s6168_s1 + $0x18] sm:$0xff] %vm1466_vm11, %v1602_v59  }
 0x12a   :  { %v3450_v11 = vld [vmem:[%s6167_s0 + $0x383] ss:$16 sm:%s2535_s23]   ;;  %2470 = vrot.lane.b32.xlu0 %v2469_v9, %s3557_s30  ;;  %v2533_v13 = vsel %vm10_vm1, %v3449_v61, %v2528_v10  ;;  %s2580_s23 = smov 192 }
 0x12b   :  { %v3442_v15 = vld [vmem:[%s6167_s0 + $0x183] ss:$16 sm:%s2499_s28]   ;;  %v2538_v17 = vsel %vm14_vm2, %v3450_v11, %v2533_v13  ;;  %v3457_v28 = vld [vmem:[%s6167_s0 + $0x202] ss:$16 sm:%s2570_s20]   ;;  %s2667_s20 = smov 48  ;;  %s2644_s28 = smov 48 }
 0x12c   :  { %v3443_v18 = vld [vmem:[%s6167_s0 + $0x183] ss:$16 sm:%s2502_s9]   ;;  %v2573_v26 = vsel %vm6_vm0, %v3457_v28, %v3456_v24  ;;  %v3458_v60 = vld [vmem:[%s6167_s0 + $0x202] ss:$16 sm:%s2575_s21]   ;;  %s2636_s21 = smov 3  ;;  %s2649_s9 = smov 192 }
 0x12d   :  { %2539 = vrot.lane.b32.xlu1 %v2538_v17, %s3557_s30  ;;  %v2505_v20 = vsel %vm6_vm0, %v3443_v18, %v3442_v15  ;;  %v3445_v21 = vld [vmem:[%s6167_s0 + $0x183] ss:$16 sm:%s2512_s17]   ;;  %v2578_v30 = vsel %vm10_vm1, %v3458_v60, %v2573_v26  ;;  %s2758_s17 = smov 48 }
 0x12e   :  { %v2510_v23 = vsel %vm10_vm1, %v3444_v19, %v2505_v20  ;;  %v3459_v27 = vld [vmem:[%s6167_s0 + $0x202] ss:$16 sm:%s2580_s23]   ;;  %v3495_v20 = vld [vmem:[%s6167_s0 + $0x201] ss:$16 sm:%s2750_s27]   ;;  %s2731_s23 = smov 12 }
 0x12f   :  { %v2515_v25 = vsel %vm14_vm2, %v3445_v21, %v2510_v23  ;;  %v2583_v31 = vsel %vm14_vm2, %v3459_v27, %v2578_v30  ;;  %v3469_v16 = vld [vmem:[%s6167_s0 + $0x282] ss:$16 sm:%s2626_s4]   ;;  %v3497_v28 = vld [vmem:[%s6167_s0 + $0x201] ss:$16 sm:%s2758_s17]   ;;  %s2809_s17 = smov 192 }
 0x130   :  { %2516 = vrot.lane.b32.xlu0 %v2515_v25, %s3557_s30  ;;  %v3461_v42 = vld [vmem:[%s6167_s0 + $0x82] ss:$16 sm:%s2590_s24]   ;;  %v2629_v43 = vsel %vm14_vm2, %v3469_v16, %v2624_v12  ;;  %s2705_s30 = smov 3  ;;  %s2736_s24 = smov 48 }
 0x131   :  { %2584 = vrot.lane.b32.xlu1 %v2583_v31, %s3558_s7  ;;  %v3462_v45 = vld [vmem:[%s6167_s0 + $0x82] ss:$16 sm:%s2593_s6]   ;;  %v1670_v18 = vpop.permute.xlu1 %1669   ;;  %s2741_s6 = smov 192 }
 0x132   :  { %v3463_v46 = vld [vmem:[%s6167_s0 + $0x82] ss:$16 sm:%s2598_s8]   ;;  %v2596_v47 = vsel %vm6_vm0, %v3462_v45, %v3461_v42  ;;  %3265 = vst.msk [vmem:[%s6168_s1 + $0x20] sm:$0xff] %vm1649_vm12, %v1670_v18   ;;  %v1648_v26 = vpop.permute.xlu0 %1647  }
 0x133   :  { %v3464_v48 = vld [vmem:[%s6167_s0 + $0x82] ss:$16 sm:%s2603_s10]   ;;  %v2601_v50 = vsel %vm10_vm1, %v3463_v46, %v2596_v47  ;;  %s2753_s10 = smov 12  ;;  %v3498_v25 = vld [vmem:[%s6167_s0 + $0x201] ss:$16 sm:%s2763_s18]   ;;  %s3559_s18 = smov 4  }
 0x134   :  { %2562 = vrot.lane.b32.xlu0 %v2561_v39, %s3558_s7  ;;  %v3476_v51 = vld [vmem:[%s6167_s0 + $0x302] ss:$16 sm:%s2659_s14]   ;;  %v2606_v53 = vsel %vm14_vm2, %v3464_v48, %v2601_v50  ;;  %1650 = vst.msk [vmem:[%s6168_s1] sm:$0xff] %vm1649_vm12, %v1648_v26  }
 0x135   :  { %2630 = vrot.lane.b32.xlu1 %v2629_v43, %s3558_s7  ;;  %v3477_v52 = vld [vmem:[%s6167_s0 + $0x302] ss:$16 sm:%s2662_s16]   ;;  %s2804_s16 = smov 48 }
 0x136   :  { %v2665_v55 = vsel %vm6_vm0, %v3477_v52, %v3476_v51  ;;  %v3478_v56 = vld [vmem:[%s6167_s0 + $0x302] ss:$16 sm:%s2667_s20]   ;;  %s2728_s20 = smov 3  ;;  %v3496_v21 = vld [vmem:[%s6167_s0 + $0x201] ss:$16 sm:%s2753_s10]   ;;  %v1716_v31 = vpop.permute.xlu1 %1715  }
 0x137   :  { %v3479_v44 = vld [vmem:[%s6167_s0 + $0x302] ss:$16 sm:%s2672_s2]   ;;  %v2670_v57 = vsel %vm10_vm1, %v3478_v56, %v2665_v55  ;;  %v2756_v24 = vsel %vm6_vm0, %v3496_v21, %v3495_v20  ;;  %v3491_v27 = vld [vmem:[%s6167_s0 + $0x1] ss:$16 sm:%s2728_s20]   ;;  %s2773_s20 = smov 3 }
 0x138   :  { %2607 = vrot.lane.b32.xlu0 %v2606_v53, %s3558_s7  ;;  %v3471_v58 = vld [vmem:[%s6167_s0 + $0x102] ss:$16 sm:%s2636_s21]   ;;  %v2675_v62 = vsel %vm14_vm2, %v3479_v44, %v2670_v57  ;;  %s2682_s21 = smov 3  ;;  %v2761_v60 = vsel %vm10_vm1, %v3497_v28, %v2756_v24  ;;  %3275 = vst.msk [vmem:[%s6168_s1 + $0x28] sm:$0xff] %vm1649_vm12, %v1716_v31  }
 0x139   :  { %v3472_v63 = vld [vmem:[%s6167_s0 + $0x102] ss:$16 sm:%s2639_s26]   ;;  %2676 = vrot.lane.b32.xlu1 %v2675_v62, %s3558_s7  ;;  %s2685_s26 = smov 12  ;;  %v2766_v29 = vsel %vm14_vm2, %v3498_v25, %v2761_v60 }
 0x13a   :  { %v3473_v0 = vld [vmem:[%s6167_s0 + $0x102] ss:$16 sm:%s2644_s28]   ;;  %v2642_v22 = vsel %vm6_vm0, %v3472_v63, %v3471_v58  ;;  %s2690_s28 = smov 48  ;;  %v3492_v30 = vld [vmem:[%s6167_s0 + $0x1] ss:$16 sm:%s2731_s23]   ;;  %v1693_v40 = vpop.permute.xlu0 %1692  }
 0x13b   :  { %v3474_v49 = vld [vmem:[%s6167_s0 + $0x102] ss:$16 sm:%s2649_s9]   ;;  %v2647_v1 = vsel %vm10_vm1, %v3473_v0, %v2642_v22  ;;  %s2695_s9 = smov 192  ;;  %v3493_v32 = vld [vmem:[%s6167_s0 + $0x1] ss:$16 sm:%s2736_s24]   ;;  %v2734_v33 = vsel %vm6_vm0, %v3492_v30, %v3491_v27 }
 0x13c   :  { %v3486_v2 = vld [vmem:[%s6167_s0 + $0x382] ss:$16 sm:%s2705_s30]   ;;  %v2652_v3 = vsel %vm14_vm2, %v3474_v49, %v2647_v1  ;;  %v3494_v4 = vld [vmem:[%s6167_s0 + $0x1] ss:$16 sm:%s2741_s6]   ;;  %v2739_v34 = vsel %vm10_vm1, %v3493_v32, %v2734_v33  ;;  %s2786_s6 = smov 192 }
 0x13d   :  { %v3487_v54 = vld [vmem:[%s6167_s0 + $0x382] ss:$16 sm:%s2708_s13]   ;;  %2653 = vrot.lane.b32.xlu0 %v2652_v3, %s3558_s7  ;;  %v2744_v6 = vsel %vm14_vm2, %v3494_v4, %v2739_v34  ;;  %3270 = vst.msk [vmem:[%s6168_s1 + $0x8] sm:$0xff] %vm1649_vm12, %v1693_v40  }
 0x13e   :  { %v2711_v5 = vsel %vm6_vm0, %v3487_v54, %v3486_v2  ;;  %v3488_v7 = vld [vmem:[%s6167_s0 + $0x382] ss:$16 sm:%s2713_s19]   ;;  %v3506_v38 = vld [vmem:[%s6167_s0 + $0x281] ss:$16 sm:%s2799_s11]   ;;  %s2845_s11 = smov 12  ;;  %v1762_v45 = vpop.permute.xlu1 %1761  }
 0x13f   :  { %v3489_v8 = vld [vmem:[%s6167_s0 + $0x382] ss:$16 sm:%s2718_s15]   ;;  %v2716_v9 = vsel %vm10_vm1, %v3488_v7, %v2711_v5  ;;  %v3507_v37 = vld [vmem:[%s6167_s0 + $0x281] ss:$16 sm:%s2804_s16]   ;;  %s2850_s16 = smov 48 }
 0x140   :  { %v3481_v10 = vld [vmem:[%s6167_s0 + $0x182] ss:$16 sm:%s2682_s21]   ;;  %v2721_v61 = vsel %vm14_vm2, %v3489_v8, %v2716_v9  ;;  %v3508_v39 = vld [vmem:[%s6167_s0 + $0x281] ss:$16 sm:%s2809_s17]   ;;  %s2855_s17 = smov 192 }
 0x141   :  { %v3482_v11 = vld [vmem:[%s6167_s0 + $0x182] ss:$16 sm:%s2685_s26]   ;;  %2722 = vrot.lane.b32.xlu1 %v2721_v61, %s3558_s7  ;;  %3285 = vst.msk [vmem:[%s6168_s1 + $0x30] sm:$0xff] %vm1649_vm12, %v1762_v45  }
 0x142   :  { %v3483_v13 = vld [vmem:[%s6167_s0 + $0x182] ss:$16 sm:%s2690_s28]   ;;  %v2688_v15 = vsel %vm6_vm0, %v3482_v11, %v3481_v10  ;;  %v3500_v16 = vld [vmem:[%s6167_s0 + $0x81] ss:$16 sm:%s2773_s20]   ;;  %s2819_s20 = smov 3  ;;  %v1739_v56 = vpop.permute.xlu0 %1738  }
 0x143   :  { %v3484_v17 = vld [vmem:[%s6167_s0 + $0x182] ss:$16 sm:%s2695_s9]   ;;  %v2693_v19 = vsel %vm10_vm1, %v3483_v13, %v2688_v15  ;;  %s2796_s9 = smov 3  ;;  %v3501_v42 = vld [vmem:[%s6167_s0 + $0x81] ss:$16 sm:%s2776_s22]   ;;  %s2822_s22 = smov 12 }
 0x144   :  { %v2698_v23 = vsel %vm14_vm2, %v3484_v17, %v2693_v19  ;;  %v3505_v35 = vld [vmem:[%s6167_s0 + $0x281] ss:$16 sm:%s2796_s9]   ;;  %s2842_s9 = smov 3  ;;  %v2779_v46 = vsel %vm6_vm0, %v3501_v42, %v3500_v16  ;;  %3280 = vst.msk [vmem:[%s6168_s1 + $0x10] sm:$0xff] %vm1649_vm12, %v1739_v56  }
 0x145   :  { %2699 = vrot.lane.b32.xlu0 %v2698_v23, %s3558_s7  ;;  %2767 = vrot.lane.b32.xlu1 %v2766_v29, %s3559_s18  ;;  %v2802_v36 = vsel %vm6_vm0, %v3506_v38, %v3505_v35  ;;  %v3502_v43 = vld [vmem:[%s6167_s0 + $0x81] ss:$16 sm:%s2781_s25]   ;;  %s2827_s25 = smov 48 }
 0x146   :  { %v2807_v41 = vsel %vm10_vm1, %v3507_v37, %v2802_v36  ;;  %v3503_v47 = vld [vmem:[%s6167_s0 + $0x81] ss:$16 sm:%s2786_s6]   ;;  %v2784_v48 = vsel %vm10_vm1, %v3502_v43, %v2779_v46  ;;  %s2832_s6 = smov 192  ;;  %v1808_v63 = vpop.permute.xlu1 %1807  }
 0x147   :  { %v2812_v12 = vsel %vm14_vm2, %v3508_v39, %v2807_v41  ;;  %v3515_v50 = vld [vmem:[%s6167_s0 + $0x301] ss:$16 sm:%s2842_s9]   ;;  %v2789_v52 = vsel %vm14_vm2, %v3503_v47, %v2784_v48  ;;  %s2888_s9 = smov 3  ;;  %3295 = vst.msk [vmem:[%s6168_s1 + $0x38] sm:$0xff] %vm1649_vm12, %v1808_v63  }
 0x148   :  { %v3516_v51 = vld [vmem:[%s6167_s0 + $0x301] ss:$16 sm:%s2845_s11]   ;;  %s2891_s11 = smov 12 }
 0x149   :  { %2745 = vrot.lane.b32.xlu0 %v2744_v6, %s3559_s18  ;;  %2813 = vrot.lane.b32.xlu1 %v2812_v12, %s3559_s18  ;;  %v2848_v14 = vsel %vm6_vm0, %v3516_v51, %v3515_v50  ;;  %v3517_v53 = vld [vmem:[%s6167_s0 + $0x301] ss:$16 sm:%s2850_s16]   ;;  %s2896_s16 = smov 48 }
 0x14a   :  { %v3518_v55 = vld [vmem:[%s6167_s0 + $0x301] ss:$16 sm:%s2855_s17]   ;;  %v2853_v44 = vsel %vm10_vm1, %v3517_v53, %v2848_v14  ;;  %s2901_s17 = smov 192  ;;  %v1785_v8 = vpop.permute.xlu0 %1784   ;;  %v1853_v15 = vpop.permute.xlu1 %1852  }
 0x14b   :  { %v3510_v57 = vld [vmem:[%s6167_s0 + $0x101] ss:$16 sm:%s2819_s20]   ;;  %v2858_v58 = vsel %vm14_vm2, %v3518_v55, %v2853_v44  ;;  %s2865_s20 = smov 3  ;;  %3290 = vst.msk [vmem:[%s6168_s1 + $0x18] sm:$0xff] %vm1649_vm12, %v1785_v8  }
 0x14c   :  { %v3511_v59 = vld [vmem:[%s6167_s0 + $0x101] ss:$16 sm:%s2822_s22]   ;;  %s2868_s22 = smov 12  ;;  %3304 = vst.msk [vmem:[%s6168_s1 + $0x20] sm:$0xff] %vm1832_vm13, %v1853_v15  }
 0x14d   :  { %2790 = vrot.lane.b32.xlu0 %v2789_v52, %s3559_s18  ;;  %v3512_v62 = vld [vmem:[%s6167_s0 + $0x101] ss:$16 sm:%s2827_s25]   ;;  %2859 = vrot.lane.b32.xlu1 %v2858_v58, %s3559_s18  ;;  %v2825_v0 = vsel %vm6_vm0, %v3511_v59, %v3510_v57  ;;  %s2873_s25 = smov 48 }
 0x14e   :  { %v3513_v22 = vld [vmem:[%s6167_s0 + $0x101] ss:$16 sm:%s2832_s6]   ;;  %v2830_v49 = vsel %vm10_vm1, %v3512_v62, %v2825_v0  ;;  %s2878_s6 = smov 192  ;;  %v1831_v21 = vpop.permute.xlu0 %1830  }
 0x14f   :  { %v3525_v1 = vld [vmem:[%s6167_s0 + $0x381] ss:$16 sm:%s2888_s9]   ;;  %v2835_v54 = vsel %vm14_vm2, %v3513_v22, %v2830_v49  ;;  %1833 = vst.msk [vmem:[%s6168_s1] sm:$0xff] %vm1832_vm13, %v1831_v21  }
 0x150   :  { %v3526_v2 = vld [vmem:[%s6167_s0 + $0x381] ss:$16 sm:%s2891_s11]   ;;  %v1899_v23 = vpop.permute.xlu1 %1898  }
 0x151   :  { %v2894_v3 = vsel %vm6_vm0, %v3526_v2, %v3525_v1  ;;  %v3527_v5 = vld [vmem:[%s6167_s0 + $0x381] ss:$16 sm:%s2896_s16]   ;;  %2836 = vrot.lane.b32.xlu0 %v2835_v54, %s3559_s18  ;;  %3314 = vst.msk [vmem:[%s6168_s1 + $0x28] sm:$0xff] %vm1832_vm13, %v1899_v23  }
 0x152   :  { %v3528_v7 = vld [vmem:[%s6167_s0 + $0x381] ss:$16 sm:%s2901_s17]   ;;  %v2899_v9 = vsel %vm10_vm1, %v3527_v5, %v2894_v3 }
 0x153   :  { %v3520_v10 = vld [vmem:[%s6167_s0 + $0x181] ss:$16 sm:%s2865_s20]   ;;  %v2904_v61 = vsel %vm14_vm2, %v3528_v7, %v2899_v9  ;;  %v1876_v24 = vpop.permute.xlu0 %1875  }
 0x154   :  { %v3521_v11 = vld [vmem:[%s6167_s0 + $0x181] ss:$16 sm:%s2868_s22]   ;;  %2905 = vrot.lane.b32.xlu1 %v2904_v61, %s3559_s18  ;;  %3309 = vst.msk [vmem:[%s6168_s1 + $0x8] sm:$0xff] %vm1832_vm13, %v1876_v24  }
 0x155   :  { %v3522_v13 = vld [vmem:[%s6167_s0 + $0x181] ss:$16 sm:%s2873_s25]   ;;  %v2871_v17 = vsel %vm6_vm0, %v3521_v11, %v3520_v10  ;;  %vm2381_vm0 = vcmask 130144  }
 0x156   :  { %v3523_v18 = vld [vmem:[%s6167_s0 + $0x181] ss:$16 sm:%s2878_s6]   ;;  %v2876_v19 = vsel %vm10_vm1, %v3522_v13, %v2871_v17  ;;  %v1945_v28 = vpop.permute.xlu1 %1944   ;;  %vm2564_vm1 = vcmask 97344  }
 0x157   :  { %v2881_v20 = vsel %vm14_vm2, %v3523_v18, %v2876_v19  ;;  %3324 = vst.msk [vmem:[%s6168_s1 + $0x30] sm:$0xff] %vm1832_vm13, %v1945_v28   ;;  %vm2747_vm2 = vcmask 64544  }
 0x158   :  { %2882 = vrot.lane.b32.xlu0 %v2881_v20, %s3559_s18 }
 0x159   :  { %v1922_v25 = vpop.permute.xlu0 %1921  }
 0x15a   :  { %3319 = vst.msk [vmem:[%s6168_s1 + $0x10] sm:$0xff] %vm1832_vm13, %v1922_v25  }
 0x15d   :  { %v1991_v26 = vpop.permute.xlu1 %1990  }
 0x15e   :  { %3334 = vst.msk [vmem:[%s6168_s1 + $0x38] sm:$0xff] %vm1832_vm13, %v1991_v26  }
 0x161   :  { %v1968_v60 = vpop.permute.xlu0 %1967   ;;  %v2036_v27 = vpop.permute.xlu1 %2035  }
 0x162   :  { %3329 = vst.msk [vmem:[%s6168_s1 + $0x18] sm:$0xff] %vm1832_vm13, %v1968_v60  }
 0x163   :  { %3343 = vst.msk [vmem:[%s6168_s1 + $0x20] sm:$0xff] %vm2015_vm14, %v2036_v27  }
 0x165   :  { %v2014_v29 = vpop.permute.xlu0 %2013  }
 0x166   :  { %2016 = vst.msk [vmem:[%s6168_s1] sm:$0xff] %vm2015_vm14, %v2014_v29  }
 0x167   :  { %v2082_v30 = vpop.permute.xlu1 %2081  }
 0x168   :  { %3353 = vst.msk [vmem:[%s6168_s1 + $0x28] sm:$0xff] %vm2015_vm14, %v2082_v30  }
 0x16a   :  { %v2059_v32 = vpop.permute.xlu0 %2058  }
 0x16b   :  { %3348 = vst.msk [vmem:[%s6168_s1 + $0x8] sm:$0xff] %vm2015_vm14, %v2059_v32  }
 0x16d   :  { %v2128_v31 = vpop.permute.xlu1 %2127  }
 0x16e   :  { %3363 = vst.msk [vmem:[%s6168_s1 + $0x30] sm:$0xff] %vm2015_vm14, %v2128_v31  }
 0x170   :  { %v2105_v33 = vpop.permute.xlu0 %2104  }
 0x171   :  { %3358 = vst.msk [vmem:[%s6168_s1 + $0x10] sm:$0xff] %vm2015_vm14, %v2105_v33  }
 0x174   :  { %v2174_v4 = vpop.permute.xlu1 %2173  }
 0x175   :  { %3373 = vst.msk [vmem:[%s6168_s1 + $0x38] sm:$0xff] %vm2015_vm14, %v2174_v4  }
 0x178   :  { %v2151_v34 = vpop.permute.xlu0 %2150   ;;  %v2219_v35 = vpop.permute.xlu1 %2218  }
 0x179   :  { %3368 = vst.msk [vmem:[%s6168_s1 + $0x18] sm:$0xff] %vm2015_vm14, %v2151_v34  }
 0x17a   :  { %3382 = vst.msk [vmem:[%s6168_s1 + $0x20] sm:$0xff] %vm2198_vm15, %v2219_v35  }
 0x17c   :  { %v2197_v38 = vpop.permute.xlu0 %2196  }
 0x17d   :  { %2199 = vst.msk [vmem:[%s6168_s1] sm:$0xff] %vm2198_vm15, %v2197_v38  }
 0x17e   :  { %v2265_v6 = vpop.permute.xlu1 %2264  }
 0x17f   :  { %3392 = vst.msk [vmem:[%s6168_s1 + $0x28] sm:$0xff] %vm2198_vm15, %v2265_v6  }
 0x181   :  { %v2242_v36 = vpop.permute.xlu0 %2241  }
 0x182   :  { %3387 = vst.msk [vmem:[%s6168_s1 + $0x8] sm:$0xff] %vm2198_vm15, %v2242_v36  }
 0x184   :  { %v2311_v37 = vpop.permute.xlu1 %2310  }
 0x185   :  { %3402 = vst.msk [vmem:[%s6168_s1 + $0x30] sm:$0xff] %vm2198_vm15, %v2311_v37  }
 0x187   :  { %v2288_v39 = vpop.permute.xlu0 %2287  }
 0x188   :  { %3397 = vst.msk [vmem:[%s6168_s1 + $0x10] sm:$0xff] %vm2198_vm15, %v2288_v39  }
 0x18b   :  { %v2357_v40 = vpop.permute.xlu1 %2356  }
 0x18c   :  { %3412 = vst.msk [vmem:[%s6168_s1 + $0x38] sm:$0xff] %vm2198_vm15, %v2357_v40  }
 0x18f   :  { %v2334_v41 = vpop.permute.xlu0 %2333   ;;  %v2402_v16 = vpop.permute.xlu1 %2401  }
 0x190   :  { %3407 = vst.msk [vmem:[%s6168_s1 + $0x18] sm:$0xff] %vm2198_vm15, %v2334_v41  }
 0x191   :  { %3421 = vst.msk [vmem:[%s6168_s1 + $0x20] sm:$0xff] %vm2381_vm0, %v2402_v16  }
 0x193   :  { %v2380_v12 = vpop.permute.xlu0 %2379  }
 0x194   :  { %2382 = vst.msk [vmem:[%s6168_s1] sm:$0xff] %vm2381_vm0, %v2380_v12  }
 0x195   :  { %v2448_v42 = vpop.permute.xlu1 %2447  }
 0x196   :  { %3431 = vst.msk [vmem:[%s6168_s1 + $0x28] sm:$0xff] %vm2381_vm0, %v2448_v42  }
 0x198   :  { %v2425_v43 = vpop.permute.xlu0 %2424  }
 0x199   :  { %3426 = vst.msk [vmem:[%s6168_s1 + $0x8] sm:$0xff] %vm2381_vm0, %v2425_v43  }
 0x19b   :  { %v2494_v45 = vpop.permute.xlu1 %2493  }
 0x19c   :  { %3441 = vst.msk [vmem:[%s6168_s1 + $0x30] sm:$0xff] %vm2381_vm0, %v2494_v45   ;;  %v2471_v46 = vpop.permute.xlu0 %2470  }
 0x19d   :  { %3436 = vst.msk [vmem:[%s6168_s1 + $0x10] sm:$0xff] %vm2381_vm0, %v2471_v46  }
 0x19f   :  { %v2540_v47 = vpop.permute.xlu1 %2539  }
 0x1a0   :  { %3451 = vst.msk [vmem:[%s6168_s1 + $0x38] sm:$0xff] %vm2381_vm0, %v2540_v47  }
 0x1a2   :  { %v2517_v48 = vpop.permute.xlu0 %2516  }
 0x1a3   :  { %3446 = vst.msk [vmem:[%s6168_s1 + $0x18] sm:$0xff] %vm2381_vm0, %v2517_v48   ;;  %v2585_v50 = vpop.permute.xlu1 %2584  }
 0x1a4   :  { %3460 = vst.msk [vmem:[%s6168_s1 + $0x20] sm:$0xff] %vm2564_vm1, %v2585_v50  }
 0x1a6   :  { %v2563_v51 = vpop.permute.xlu0 %2562  }
 0x1a7   :  { %2565 = vst.msk [vmem:[%s6168_s1] sm:$0xff] %vm2564_vm1, %v2563_v51   ;;  %v2631_v52 = vpop.permute.xlu1 %2630  }
 0x1a8   :  { %3470 = vst.msk [vmem:[%s6168_s1 + $0x28] sm:$0xff] %vm2564_vm1, %v2631_v52  }
 0x1aa   :  { %v2608_v14 = vpop.permute.xlu0 %2607  }
 0x1ab   :  { %3465 = vst.msk [vmem:[%s6168_s1 + $0x8] sm:$0xff] %vm2564_vm1, %v2608_v14   ;;  %v2677_v53 = vpop.permute.xlu1 %2676  }
 0x1ac   :  { %3480 = vst.msk [vmem:[%s6168_s1 + $0x30] sm:$0xff] %vm2564_vm1, %v2677_v53  }
 0x1af   :  { %v2654_v55 = vpop.permute.xlu0 %2653  }
 0x1b0   :  { %3475 = vst.msk [vmem:[%s6168_s1 + $0x10] sm:$0xff] %vm2564_vm1, %v2654_v55  }
 0x1b3   :  { %v2723_v56 = vpop.permute.xlu1 %2722  }
 0x1b4   :  { %3490 = vst.msk [vmem:[%s6168_s1 + $0x38] sm:$0xff] %vm2564_vm1, %v2723_v56  }
 0x1b7   :  { %v2700_v44 = vpop.permute.xlu0 %2699   ;;  %v2768_v57 = vpop.permute.xlu1 %2767  }
 0x1b8   :  { %3485 = vst.msk [vmem:[%s6168_s1 + $0x18] sm:$0xff] %vm2564_vm1, %v2700_v44  }
 0x1b9   :  { %3499 = vst.msk [vmem:[%s6168_s1 + $0x20] sm:$0xff] %vm2747_vm2, %v2768_v57  }
 0x1bb   :  { %v2746_v58 = vpop.permute.xlu0 %2745   ;;  %v2814_v59 = vpop.permute.xlu1 %2813  }
 0x1bc   :  { %2748 = vst.msk [vmem:[%s6168_s1] sm:$0xff] %vm2747_vm2, %v2746_v58   ;;  %3509 = vst.msk [vmem:[%s6168_s1 + $0x28] sm:$0xff] %vm2747_vm2, %v2814_v59  }
 0x1bf   :  { %v2791_v62 = vpop.permute.xlu0 %2790   ;;  %v2860_v63 = vpop.permute.xlu1 %2859  }
 0x1c0   :  { %3504 = vst.msk [vmem:[%s6168_s1 + $0x8] sm:$0xff] %vm2747_vm2, %v2791_v62   ;;  %3519 = vst.msk [vmem:[%s6168_s1 + $0x30] sm:$0xff] %vm2747_vm2, %v2860_v63  }
 0x1c3   :  { %v2837_v0 = vpop.permute.xlu0 %2836  }
 0x1c4   :  { %3514 = vst.msk [vmem:[%s6168_s1 + $0x10] sm:$0xff] %vm2747_vm2, %v2837_v0  }
 0x1c6   :  { %v2906_v22 = vpop.permute.xlu1 %2905  }
 0x1c7   :  { %3529 = vst.msk [vmem:[%s6168_s1 + $0x38] sm:$0xff] %vm2747_vm2, %v2906_v22  }
 0x1ca   :  { %v2883_v49 = vpop.permute.xlu0 %2882  }
 0x1cb   :  { %3524 = vst.msk [vmem:[%s6168_s1 + $0x18] sm:$0xff] %vm2747_vm2, %v2883_v49  }

// kernel: tile.13
= control target key start
LH: loop header
LB: loop body
LE: loop exit
PB: predicated region body
PF: predicated region fallthrough
CT: control target
= control target key end

     0   :  { %s40_s0 = inlined_call_operand.vmem [shape: f32[4], index: 0, kind: input, shape index: {}]   ;;  %s41_s1 = inlined_call_operand.vmem [shape: f32[32,4], index: 1, kind: output, shape index: {}]  }
   0x1   :  { %v4_v0 = vld [vmem:[%s40_s0] ss:$0 sm:$0xff] }
   0x2   :  { %5 = vst [vmem:[%s41_s1] sm:$0xff] %v4_v0  ;;  %12 = vst [vmem:[%s41_s1 + $0x8] sm:$0xff] %v4_v0 }
   0x3   :  { %13 = vst [vmem:[%s41_s1 + $0x10] sm:$0xff] %v4_v0  ;;  %14 = vst [vmem:[%s41_s1 + $0x18] sm:$0xff] %v4_v0 }

// kernel: tile.14
= control target key start
LH: loop header
LB: loop body
LE: loop exit
PB: predicated region body
PF: predicated region fallthrough
CT: control target
= control target key end

     0   :  { %s259_s10 = smov 124   ;;  %s260_s11 = smov 116   ;;  %vm3_vm0 = vcmask 31744   ;;  %vm9_vm1 = vcmask 1048544   ;;  %vm15_vm2 = vcmask 1015744   ;;  %vm21_vm3 = vcmask 982944   ;;  %s399_s0 = inlined_call_operand.vmem [shape: f32[32,4], index: 0, kind: input, shape index: {}]   ;;  %s400_s1 = inlined_call_operand.vmem [shape: f32[1,128], index: 1, kind: output, shape index: {}]  }
   0x1   :  { %v197_v0 = vld [vmem:[%s399_s0 + $0x1f] sm:$0x1]   ;;  %v199_v1 = vld [vmem:[%s399_s0 + $0x1d] sm:$0x1]   ;;  %v198_v2 = vld [vmem:[%s399_s0 + $0x1e] sm:$0x1]  }
   0x2   :  { %7 = vrot.lane.b32.xlu0 %v197_v0, %s259_s10  ;;  %19 = vrot.lane.b32.xlu1 %v199_v1, %s260_s11  ;;  %v200_v3 = vld [vmem:[%s399_s0 + $0x1c] sm:$0x1]   ;;  %s261_s16 = smov 120   ;;  %s262_s17 = smov 112   ;;  %v201_v4 = vld [vmem:[%s399_s0 + $0x1b] sm:$0x1]  }
   0x3   :  { %v202_v5 = vld [vmem:[%s399_s0 + $0x1a] sm:$0x1]   ;;  %s263_s22 = smov 108   ;;  %s264_s23 = smov 104   ;;  %v203_v6 = vld [vmem:[%s399_s0 + $0x19] sm:$0x1]  }
   0x4   :  { %v204_v7 = vld [vmem:[%s399_s0 + $0x18] sm:$0x1]   ;;  %s265_s28 = smov 100   ;;  %s266_s29 = smov 96   ;;  %v205_v8 = vld [vmem:[%s399_s0 + $0x17] sm:$0x1]  }
   0x5   :  { %v206_v9 = vld [vmem:[%s399_s0 + $0x16] sm:$0x1]   ;;  %v2_v10 = vld [vmem:[%s399_s0] sm:$0x1]   ;;  %s267_s7 = smov 92   ;;  %s268_s8 = smov 88  }
   0x6   :  { %13 = vrot.lane.b32.xlu0 %v198_v2, %s261_s16  ;;  %25 = vrot.lane.b32.xlu1 %v200_v3, %s262_s17  ;;  %4 = vst.msk [vmem:[#allocation0] sm:$0x1] %vm3_vm0, %v2_v10   ;;  %v207_v11 = vld [vmem:[%s399_s0 + $0x15] sm:$0x1]   ;;  %v208_v12 = vld [vmem:[%s399_s0 + $0x14] sm:$0x1]  }
   0x7   :  { %s269_s13 = smov 84   ;;  %s270_s14 = smov 80   ;;  %v209_v13 = vld [vmem:[%s399_s0 + $0x13] sm:$0x1]   ;;  %v210_v14 = vld [vmem:[%s399_s0 + $0x12] sm:$0x1]  }
   0x8   :  { %s271_s19 = smov 76   ;;  %s272_s20 = smov 72   ;;  %v211_v15 = vld [vmem:[%s399_s0 + $0x11] sm:$0x1]   ;;  %v212_v16 = vld [vmem:[%s399_s0 + $0x10] sm:$0x1]  }
   0x9   :  { %s273_s25 = smov 68   ;;  %s274_s26 = smov 64   ;;  %v213_v17 = vld [vmem:[%s399_s0 + $0xf] sm:$0x1]   ;;  %v214_v18 = vld [vmem:[%s399_s0 + $0xe] sm:$0x1]  }
   0xa   :  { %31 = vrot.lane.b32.xlu0 %v201_v4, %s263_s22  ;;  %37 = vrot.lane.b32.xlu1 %v202_v5, %s264_s23  ;;  %s275_s2 = smov 60   ;;  %s276_s3 = smov 56   ;;  %v215_v19 = vld [vmem:[%s399_s0 + $0xd] sm:$0x1]   ;;  %v216_v20 = vld [vmem:[%s399_s0 + $0xc] sm:$0x1]  }
   0xb   :  { %s278_s9 = smov 48   ;;  %v217_v21 = vld [vmem:[%s399_s0 + $0xb] sm:$0x1]   ;;  %v218_v22 = vld [vmem:[%s399_s0 + $0xa] sm:$0x1]   ;;  %s280_s15 = smov 40  }
   0xc   :  { %v219_v23 = vld [vmem:[%s399_s0 + $0x9] sm:$0x1]   ;;  %v220_v24 = vld [vmem:[%s399_s0 + $0x8] sm:$0x1]   ;;  %s282_s21 = smov 32   ;;  %s284_s27 = smov 24  }
   0xd   :  { %v221_v25 = vld [vmem:[%s399_s0 + $0x7] sm:$0x1]   ;;  %v222_v26 = vld [vmem:[%s399_s0 + $0x6] sm:$0x1]   ;;  %v223_v27 = vld [vmem:[%s399_s0 + $0x5] sm:$0x1]  }
   0xe   :  { %43 = vrot.lane.b32.xlu0 %v203_v6, %s265_s28  ;;  %49 = vrot.lane.b32.xlu1 %v204_v7, %s266_s29  ;;  %v224_v28 = vld [vmem:[%s399_s0 + $0x4] sm:$0x1]   ;;  %s286_s4 = smov 16   ;;  %v225_v29 = vld [vmem:[%s399_s0 + $0x3] sm:$0x1]   ;;  %s288_s10 = smov 8  }
   0xf   :  { %v226_v30 = vld [vmem:[%s399_s0 + $0x2] sm:$0x1]   ;;  %v227_v31 = vld [vmem:[%s399_s0 + $0x1] sm:$0x1]   ;;  %s289_s0 = smov 4   ;;  %vm27_vm4 = vcmask 950144  }
  0x10   :  { %vm33_vm5 = vcmask 917344   ;;  %vm39_vm6 = vcmask 884544   ;;  %vm45_vm7 = vcmask 851744   ;;  %vm51_vm8 = vcmask 818944  }
  0x11   :  { %vm57_vm9 = vcmask 786144   ;;  %vm63_vm10 = vcmask 753344   ;;  %vm69_vm11 = vcmask 720544   ;;  %vm75_vm12 = vcmask 687744  }
  0x12   :  { %55 = vrot.lane.b32.xlu0 %v205_v8, %s267_s7  ;;  %61 = vrot.lane.b32.xlu1 %v206_v9, %s268_s8  ;;  %s277_s8 = smov 52   ;;  %vm81_vm13 = vcmask 654944   ;;  %vm87_vm14 = vcmask 622144   ;;  %vm93_vm15 = vcmask 589344   ;;  %vm99_vm0 = vcmask 556544  }
  0x16   :  { %67 = vrot.lane.b32.xlu0 %v207_v11, %s269_s13  ;;  %73 = vrot.lane.b32.xlu1 %v208_v12, %s270_s14  ;;  %s279_s14 = smov 44  }
  0x1a   :  { %79 = vrot.lane.b32.xlu0 %v209_v13, %s271_s19  ;;  %85 = vrot.lane.b32.xlu1 %v210_v14, %s272_s20  ;;  %s281_s20 = smov 36  }
  0x1e   :  { %91 = vrot.lane.b32.xlu0 %v211_v15, %s273_s25  ;;  %97 = vrot.lane.b32.xlu1 %v212_v16, %s274_s26  ;;  %s283_s26 = smov 28  }
  0x22   :  { %103 = vrot.lane.b32.xlu0 %v213_v17, %s275_s2  ;;  %109 = vrot.lane.b32.xlu1 %v214_v18, %s276_s3  ;;  %s285_s3 = smov 20  }
  0x26   :  { %115 = vrot.lane.b32.xlu0 %v215_v19, %s277_s8  ;;  %121 = vrot.lane.b32.xlu1 %v216_v20, %s278_s9  ;;  %s287_s9 = smov 12  }
  0x2a   :  { %127 = vrot.lane.b32.xlu0 %v217_v21, %s279_s14  ;;  %133 = vrot.lane.b32.xlu1 %v218_v22, %s280_s15 }
  0x2e   :  { %139 = vrot.lane.b32.xlu0 %v219_v23, %s281_s20  ;;  %145 = vrot.lane.b32.xlu1 %v220_v24, %s282_s21 }
  0x32   :  { %151 = vrot.lane.b32.xlu0 %v221_v25, %s283_s26  ;;  %157 = vrot.lane.b32.xlu1 %v222_v26, %s284_s27 }
  0x36   :  { %163 = vrot.lane.b32.xlu0 %v223_v27, %s285_s3  ;;  %169 = vrot.lane.b32.xlu1 %v224_v28, %s286_s4 }
  0x3a   :  { %175 = vrot.lane.b32.xlu0 %v225_v29, %s287_s9  ;;  %181 = vrot.lane.b32.xlu1 %v226_v30, %s288_s10 }
  0x3e   :  { %187 = vrot.lane.b32.xlu0 %v227_v31, %s289_s0 }
  0x74   :  { %v8_v32 = vpop.permute.xlu0 %7   ;;  %v20_v33 = vpop.permute.xlu1 %19  }
  0x75   :  { %10 = vst.msk [vmem:[#allocation0] sm:$0x1] %vm9_vm1, %v8_v32   ;;  %vm105_vm1 = vcmask 523744  }
  0x78   :  { %v14_v34 = vpop.permute.xlu0 %13   ;;  %v26_v35 = vpop.permute.xlu1 %25  }
  0x79   :  { %16 = vst.msk [vmem:[#allocation0] sm:$0x1] %vm15_vm2, %v14_v34   ;;  %vm111_vm2 = vcmask 490944  }
  0x7a   :  { %22 = vst.msk [vmem:[#allocation0] sm:$0x1] %vm21_vm3, %v20_v33   ;;  %vm117_vm3 = vcmask 458144  }
  0x7b   :  { %28 = vst.msk [vmem:[#allocation0] sm:$0x1] %vm27_vm4, %v26_v35   ;;  %vm123_vm4 = vcmask 425344  }
  0x7c   :  { %v32_v36 = vpop.permute.xlu0 %31   ;;  %v38_v37 = vpop.permute.xlu1 %37  }
  0x7d   :  { %34 = vst.msk [vmem:[#allocation0] sm:$0x1] %vm33_vm5, %v32_v36   ;;  %vm129_vm5 = vcmask 392544  }
  0x7e   :  { %40 = vst.msk [vmem:[#allocation0] sm:$0x1] %vm39_vm6, %v38_v37   ;;  %vm135_vm6 = vcmask 359744  }
  0x80   :  { %v44_v38 = vpop.permute.xlu0 %43   ;;  %v50_v39 = vpop.permute.xlu1 %49  }
  0x81   :  { %46 = vst.msk [vmem:[#allocation0] sm:$0x1] %vm45_vm7, %v44_v38   ;;  %vm141_vm7 = vcmask 326944  }
  0x82   :  { %52 = vst.msk [vmem:[#allocation0] sm:$0x1] %vm51_vm8, %v50_v39   ;;  %vm147_vm8 = vcmask 294144  }
  0x84   :  { %v56_v40 = vpop.permute.xlu0 %55   ;;  %v62_v41 = vpop.permute.xlu1 %61  }
  0x85   :  { %58 = vst.msk [vmem:[#allocation0] sm:$0x1] %vm57_vm9, %v56_v40   ;;  %vm153_vm9 = vcmask 261344  }
  0x86   :  { %64 = vst.msk [vmem:[#allocation0] sm:$0x1] %vm63_vm10, %v62_v41   ;;  %vm159_vm10 = vcmask 228544  }
  0x88   :  { %v68_v42 = vpop.permute.xlu0 %67   ;;  %v74_v43 = vpop.permute.xlu1 %73  }
  0x89   :  { %70 = vst.msk [vmem:[#allocation0] sm:$0x1] %vm69_vm11, %v68_v42   ;;  %vm165_vm11 = vcmask 195744  }
  0x8a   :  { %76 = vst.msk [vmem:[#allocation0] sm:$0x1] %vm75_vm12, %v74_v43   ;;  %vm171_vm12 = vcmask 162944  }
  0x8c   :  { %v80_v44 = vpop.permute.xlu0 %79   ;;  %v86_v45 = vpop.permute.xlu1 %85  }
  0x8d   :  { %82 = vst.msk [vmem:[#allocation0] sm:$0x1] %vm81_vm13, %v80_v44   ;;  %vm177_vm13 = vcmask 130144  }
  0x8e   :  { %88 = vst.msk [vmem:[#allocation0] sm:$0x1] %vm87_vm14, %v86_v45   ;;  %vm183_vm14 = vcmask 97344  }
  0x90   :  { %v92_v46 = vpop.permute.xlu0 %91   ;;  %v98_v47 = vpop.permute.xlu1 %97  }
  0x91   :  { %94 = vst.msk [vmem:[#allocation0] sm:$0x1] %vm93_vm15, %v92_v46   ;;  %vm189_vm15 = vcmask 64544  }
  0x92   :  { %100 = vst.msk [vmem:[#allocation0] sm:$0x1] %vm99_vm0, %v98_v47  }
  0x94   :  { %v104_v48 = vpop.permute.xlu0 %103   ;;  %v110_v49 = vpop.permute.xlu1 %109  }
  0x95   :  { %106 = vst.msk [vmem:[#allocation0] sm:$0x1] %vm105_vm1, %v104_v48  }
  0x96   :  { %112 = vst.msk [vmem:[#allocation0] sm:$0x1] %vm111_vm2, %v110_v49  }
  0x98   :  { %v116_v50 = vpop.permute.xlu0 %115   ;;  %v122_v51 = vpop.permute.xlu1 %121  }
  0x99   :  { %118 = vst.msk [vmem:[#allocation0] sm:$0x1] %vm117_vm3, %v116_v50  }
  0x9a   :  { %124 = vst.msk [vmem:[#allocation0] sm:$0x1] %vm123_vm4, %v122_v51  }
  0x9c   :  { %v128_v52 = vpop.permute.xlu0 %127   ;;  %v134_v53 = vpop.permute.xlu1 %133  }
  0x9d   :  { %130 = vst.msk [vmem:[#allocation0] sm:$0x1] %vm129_vm5, %v128_v52  }
  0x9e   :  { %136 = vst.msk [vmem:[#allocation0] sm:$0x1] %vm135_vm6, %v134_v53  }
  0xa0   :  { %v140_v54 = vpop.permute.xlu0 %139   ;;  %v146_v55 = vpop.permute.xlu1 %145  }
  0xa1   :  { %142 = vst.msk [vmem:[#allocation0] sm:$0x1] %vm141_vm7, %v140_v54  }
  0xa2   :  { %148 = vst.msk [vmem:[#allocation0] sm:$0x1] %vm147_vm8, %v146_v55  }
  0xa4   :  { %v152_v56 = vpop.permute.xlu0 %151   ;;  %v158_v57 = vpop.permute.xlu1 %157  }
  0xa5   :  { %154 = vst.msk [vmem:[#allocation0] sm:$0x1] %vm153_vm9, %v152_v56  }
  0xa6   :  { %160 = vst.msk [vmem:[#allocation0] sm:$0x1] %vm159_vm10, %v158_v57  }
  0xa8   :  { %v164_v58 = vpop.permute.xlu0 %163   ;;  %v170_v59 = vpop.permute.xlu1 %169  }
  0xa9   :  { %166 = vst.msk [vmem:[#allocation0] sm:$0x1] %vm165_vm11, %v164_v58  }
  0xaa   :  { %172 = vst.msk [vmem:[#allocation0] sm:$0x1] %vm171_vm12, %v170_v59  }
  0xac   :  { %v176_v60 = vpop.permute.xlu0 %175   ;;  %v182_v61 = vpop.permute.xlu1 %181  }
  0xad   :  { %178 = vst.msk [vmem:[#allocation0] sm:$0x1] %vm177_vm13, %v176_v60  }
  0xae   :  { %184 = vst.msk [vmem:[#allocation0] sm:$0x1] %vm183_vm14, %v182_v61  }
  0xb0   :  { %v188_v62 = vpop.permute.xlu0 %187  }
  0xb1   :  { %190 = vst.msk [vmem:[#allocation0] sm:$0x1] %vm189_vm15, %v188_v62  }
  0xb8   :  { %v194_v63 = vld [vmem:[#allocation0] sm:$0x1] }
  0xb9   :  { %196 = vst [vmem:[%s400_s1] sm:$0x1] %v194_v63 }

// kernel: residual_block.1
= control target key start
LH: loop header
LB: loop body
LE: loop exit
PB: predicated region body
PF: predicated region fallthrough
CT: control target
= control target key end

     0   :  { %v1438_v0 = vmov 0.0|0.0   ;;  %vm1439_vm0 = vmmov 0   ;;  %v1440_v8 = vmov 0.0   ;;  %v1441_v12 = vmov 0   ;;  %s1443_s30 = smov 8   ;;  %s1444_s7 = smov 16   ;;  %s2011_s1 = inlined_call_operand.vmem [shape: f32[3,128,128], index: 1, kind: input, shape index: {}]   ;;  %s2012_s5 = inlined_call_operand.vmem [shape: f32[24,1], index: 5, kind: input, shape index: {}]   ;;  %s2013_s0 = inlined_call_operand.vmem [shape: f32[24,128], index: 0, kind: input, shape index: {}]   ;;  %s2014_s2 = inlined_call_operand.vmem [shape: f32[3,128,128], index: 2, kind: input, shape index: {}]   ;;  %s2015_s3 = inlined_call_operand.vmem [shape: f32[1,128], index: 3, kind: input, shape index: {}]   ;;  %s2016_s4 = inlined_call_operand.vmem [shape: f32[1,128], index: 4, kind: input, shape index: {}]   ;;  %s2017_s6 = inlined_call_operand.vmem [shape: f32[24,128], index: 6, kind: output, shape index: {}]  }
   0x1   :  { %1279 = vmatprep.subr.bf16.mxu0 %v1438_v0  ;;  %v30_v1 = vld [vmem:[%s2011_s1] sm:$0xff]  ;;  %v31_v2 = vld [vmem:[%s2011_s1 + $0x8] sm:$0xff]  ;;  %1303 = vmatprep.subr.bf16.mxu1 %v1438_v0  ;;  %v32_v6 = vld [vmem:[%s2011_s1 + $0x10] sm:$0xff]  ;;  %s1445_s11 = smov 32   ;;  %s1446_s20 = smov 64  }
   0x2   :  { %v853_v3 = vld [vmem:[%s2011_s1 + $0x80] sm:$0xff]  ;;  %v1280_v4 = vpack.c.bf16 %v31_v2, %v30_v1  ;;  %v854_v5 = vld [vmem:[%s2011_s1 + $0x88] sm:$0xff]  ;;  %v33_v7 = vld [vmem:[%s2011_s1 + $0x18] sm:$0xff]  ;;  %1065 = vmatprep.mubr.msk.f32.mxu0 %vm1439_vm0, %v1440_v8  ;;  %1106 = vmatprep.mubr.msk.f32.mxu1 %vm1439_vm0, %v1440_v8 }
   0x3   :  { %v1304_v9 = vpack.c.bf16 %v854_v5, %v853_v3  ;;  %v855_v10 = vld [vmem:[%s2011_s1 + $0x90] sm:$0xff]  ;;  %v856_v11 = vld [vmem:[%s2011_s1 + $0x98] sm:$0xff]  ;;  %1432 = vset.pattern.permute.xlu0 %v1441_v12  ;;  %1433 = vset.pattern.permute.xlu1 %v1441_v12  ;;  %v1283_v13 = vpack.c.bf16 %v33_v7, %v32_v6  ;;  %v34_v15 = vld [vmem:[%s2011_s1 + $0x20] sm:$0xff] }
   0x4   :  { %1281 = vmatpush3.bf16.msra.mxu0 %v1280_v4  ;;  %v1307_v14 = vpack.c.bf16 %v856_v11, %v855_v10  ;;  %v35_v16 = vld [vmem:[%s2011_s1 + $0x28] sm:$0xff]  ;;  %v857_v17 = vld [vmem:[%s2011_s1 + $0xa0] sm:$0xff]  ;;  %v36_v21 = vld [vmem:[%s2011_s1 + $0x30] sm:$0xff] }
   0x5   :  { %1282 = vmatprep.subr.bf16.mxu0 %v1438_v0  ;;  %1305 = vmatpush3.bf16.msra.mxu1 %v1304_v9  ;;  %v858_v18 = vld [vmem:[%s2011_s1 + $0xa8] sm:$0xff]  ;;  %v1286_v19 = vpack.c.bf16 %v35_v16, %v34_v15  ;;  %v37_v22 = vld [vmem:[%s2011_s1 + $0x38] sm:$0xff]  ;;  %v859_v23 = vld [vmem:[%s2011_s1 + $0xb0] sm:$0xff] }
   0x6   :  { %1306 = vmatprep.subr.bf16.mxu1 %v1438_v0  ;;  %v1310_v20 = vpack.c.bf16 %v858_v18, %v857_v17  ;;  %v860_v24 = vld [vmem:[%s2011_s1 + $0xb8] sm:$0xff]  ;;  %v1289_v25 = vpack.c.bf16 %v37_v22, %v36_v21  ;;  %v38_v27 = vld [vmem:[%s2011_s1 + $0x40] sm:$0xff]  ;;  %v39_v28 = vld [vmem:[%s2011_s1 + $0x48] sm:$0xff] }
   0x7   :  { %v1313_v26 = vpack.c.bf16 %v860_v24, %v859_v23  ;;  %v861_v29 = vld [vmem:[%s2011_s1 + $0xc0] sm:$0xff]  ;;  %v862_v30 = vld [vmem:[%s2011_s1 + $0xc8] sm:$0xff]  ;;  %v1292_v31 = vpack.c.bf16 %v39_v28, %v38_v27  ;;  %v40_v33 = vld [vmem:[%s2011_s1 + $0x50] sm:$0xff] }
   0x8   :  { %1284 = vmatpush3.bf16.msra.mxu0 %v1283_v13  ;;  %v1316_v32 = vpack.c.bf16 %v862_v30, %v861_v29  ;;  %v41_v34 = vld [vmem:[%s2011_s1 + $0x58] sm:$0xff]  ;;  %v863_v35 = vld [vmem:[%s2011_s1 + $0xd0] sm:$0xff]  ;;  %v26_v37 = vld [vmem:[%s2012_s5] sm:$0xff] }
   0x9   :  { %1285 = vmatprep.subr.bf16.mxu0 %v1438_v0  ;;  %1308 = vmatpush3.bf16.msra.mxu1 %v1307_v14  ;;  %v864_v36 = vld [vmem:[%s2011_s1 + $0xd8] sm:$0xff]  ;;  %v28_v38 = vld [vmem:[%s2012_s5 + $0x10] sm:$0xff]  ;;  %v1295_v39 = vpack.c.bf16 %v41_v34, %v40_v33  ;;  %v27_v40 = vld [vmem:[%s2012_s5 + $0x8] sm:$0xff] }
   0xa   :  { %1309 = vmatprep.subr.bf16.mxu1 %v1438_v0  ;;  %347 = vperm.xlu0 %1432, %v26_v37   ;;  %v1319_v41 = vpack.c.bf16 %v864_v36, %v863_v35  ;;  %v42_v42 = vld [vmem:[%s2011_s1 + $0x60] sm:$0xff]  ;;  %v43_v43 = vld [vmem:[%s2011_s1 + $0x68] sm:$0xff]  ;;  %v44_v48 = vld [vmem:[%s2011_s1 + $0x70] sm:$0xff] }
   0xb   :  { %357 = vperm.xlu1 %1433, %v28_v38   ;;  %v865_v44 = vld [vmem:[%s2011_s1 + $0xe0] sm:$0xff]  ;;  %v866_v45 = vld [vmem:[%s2011_s1 + $0xe8] sm:$0xff]  ;;  %v1298_v46 = vpack.c.bf16 %v43_v43, %v42_v42  ;;  %v45_v49 = vld [vmem:[%s2011_s1 + $0x78] sm:$0xff] }
   0xc   :  { %1287 = vmatpush3.bf16.msra.mxu0 %v1286_v19  ;;  %v1322_v47 = vpack.c.bf16 %v866_v45, %v865_v44  ;;  %v867_v50 = vld [vmem:[%s2011_s1 + $0xf0] sm:$0xff]  ;;  %v868_v51 = vld [vmem:[%s2011_s1 + $0xf8] sm:$0xff]  ;;  %v1301_v52 = vpack.c.bf16 %v45_v49, %v44_v48  ;;  %v869_v54 = vld [vmem:[%s2011_s1 + $0x100] sm:$0xff]  ;;  %v129_v19 = vlaneseq }
   0xd   :  { %1288 = vmatprep.subr.bf16.mxu0 %v1438_v0  ;;  %1311 = vmatpush3.bf16.msra.mxu1 %v1310_v20  ;;  %v1325_v53 = vpack.c.bf16 %v868_v51, %v867_v50  ;;  %v870_v55 = vld [vmem:[%s2011_s1 + $0x108] sm:$0xff]  ;;  %v1616_v56 = vld [vmem:[%s2013_s0] sm:$0xff]  ;;  %v871_v58 = vld [vmem:[%s2011_s1 + $0x110] sm:$0xff] }
   0xe   :  { %1312 = vmatprep.subr.bf16.mxu1 %v1438_v0  ;;  %352 = vperm.xlu0 %1432, %v27_v40   ;;  %v1328_v57 = vpack.c.bf16 %v870_v55, %v869_v54  ;;  %v872_v59 = vld [vmem:[%s2011_s1 + $0x118] sm:$0xff]  ;;  %v1632_v60 = vld [vmem:[%s2013_s0 + $0x8] sm:$0xff]  ;;  %v873_v62 = vld [vmem:[%s2011_s1 + $0x120] sm:$0xff]  ;;  %v1707_v21 = vshrl.u32 %v129_v19, 7 }
   0xf   :  { %v1331_v61 = vpack.c.bf16 %v872_v59, %v871_v58  ;;  %v874_v63 = vld [vmem:[%s2011_s1 + $0x128] sm:$0xff]  ;;  %v1650_v1 = vld [vmem:[%s2013_s0 + $0x10] sm:$0xff]  ;;  %v876_v4 = vld [vmem:[%s2011_s1 + $0x138] sm:$0xff] }
  0x10   :  { %1290 = vmatpush3.bf16.msra.mxu0 %v1289_v25  ;;  %v1334_v2 = vpack.c.bf16 %v874_v63, %v873_v62  ;;  %v875_v3 = vld [vmem:[%s2011_s1 + $0x130] sm:$0xff]  ;;  %v877_v6 = vld [vmem:[%s2011_s1 + $0x140] sm:$0xff]  ;;  %v878_v7 = vld [vmem:[%s2011_s1 + $0x148] sm:$0xff]  ;;  %vm131_vm1 = vcmp.lt.s32.totalorder %v1707_v21, 1  ;;  %vm338_vm2 = vcmp.lt.s32.totalorder %v1707_v21, 7 }
  0x11   :  { %1291 = vmatprep.subr.bf16.mxu0 %v1438_v0  ;;  %1314 = vmatpush3.bf16.msra.mxu1 %v1313_v26  ;;  %v1337_v5 = vpack.c.bf16 %v876_v4, %v875_v3  ;;  %v1340_v9 = vpack.c.bf16 %v878_v7, %v877_v6  ;;  %v879_v10 = vld [vmem:[%s2011_s1 + $0x150] sm:$0xff]  ;;  %v880_v11 = vld [vmem:[%s2011_s1 + $0x158] sm:$0xff]  ;;  %v881_v13 = vld [vmem:[%s2011_s1 + $0x160] sm:$0xff] }
  0x12   :  { %1315 = vmatprep.subr.bf16.mxu1 %v1438_v0  ;;  %v1343_v12 = vpack.c.bf16 %v880_v11, %v879_v10  ;;  %v882_v14 = vld [vmem:[%s2011_s1 + $0x168] sm:$0xff]  ;;  %v883_v16 = vld [vmem:[%s2011_s1 + $0x170] sm:$0xff]  ;;  %v884_v17 = vld [vmem:[%s2011_s1 + $0x178] sm:$0xff]  ;;  %s1442_s1 = smov 4  }
  0x13   :  { %v1346_v15 = vpack.c.bf16 %v882_v14, %v881_v13  ;;  %v1349_v18 = vpack.c.bf16 %v884_v17, %v883_v16 }
  0x14   :  { %1293 = vmatpush3.bf16.msra.mxu0 %v1292_v31 }
  0x15   :  { %1294 = vmatprep.subr.bf16.mxu0 %v1438_v0  ;;  %1317 = vmatpush3.bf16.msra.mxu1 %v1316_v32 }
  0x16   :  { %1318 = vmatprep.subr.bf16.mxu1 %v1438_v0 }
  0x18   :  { %1296 = vmatpush3.bf16.msra.mxu0 %v1295_v39 }
  0x19   :  { %1297 = vmatprep.subr.bf16.mxu0 %v1438_v0  ;;  %1320 = vmatpush3.bf16.msra.mxu1 %v1319_v41 }
  0x1a   :  { %1321 = vmatprep.subr.bf16.mxu1 %v1438_v0 }
  0x1c   :  { %1299 = vmatpush3.bf16.msra.mxu0 %v1298_v46 }
  0x1d   :  { %1300 = vmatprep.subr.bf16.mxu0 %v1438_v0  ;;  %1323 = vmatpush3.bf16.msra.mxu1 %v1322_v47 }
  0x1e   :  { %1324 = vmatprep.subr.bf16.mxu1 %v1438_v0 }
  0x20   :  { %1302 = vmatpush3.bf16.msra.mxu0 %v1301_v52 }
  0x21   :  { %1326 = vmatpush3.bf16.msra.mxu1 %v1325_v53  ;;  %1327 = vmatprep.subr.bf16.mxu0 %v1438_v0 }
  0x22   :  { %1351 = vmatprep.subr.bf16.mxu1 %v1438_v0 }
  0x23   :  { %1066 = vmatmul.mubr.f32.vlgmr.msra.gmra.mrb[0].mxu0 %v1616_v56 }
  0x24   :  { %1329 = vmatpush3.bf16.msra.mxu0 %v1328_v57  ;;  %1068 = vmatprep.mubr.msk.f32.mxu0 %vm1439_vm0, %v1440_v8 }
  0x25   :  { %1107 = vmatmul.mubr.f32.vlgmr.msra.gmra.mrb[0].mxu1 %v1616_v56  ;;  %1330 = vmatprep.subr.bf16.mxu0 %v1438_v0 }
  0x26   :  { %1109 = vmatprep.mubr.msk.f32.mxu1 %vm1439_vm0, %v1440_v8 }
  0x27   :  { %1069 = vmatmul.mubr.f32.gmra.mrb[2].mxu0 %v1632_v60 }
  0x28   :  { %1332 = vmatpush3.bf16.msra.mxu0 %v1331_v61  ;;  %1071 = vmatprep.mubr.msk.f32.mxu0 %vm1439_vm0, %v1440_v8 }
  0x29   :  { %1110 = vmatmul.mubr.f32.gmra.mrb[2].mxu1 %v1632_v60  ;;  %1333 = vmatprep.subr.bf16.mxu0 %v1438_v0 }
  0x2a   :  { %1112 = vmatprep.mubr.msk.f32.mxu1 %vm1439_vm0, %v1440_v8 }
  0x2b   :  { %1072 = vmatmul.mubr.f32.gmra.mrb[4].mxu0 %v1650_v1 }
  0x2c   :  { %1335 = vmatpush3.bf16.msra.mxu0 %v1334_v2  ;;  %1147 = vmatprep.mubr.msk.f32.mxu0 %vm1439_vm0, %v1440_v8 }
  0x2d   :  { %1336 = vmatprep.subr.bf16.mxu0 %v1438_v0  ;;  %1113 = vmatmul.mubr.f32.gmra.mrb[4].mxu1 %v1650_v1 }
  0x2e   :  { %1188 = vmatprep.mubr.msk.f32.mxu1 %vm1439_vm0, %v1440_v8 }
  0x30   :  { %1338 = vmatpush3.bf16.msra.mxu0 %v1337_v5 }
  0x31   :  { %1339 = vmatprep.subr.bf16.mxu0 %v1438_v0 }
  0x34   :  { %1341 = vmatpush3.bf16.msra.mxu0 %v1340_v9 }
  0x35   :  { %1342 = vmatprep.subr.bf16.mxu0 %v1438_v0 }
  0x38   :  { %1344 = vmatpush3.bf16.msra.mxu0 %v1343_v12 }
  0x39   :  { %1345 = vmatprep.subr.bf16.mxu0 %v1438_v0 }
  0x3c   :  { %1347 = vmatpush3.bf16.msra.mxu0 %v1346_v15 }
  0x3d   :  { %1348 = vmatprep.subr.bf16.mxu0 %v1438_v0 }
  0x40   :  { %1350 = vmatpush3.bf16.msra.mxu0 %v1349_v18 }
  0x41   :  { %1375 = vmatprep.subr.bf16.mxu0 %v1438_v0 }
  0x43   :  { %1148 = vmatmul.mubr.f32.vlgmr.msra.gmra.mrb[6].mxu0 %v1616_v56 }
  0x44   :  { %1150 = vmatprep.mubr.msk.f32.mxu0 %vm1439_vm0, %v1440_v8 }
  0x47   :  { %1151 = vmatmul.mubr.f32.gmra.mrb[8].mxu0 %v1632_v60 }
  0x48   :  { %1153 = vmatprep.mubr.msk.f32.mxu0 %vm1439_vm0, %v1440_v8 }
  0x4b   :  { %1154 = vmatmul.mubr.f32.gmra.mrb[10].mxu0 %v1650_v1 }
  0x4c   :  { %1229 = vmatprep.mubr.msk.f32.mxu0 %vm1439_vm0, %v1440_v8 }
  0x89   :  { %v1719_v49 = vpop.permute.xlu0 %347 }
  0x8a   :  { %v1725_v57 = vpop.permute.xlu1 %357 }
  0x8d   :  { %v1730_v62 = vpop.permute.xlu0 %352 }
  0xf6   :  { %v112_v20 = vpop.f32.mrb[0].mxu0 }
  0xf7   :  { %v1067_v22 = vpop.f32.mrb[1].mxu0  ;;  %v126_v26 = vrot.slane %v112_v20, 7 }
  0xf8   :  { %v221_v23 = vpop.f32.mrb[0].mxu1 }
  0xf9   :  { %v1108_v24 = vpop.f32.mrb[1].mxu1 }
  0xfa   :  { %v117_v25 = vpop.f32.mrb[2].mxu0 }
  0xfb   :  { %v127_v27 = vrot.slane %v117_v25, 7  ;;  %v1070_v28 = vpop.f32.mrb[3].mxu0 }
  0xfc   :  { %v226_v29 = vpop.f32.mrb[2].mxu1 }
  0xfd   :  { %v133_v30 = vsel %vm131_vm1, %v126_v26, %v127_v27  ;;  %v1111_v31 = vpop.f32.mrb[3].mxu1 }
  0xfe   :  { %v236_v32 = vadd.f32 %v226_v29, %v133_v30  ;;  %v122_v33 = vpop.f32.mrb[4].mxu0 }
  0xff   :  { %v128_v34 = vrot.slane %v122_v33, 7  ;;  %v1073_v35 = vpop.f32.mrb[5].mxu0  ;;  %v449_v33 = vld [vmem:[%s2014_s2 + $0x8] sm:$0xff] }
 0x100   :  { %v231_v36 = vpop.f32.mrb[4].mxu1 }
 0x101   :  { %v134_v37 = vsel %vm131_vm1, %v128_v34, %v126_v26  ;;  %v132_v38 = vsel %vm131_vm1, %v127_v27, %v128_v34  ;;  %v1114_v39 = vpop.f32.mrb[5].mxu1 }
 0x102   :  { %v235_v40 = vadd.f32 %v221_v23, %v134_v37  ;;  %v237_v41 = vadd.f32 %v231_v36, %v132_v38  ;;  %v886_v39 = vld [vmem:[%s2014_s2 + $0x80] sm:$0xff] }
 0x116   :  { %v321_v42 = vpop.f32.mrb[6].mxu0 }
 0x117   :  { %v1149_v43 = vpop.f32.mrb[7].mxu0  ;;  %v335_v45 = vrot.slane %v321_v42, 1  ;;  %v450_v42 = vld [vmem:[%s2014_s2 + $0x10] sm:$0xff] }
 0x118   :  { %v451_v43 = vld [vmem:[%s2014_s2 + $0x18] sm:$0xff] }
 0x11a   :  { %v326_v44 = vpop.f32.mrb[8].mxu0 }
 0x11b   :  { %v336_v46 = vrot.slane %v326_v44, 1  ;;  %v1152_v47 = vpop.f32.mrb[9].mxu0  ;;  %v1355_v44 = vpack.c.bf16 %v451_v43, %v450_v42 }
 0x11d   :  { %v340_v48 = vsel %vm338_vm2, %v335_v45, %v336_v46 }
 0x11e   :  { %v342_v50 = vadd.f32 %v340_v48, %v235_v40  ;;  %v331_v51 = vpop.f32.mrb[10].mxu0  ;;  %v887_v40 = vld [vmem:[%s2014_s2 + $0x88] sm:$0xff]  ;;  %v452_v48 = vld [vmem:[%s2014_s2 + $0x20] sm:$0xff] }
 0x11f   :  { %v337_v52 = vrot.slane %v331_v51, 1  ;;  %v1155_v53 = vpop.f32.mrb[11].mxu0 }
 0x120   :  { %v1728_v58 = vmul.f32 %v1719_v49, %v342_v50  ;;  %v453_v50 = vld [vmem:[%s2014_s2 + $0x28] sm:$0xff] }
 0x121   :  { %v339_v54 = vsel %vm338_vm2, %v336_v46, %v337_v52  ;;  %v341_v55 = vsel %vm338_vm2, %v337_v52, %v335_v45  ;;  %v888_v45 = vld [vmem:[%s2014_s2 + $0x90] sm:$0xff]  ;;  %v889_v46 = vld [vmem:[%s2014_s2 + $0x98] sm:$0xff]  ;;  %v1358_v51 = vpack.c.bf16 %v453_v50, %v452_v48  ;;  %v890_v52 = vld [vmem:[%s2014_s2 + $0xa0] sm:$0xff] }
 0x122   :  { %v343_v59 = vadd.f32 %v339_v54, %v236_v32  ;;  %v344_v61 = vadd.f32 %v341_v55, %v237_v41  ;;  %v371_v3 = vmul.f32 %v1728_v58, %v1728_v58  ;;  %v448_v32 = vld [vmem:[%s2014_s2] sm:$0xff]  ;;  %v1376_v41 = vpack.c.bf16 %v887_v40, %v886_v39  ;;  %v891_v53 = vld [vmem:[%s2014_s2 + $0xa8] sm:$0xff]  ;;  %v454_v55 = vld [vmem:[%s2014_s2 + $0x30] sm:$0xff] }
 0x123   :  { %v1352_v34 = vpack.c.bf16 %v449_v33, %v448_v32  ;;  %v1379_v47 = vpack.c.bf16 %v889_v46, %v888_v45  ;;  %v1382_v54 = vpack.c.bf16 %v891_v53, %v890_v52  ;;  %v900_v32 = vld [vmem:[%s2014_s2 + $0xf0] sm:$0xff]  ;;  %v901_v33 = vld [vmem:[%s2014_s2 + $0xf8] sm:$0xff]  ;;  %v1869_v45 = vsub.s32 0, %v1707_v21  ;;  %v885_v52 = vld [vmem:[%s2015_s3] ss:$0 sm:$0xff] }
 0x124   :  { %v1733_v63 = vmul.f32 %v1730_v62, %v343_v59  ;;  %v1736_v2 = vmul.f32 %v1725_v57, %v344_v61  ;;  %1377 = vmatpush3.bf16.msra.mxu0 %v1376_v41  ;;  %v455_v59 = vld [vmem:[%s2014_s2 + $0x38] sm:$0xff] }
 0x125   :  { %1353 = vmatpush3.bf16.msra.mxu1 %v1352_v34  ;;  %1378 = vmatprep.subr.bf16.mxu0 %v1438_v0  ;;  %v1361_v61 = vpack.c.bf16 %v455_v59, %v454_v55 }
 0x126   :  { %v363_v4 = vadd.f32 %v1733_v63, %v1728_v58  ;;  %v372_v5 = vmul.f32 %v1733_v63, %v1733_v63  ;;  %v373_v9 = vmul.f32 %v1736_v2, %v1736_v2  ;;  %1354 = vmatprep.subr.bf16.mxu1 %v1438_v0 }
 0x128   :  { %v374_v6 = vadd.f32 %v372_v5, %v371_v3  ;;  %v364_v7 = vadd.f32 %v363_v4, %v1736_v2  ;;  %1380 = vmatpush3.bf16.msra.mxu0 %v1379_v47  ;;  %v892_v3 = vld [vmem:[%s2014_s2 + $0xb0] sm:$0xff]  ;;  %v893_v4 = vld [vmem:[%s2014_s2 + $0xb8] sm:$0xff] }
 0x129   :  { %1356 = vmatpush3.bf16.msra.mxu1 %v1355_v44  ;;  %1381 = vmatprep.subr.bf16.mxu0 %v1438_v0 }
 0x12a   :  { %v365_v10 = vrot.slane %v364_v7, 4  ;;  %v375_v11 = vadd.f32 %v374_v6, %v373_v9  ;;  %1357 = vmatprep.subr.bf16.mxu1 %v1438_v0  ;;  %v1385_v6 = vpack.c.bf16 %v893_v4, %v892_v3 }
 0x12c   :  { %v366_v12 = vadd.f32 %v365_v10, %v364_v7  ;;  %v376_v13 = vrot.slane %v375_v11, 4  ;;  %1383 = vmatpush3.bf16.msra.mxu0 %v1382_v54  ;;  %v456_v10 = vld [vmem:[%s2014_s2 + $0x40] sm:$0xff] }
 0x12d   :  { %1359 = vmatpush3.bf16.msra.mxu1 %v1358_v51  ;;  %1384 = vmatprep.subr.bf16.mxu0 %v1438_v0 }
 0x12e   :  { %v367_v14 = vrot.slane %v366_v12, 2  ;;  %v377_v15 = vadd.f32 %v376_v13, %v375_v11  ;;  %1360 = vmatprep.subr.bf16.mxu1 %v1438_v0  ;;  %v457_v11 = vld [vmem:[%s2014_s2 + $0x48] sm:$0xff] }
 0x12f   :  { %v1364_v13 = vpack.c.bf16 %v457_v11, %v456_v10 }
 0x130   :  { %v368_v16 = vadd.f32 %v367_v14, %v366_v12  ;;  %v378_v17 = vrot.slane %v377_v15, 2  ;;  %1386 = vmatpush3.bf16.msra.mxu0 %v1385_v6  ;;  %v894_v14 = vld [vmem:[%s2014_s2 + $0xc0] sm:$0xff] }
 0x131   :  { %1362 = vmatpush3.bf16.msra.mxu1 %v1361_v61  ;;  %1387 = vmatprep.subr.bf16.mxu0 %v1438_v0  ;;  %v902_v61 = vld [vmem:[%s2014_s2 + $0x100] sm:$0xff] }
 0x132   :  { %v369_v18 = vrot.slane %v368_v16, 1  ;;  %v379_v19 = vadd.f32 %v378_v17, %v377_v15  ;;  %1363 = vmatprep.subr.bf16.mxu1 %v1438_v0  ;;  %v895_v15 = vld [vmem:[%s2014_s2 + $0xc8] sm:$0xff]  ;;  %v458_v17 = vld [vmem:[%s2014_s2 + $0x50] sm:$0xff] }
 0x134   :  { %v370_v20 = vadd.f32 %v369_v18, %v368_v16  ;;  %v380_v22 = vrot.slane %v379_v19, 1  ;;  %v1388_v16 = vpack.c.bf16 %v895_v15, %v894_v14  ;;  %v459_v18 = vld [vmem:[%s2014_s2 + $0x58] sm:$0xff]  ;;  %v906_v14 = vld [vmem:[%s2014_s2 + $0x120] sm:$0xff]  ;;  %v907_v15 = vld [vmem:[%s2014_s2 + $0x128] sm:$0xff] }
 0x135   :  { %1365 = vmatpush3.bf16.msra.mxu1 %v1364_v13 }
 0x136   :  { %382 = vrot.lane.b32.xlu1 %v370_v20, %s1442_s1  ;;  %v381_v23 = vadd.f32 %v380_v22, %v379_v19  ;;  %1389 = vmatpush3.bf16.msra.mxu0 %v1388_v16  ;;  %v1367_v19 = vpack.c.bf16 %v459_v18, %v458_v17  ;;  %v897_v22 = vld [vmem:[%s2014_s2 + $0xd8] sm:$0xff]  ;;  %v1406_v16 = vpack.c.bf16 %v907_v15, %v906_v14  ;;  %v908_v18 = vld [vmem:[%s2014_s2 + $0x130] sm:$0xff] }
 0x137   :  { %1366 = vmatprep.subr.bf16.mxu1 %v1438_v0  ;;  %1390 = vmatprep.subr.bf16.mxu0 %v1438_v0 }
 0x138   :  { %385 = vrot.lane.b32.xlu0 %v381_v23, %s1442_s1 }
 0x139   :  { %1368 = vmatpush3.bf16.msra.mxu1 %v1367_v19  ;;  %v909_v19 = vld [vmem:[%s2014_s2 + $0x138] sm:$0xff] }
 0x13a   :  { %1369 = vmatprep.subr.bf16.mxu1 %v1438_v0 }
 0x1a8   :  { %v383_v24 = vpop.permute.xlu1 %382 }
 0x1a9   :  { %v384_v25 = vadd.f32 %v383_v24, %v370_v20  ;;  %v896_v20 = vld [vmem:[%s2014_s2 + $0xd0] sm:$0xff]  ;;  %v460_v24 = vld [vmem:[%s2014_s2 + $0x60] sm:$0xff] }
 0x1aa   :  { %v386_v26 = vpop.permute.xlu0 %385 }
 0x1ab   :  { %v387_v27 = vadd.f32 %v386_v26, %v381_v23  ;;  %388 = vrot.lane.b32.xlu1 %v384_v25, %s1443_s30  ;;  %v1391_v23 = vpack.c.bf16 %v897_v22, %v896_v20  ;;  %v1409_v20 = vpack.c.bf16 %v909_v19, %v908_v18  ;;  %v910_v22 = vld [vmem:[%s2014_s2 + $0x140] sm:$0xff] }
 0x1ad   :  { %391 = vrot.lane.b32.xlu0 %v387_v27, %s1443_s30  ;;  %1392 = vmatpush3.bf16.msra.mxu0 %v1391_v23  ;;  %v911_v23 = vld [vmem:[%s2014_s2 + $0x148] sm:$0xff] }
 0x1ae   :  { %1393 = vmatprep.subr.bf16.mxu0 %v1438_v0 }
 0x21d   :  { %v389_v28 = vpop.permute.xlu1 %388 }
 0x21e   :  { %v390_v29 = vadd.f32 %v389_v28, %v384_v25  ;;  %v461_v25 = vld [vmem:[%s2014_s2 + $0x68] sm:$0xff] }
 0x21f   :  { %v392_v30 = vpop.permute.xlu0 %391  ;;  %v1370_v26 = vpack.c.bf16 %v461_v25, %v460_v24  ;;  %v899_v28 = vld [vmem:[%s2014_s2 + $0xe8] sm:$0xff]  ;;  %v1412_v24 = vpack.c.bf16 %v911_v23, %v910_v22  ;;  %v912_v25 = vld [vmem:[%s2014_s2 + $0x150] sm:$0xff] }
 0x220   :  { %v393_v31 = vadd.f32 %v392_v30, %v387_v27  ;;  %394 = vrot.lane.b32.xlu1 %v390_v29, %s1444_s7  ;;  %v898_v27 = vld [vmem:[%s2014_s2 + $0xe0] sm:$0xff] }
 0x221   :  { %v1394_v30 = vpack.c.bf16 %v899_v28, %v898_v27  ;;  %1371 = vmatpush3.bf16.msra.mxu1 %v1370_v26  ;;  %v913_v26 = vld [vmem:[%s2014_s2 + $0x158] sm:$0xff]  ;;  %v914_v28 = vld [vmem:[%s2014_s2 + $0x160] sm:$0xff] }
 0x222   :  { %397 = vrot.lane.b32.xlu0 %v393_v31, %s1444_s7  ;;  %1372 = vmatprep.subr.bf16.mxu1 %v1438_v0  ;;  %v1415_v27 = vpack.c.bf16 %v913_v26, %v912_v25 }
 0x223   :  { %1395 = vmatpush3.bf16.msra.mxu0 %v1394_v30 }
 0x224   :  { %1396 = vmatprep.subr.bf16.mxu0 %v1438_v0 }
 0x292   :  { %v395_v35 = vpop.permute.xlu1 %394 }
 0x293   :  { %v396_v36 = vadd.f32 %v395_v35, %v390_v29  ;;  %v462_v29 = vld [vmem:[%s2014_s2 + $0x70] sm:$0xff]  ;;  %v1397_v35 = vpack.c.bf16 %v901_v33, %v900_v32  ;;  %v917_v32 = vld [vmem:[%s2014_s2 + $0x178] sm:$0xff] }
 0x294   :  { %v398_v37 = vpop.permute.xlu0 %397 }
 0x295   :  { %v399_v38 = vadd.f32 %v398_v37, %v393_v31  ;;  %400 = vrot.lane.b32.xlu1 %v396_v36, %s1445_s11  ;;  %v463_v31 = vld [vmem:[%s2014_s2 + $0x78] sm:$0xff]  ;;  %1398 = vmatpush3.bf16.msra.mxu0 %v1397_v35 }
 0x296   :  { %v1373_v34 = vpack.c.bf16 %v463_v31, %v462_v29  ;;  %v915_v29 = vld [vmem:[%s2014_s2 + $0x168] sm:$0xff]  ;;  %v916_v31 = vld [vmem:[%s2014_s2 + $0x170] sm:$0xff] }
 0x297   :  { %403 = vrot.lane.b32.xlu0 %v399_v38, %s1445_s11  ;;  %v1418_v30 = vpack.c.bf16 %v915_v29, %v914_v28  ;;  %v1421_v33 = vpack.c.bf16 %v917_v32, %v916_v31 }
 0x298   :  { %1374 = vmatpush3.bf16.msra.mxu1 %v1373_v34 }
 0x299   :  { %1399 = vmatprep.subr.bf16.mxu1 %v1438_v0 }
 0x307   :  { %v401_v5 = vpop.permute.xlu1 %400 }
 0x308   :  { %v402_v7 = vadd.f32 %v401_v5, %v396_v36 }
 0x309   :  { %v404_v9 = vpop.permute.xlu0 %403 }
 0x30a   :  { %v405_v12 = vadd.f32 %v404_v9, %v399_v38  ;;  %406 = vrot.lane.b32.xlu1 %v402_v7, %s1446_s20  ;;  %v905_v9 = vld [vmem:[%s2014_s2 + $0x118] sm:$0xff] }
 0x30c   :  { %409 = vrot.lane.b32.xlu0 %v405_v12, %s1446_s20 }
 0x37c   :  { %v407_v36 = vpop.permute.xlu1 %406 }
 0x37d   :  { %v408_v37 = vadd.f32 %v407_v36, %v402_v7 }
 0x37e   :  { %v410_v38 = vpop.permute.xlu0 %409 }
 0x37f   :  { %v412_v39 = vmul.f32 0.001953125, %v408_v37  ;;  %v411_v40 = vadd.f32 %v410_v38, %v405_v12 }
 0x381   :  { %v414_v41 = vmul.f32 %v412_v39, %v412_v39  ;;  %v413_v42 = vmul.f32 0.001953125, %v411_v40  ;;  %v419_v46 = vrot.slane %v412_v39, %v1869_v45 }
 0x383   :  { %v415_v43 = vsub.f32 %v413_v42, %v414_v41  ;;  %v420_v48 = vsub.f32 %v1728_v58, %v419_v46  ;;  %v421_v50 = vsub.f32 %v1733_v63, %v419_v46  ;;  %v422_v53 = vsub.f32 %v1736_v2, %v419_v46  ;;  %v903_v58 = vld [vmem:[%s2014_s2 + $0x108] sm:$0xff]  ;;  %v904_v2 = vld [vmem:[%s2014_s2 + $0x110] sm:$0xff] }
 0x384   :  { %v1400_v5 = vpack.c.bf16 %v903_v58, %v902_v61  ;;  %v1403_v11 = vpack.c.bf16 %v905_v9, %v904_v2 }
 0x385   :  { %v423_v44 = vadd.f32 1e-05, %v415_v43 }
 0x387   :  { %1434 = vrsqrt.f32 %v423_v44 }
 0x391   :  { %v1435_v47 = vpop.eup %1434 }
 0x392   :  { %v428_v51 = vrot.slane %v1435_v47, %v1869_v45 }
 0x394   :  { %v429_v54 = vmul.f32 %v428_v51, %v420_v48  ;;  %v430_v55 = vmul.f32 %v428_v51, %v421_v50  ;;  %v431_v3 = vmul.f32 %v428_v51, %v422_v53 }
 0x396   :  { %v438_v59 = vadd.f32 %v885_v52, %v429_v54  ;;  %v439_v63 = vadd.f32 %v885_v52, %v430_v55  ;;  %v440_v10 = vadd.f32 %v885_v52, %v431_v3 }
 0x398   :  { %v441_v4 = vmax.f32 %v438_v59, 0.0  ;;  %v442_v7 = vmax.f32 %v439_v63, 0.0  ;;  %v443_v13 = vmax.f32 %v440_v10, 0.0 }
 0x39a   :  { %v444_v6 = vmul.f32 %v441_v4, %v1719_v49  ;;  %v445_v12 = vmul.f32 %v442_v7, %v1730_v62  ;;  %v446_v17 = vmul.f32 %v443_v13, %v1725_v57 }
 0x39c   :  { %1189 = vmatmul.mubr.f32.vlgmr.msra.gmra.mrb[6].mxu1 %v444_v6  ;;  %1230 = vmatmul.mubr.f32.vlgmr.msra.gmra.mrb[12].mxu0 %v444_v6 }
 0x39d   :  { %1401 = vmatpush3.bf16.msra.mxu1 %v1400_v5  ;;  %1191 = vmatprep.mubr.msk.f32.mxu1 %vm1439_vm0, %v1440_v8 }
 0x39e   :  { %1232 = vmatprep.mubr.msk.f32.mxu0 %vm1439_vm0, %v1440_v8  ;;  %1402 = vmatprep.subr.bf16.mxu1 %v1438_v0 }
 0x3a0   :  { %1192 = vmatmul.mubr.f32.gmra.mrb[8].mxu1 %v445_v12  ;;  %1233 = vmatmul.mubr.f32.gmra.mrb[14].mxu0 %v445_v12 }
 0x3a1   :  { %1404 = vmatpush3.bf16.msra.mxu1 %v1403_v11  ;;  %1194 = vmatprep.mubr.msk.f32.mxu1 %vm1439_vm0, %v1440_v8 }
 0x3a2   :  { %1235 = vmatprep.mubr.msk.f32.mxu0 %vm1439_vm0, %v1440_v8  ;;  %1405 = vmatprep.subr.bf16.mxu1 %v1438_v0 }
 0x3a4   :  { %1195 = vmatmul.mubr.f32.gmra.mrb[10].mxu1 %v446_v17  ;;  %1236 = vmatmul.mubr.f32.gmra.mrb[16].mxu0 %v446_v17 }
 0x3a5   :  { %1407 = vmatpush3.bf16.msra.mxu1 %v1406_v16  ;;  %1270 = vmatprep.mubr.msk.f32.mxu1 %vm1439_vm0, %v1440_v8 }
 0x3a6   :  { %1408 = vmatprep.subr.bf16.mxu1 %v1438_v0 }
 0x3a9   :  { %1410 = vmatpush3.bf16.msra.mxu1 %v1409_v20 }
 0x3aa   :  { %1411 = vmatprep.subr.bf16.mxu1 %v1438_v0 }
 0x3ad   :  { %1413 = vmatpush3.bf16.msra.mxu1 %v1412_v24 }
 0x3ae   :  { %1414 = vmatprep.subr.bf16.mxu1 %v1438_v0 }
 0x3b1   :  { %1416 = vmatpush3.bf16.msra.mxu1 %v1415_v27 }
 0x3b2   :  { %1417 = vmatprep.subr.bf16.mxu1 %v1438_v0 }
 0x3b5   :  { %1419 = vmatpush3.bf16.msra.mxu1 %v1418_v30 }
 0x3b6   :  { %1420 = vmatprep.subr.bf16.mxu1 %v1438_v0 }
 0x3b9   :  { %1422 = vmatpush3.bf16.msra.mxu1 %v1421_v33 }
 0x3bc   :  { %1271 = vmatmul.mubr.f32.vlgmr.msra.gmra.mrb[12].mxu1 %v444_v6 }
 0x3bd   :  { %1273 = vmatprep.mubr.msk.f32.mxu1 %vm1439_vm0, %v1440_v8 }
 0x3c0   :  { %1274 = vmatmul.mubr.f32.gmra.mrb[14].mxu1 %v445_v12 }
 0x3c1   :  { %1276 = vmatprep.mubr.msk.f32.mxu1 %vm1439_vm0, %v1440_v8 }
 0x3c4   :  { %1277 = vmatmul.mubr.f32.gmra.mrb[16].mxu1 %v446_v17 }
 0x46f   :  { %v530_v34 = vpop.f32.mrb[6].mxu1  ;;  %v636_v35 = vpop.f32.mrb[12].mxu0 }
 0x470   :  { %v1190_v36 = vpop.f32.mrb[7].mxu1  ;;  %v1231_v37 = vpop.f32.mrb[13].mxu0  ;;  %v544_v40 = vrot.slane %v530_v34, 7 }
 0x473   :  { %v535_v38 = vpop.f32.mrb[8].mxu1  ;;  %v641_v39 = vpop.f32.mrb[14].mxu0 }
 0x474   :  { %v545_v41 = vrot.slane %v535_v38, 7  ;;  %v1193_v42 = vpop.f32.mrb[9].mxu1  ;;  %v1234_v0 = vpop.f32.mrb[15].mxu0 }
 0x476   :  { %v548_v43 = vsel %vm131_vm1, %v544_v40, %v545_v41 }
 0x477   :  { %v651_v44 = vadd.f32 %v641_v39, %v548_v43  ;;  %v540_v46 = vpop.f32.mrb[10].mxu1  ;;  %v646_v47 = vpop.f32.mrb[16].mxu0 }
 0x478   :  { %v546_v48 = vrot.slane %v540_v46, 7  ;;  %v1196_v50 = vpop.f32.mrb[11].mxu1  ;;  %v1237_v8 = vpop.f32.mrb[17].mxu0 }
 0x47a   :  { %v549_v51 = vsel %vm131_vm1, %v546_v48, %v544_v40  ;;  %v547_v52 = vsel %vm131_vm1, %v545_v41, %v546_v48 }
 0x47b   :  { %v650_v53 = vadd.f32 %v636_v35, %v549_v51  ;;  %v652_v54 = vadd.f32 %v646_v47, %v547_v52 }
 0x48f   :  { %v736_v55 = vpop.f32.mrb[12].mxu1 }
 0x490   :  { %v1272_v59 = vpop.f32.mrb[13].mxu1  ;;  %v750_v58 = vrot.slane %v736_v55, 1 }
 0x493   :  { %v741_v61 = vpop.f32.mrb[14].mxu1 }
 0x494   :  { %v751_v63 = vrot.slane %v741_v61, 1  ;;  %v1275_v3 = vpop.f32.mrb[15].mxu1 }
 0x496   :  { %v754_v4 = vsel %vm338_vm2, %v750_v58, %v751_v63 }
 0x497   :  { %v756_v5 = vadd.f32 %v754_v4, %v650_v53  ;;  %v746_v6 = vpop.f32.mrb[16].mxu1 }
 0x498   :  { %v752_v7 = vrot.slane %v746_v6, 1  ;;  %v1278_v2 = vpop.f32.mrb[17].mxu1  ;;  %v918_v6 = vld [vmem:[%s2016_s4] ss:$0 sm:$0xff] }
 0x499   :  { %v1964_v11 = vmul.f32 %v756_v5, %v1719_v49 }
 0x49a   :  { %v753_v9 = vsel %vm338_vm2, %v751_v63, %v752_v7  ;;  %v755_v10 = vsel %vm338_vm2, %v752_v7, %v750_v58 }
 0x49b   :  { %v757_v12 = vadd.f32 %v753_v9, %v651_v44  ;;  %v758_v13 = vadd.f32 %v755_v10, %v652_v54  ;;  %v770_v16 = vmul.f32 %v1964_v11, %v1964_v11 }
 0x49d   :  { %v1967_v14 = vmul.f32 %v757_v12, %v1730_v62  ;;  %v1970_v15 = vmul.f32 %v758_v13, %v1725_v57 }
 0x49f   :  { %v771_v17 = vmul.f32 %v1967_v14, %v1967_v14  ;;  %v762_v21 = vadd.f32 %v1967_v14, %v1964_v11  ;;  %v772_v18 = vmul.f32 %v1970_v15, %v1970_v15 }
 0x4a1   :  { %v763_v49 = vadd.f32 %v762_v21, %v1970_v15  ;;  %v773_v19 = vadd.f32 %v771_v17, %v770_v16 }
 0x4a3   :  { %v764_v62 = vrot.slane %v763_v49, 4  ;;  %v774_v20 = vadd.f32 %v773_v19, %v772_v18 }
 0x4a5   :  { %v765_v22 = vadd.f32 %v764_v62, %v763_v49  ;;  %v775_v57 = vrot.slane %v774_v20, 4 }
 0x4a7   :  { %v766_v23 = vrot.slane %v765_v22, 2  ;;  %v776_v24 = vadd.f32 %v775_v57, %v774_v20 }
 0x4a9   :  { %v767_v25 = vadd.f32 %v766_v23, %v765_v22  ;;  %v777_v26 = vrot.slane %v776_v24, 2 }
 0x4ab   :  { %v768_v27 = vrot.slane %v767_v25, 1  ;;  %v778_v28 = vadd.f32 %v777_v26, %v776_v24 }
 0x4ad   :  { %v769_v29 = vadd.f32 %v768_v27, %v767_v25  ;;  %v779_v30 = vrot.slane %v778_v28, 1 }
 0x4af   :  { %781 = vrot.lane.b32.xlu1 %v769_v29, %s1442_s1  ;;  %v780_v31 = vadd.f32 %v779_v30, %v778_v28 }
 0x4b1   :  { %784 = vrot.lane.b32.xlu0 %v780_v31, %s1442_s1 }
 0x521   :  { %v782_v32 = vpop.permute.xlu1 %781 }
 0x522   :  { %v783_v33 = vadd.f32 %v782_v32, %v769_v29 }
 0x523   :  { %v785_v34 = vpop.permute.xlu0 %784 }
 0x524   :  { %v786_v35 = vadd.f32 %v785_v34, %v780_v31  ;;  %787 = vrot.lane.b32.xlu1 %v783_v33, %s1443_s30 }
 0x526   :  { %790 = vrot.lane.b32.xlu0 %v786_v35, %s1443_s30 }
 0x596   :  { %v788_v36 = vpop.permute.xlu1 %787 }
 0x597   :  { %v789_v37 = vadd.f32 %v788_v36, %v783_v33 }
 0x598   :  { %v791_v38 = vpop.permute.xlu0 %790 }
 0x599   :  { %v792_v39 = vadd.f32 %v791_v38, %v786_v35  ;;  %793 = vrot.lane.b32.xlu1 %v789_v37, %s1444_s7 }
 0x59b   :  { %796 = vrot.lane.b32.xlu0 %v792_v39, %s1444_s7 }
 0x60b   :  { %v794_v40 = vpop.permute.xlu1 %793 }
 0x60c   :  { %v795_v41 = vadd.f32 %v794_v40, %v789_v37 }
 0x60d   :  { %v797_v42 = vpop.permute.xlu0 %796 }
 0x60e   :  { %v798_v0 = vadd.f32 %v797_v42, %v792_v39  ;;  %799 = vrot.lane.b32.xlu1 %v795_v41, %s1445_s11 }
 0x610   :  { %802 = vrot.lane.b32.xlu0 %v798_v0, %s1445_s11 }
 0x680   :  { %v800_v43 = vpop.permute.xlu1 %799 }
 0x681   :  { %v801_v44 = vadd.f32 %v800_v43, %v795_v41 }
 0x682   :  { %v803_v46 = vpop.permute.xlu0 %802 }
 0x683   :  { %v804_v47 = vadd.f32 %v803_v46, %v798_v0  ;;  %805 = vrot.lane.b32.xlu1 %v801_v44, %s1446_s20 }
 0x685   :  { %808 = vrot.lane.b32.xlu0 %v804_v47, %s1446_s20 }
 0x6f5   :  { %v806_v48 = vpop.permute.xlu1 %805 }
 0x6f6   :  { %v807_v50 = vadd.f32 %v806_v48, %v801_v44 }
 0x6f7   :  { %v809_v8 = vpop.permute.xlu0 %808 }
 0x6f8   :  { %v811_v51 = vmul.f32 0.001953125, %v807_v50  ;;  %v810_v52 = vadd.f32 %v809_v8, %v804_v47 }
 0x6fa   :  { %v813_v53 = vmul.f32 %v811_v51, %v811_v51  ;;  %v812_v54 = vmul.f32 0.001953125, %v810_v52  ;;  %v818_v61 = vrot.slane %v811_v51, %v1869_v45 }
 0x6fc   :  { %v814_v55 = vsub.f32 %v812_v54, %v813_v53  ;;  %v819_v63 = vsub.f32 %v1964_v11, %v818_v61  ;;  %v820_v3 = vsub.f32 %v1967_v14, %v818_v61  ;;  %v821_v4 = vsub.f32 %v1970_v15, %v818_v61 }
 0x6fe   :  { %v822_v59 = vadd.f32 1e-05, %v814_v55 }
 0x700   :  { %1436 = vrsqrt.f32 %v822_v59 }
 0x70a   :  { %v1437_v58 = vpop.eup %1436 }
 0x70b   :  { %v827_v5 = vrot.slane %v1437_v58, %v1869_v45 }
 0x70d   :  { %v828_v7 = vmul.f32 %v827_v5, %v819_v63  ;;  %v829_v2 = vmul.f32 %v827_v5, %v820_v3  ;;  %v830_v9 = vmul.f32 %v827_v5, %v821_v4 }
 0x70f   :  { %v837_v10 = vadd.f32 %v918_v6, %v828_v7  ;;  %v838_v12 = vadd.f32 %v918_v6, %v829_v2  ;;  %v839_v13 = vadd.f32 %v918_v6, %v830_v9 }
 0x711   :  { %v840_v16 = vadd.f32 %v837_v10, %v1616_v56  ;;  %v841_v11 = vadd.f32 %v838_v12, %v1632_v60  ;;  %v842_v14 = vadd.f32 %v839_v13, %v1650_v1 }
 0x713   :  { %v843_v17 = vmax.f32 %v840_v16, 0.0  ;;  %v844_v15 = vmax.f32 %v841_v11, 0.0  ;;  %v845_v21 = vmax.f32 %v842_v14, 0.0 }
 0x715   :  { %846 = vst [vmem:[%s2017_s6] sm:$0xff] %v843_v17  ;;  %847 = vst [vmem:[%s2017_s6 + $0x8] sm:$0xff] %v844_v15 }
 0x716   :  { %848 = vst [vmem:[%s2017_s6 + $0x10] sm:$0xff] %v845_v21 }

</bundles_post_ra>
